<compile_context>
chip_gen: v7x
topology: tpu7x:2x2x1
jax: 0.10.0
libtpu: 0.0.40
codegen_flags: <defaults>
</compile_context>

<pallas_src>
import jax
import jax.numpy as jnp
from jax import lax
from jax.experimental import pallas as pl
from jax.experimental.pallas import tpu as pltpu

# ----------------------------- config (small, synthetic) -----------------------------
N_SYMBOLS = 40            # len(symbols) + 1
EMB_DIM = 32              # symbols_embedding_dim
ENC_CONV_LAYERS = 3
ENC_KERNEL = 5
ENC_LSTM_H = 16           # per direction -> encoder dim = 32
ENC_DIM = 2 * ENC_LSTM_H
Z_ACC = 8
Z_SPK = 8
LAT_DIM = Z_ACC + Z_SPK
LIN_PROJ_IN = ENC_DIM + LAT_DIM   # 48
LIN_PROJ_OUT = 32                 # decoder memory dim
N_MEL = 16
PRENET_DIM = 16
ATTN_RNN_H = 32
DEC_RNN_H = 32
ATTN_DIM = 16
LOC_FILTERS = 4
LOC_KERNEL = 7
POSTNET_CH = 32
POSTNET_KERNEL = 5
N_ACCENTS = 4
MLVAE_HIDDEN = 32


# ----------------------------- small fused kernels -----------------------------

def pallas_prenet_proj(x, w1, w2, w3):
    """Fused prenet (2x ReLU linear, no bias) + hoisted attention-RNN input projection.
    x: [B, T, n_mel] -> [B, T, 4*ATTN_RNN_H] (lane-dense, 128 wide)."""
    B, T, C = x.shape
    M = B * T
    P1, P2, N = w1.shape[1], w2.shape[1], w3.shape[1]
    x2 = x.reshape(M, C).astype(jnp.float32)

    def kern(x_ref, w1_ref, w2_ref, w3_ref, o_ref):
        h = jnp.maximum(jnp.dot(x_ref[...], w1_ref[...],
                                preferred_element_type=jnp.float32), 0.0)
        h = jnp.maximum(jnp.dot(h, w2_ref[...],
                                preferred_element_type=jnp.float32), 0.0)
        o_ref[...] = jnp.dot(h, w3_ref[...], preferred_element_type=jnp.float32)

    out = pl.pallas_call(
        kern,
        out_shape=jax.ShapeDtypeStruct((M, N), jnp.float32),
        grid=(1,),
        in_specs=[pl.BlockSpec((M, C), lambda i: (0, 0)),
                  pl.BlockSpec((C, P1), lambda i: (0, 0)),
                  pl.BlockSpec((P1, P2), lambda i: (0, 0)),
                  pl.BlockSpec((P2, N), lambda i: (0, 0))],
        out_specs=pl.BlockSpec((M, N), lambda i: (0, 0)),
    )(x2, w1.astype(jnp.float32), w2.astype(jnp.float32), w3.astype(jnp.float32))
    return out.reshape(B, T, N)


def pallas_mlvae_adv(mels, p, adv_p):
    """Fused MLVAE reference encoder (mean-pool + relu linear + 4 gaussian heads)
    plus the adversarial accent classifier softmax head."""
    B, T, C = mels.shape
    H = MLVAE_HIDDEN
    heads_w = jnp.concatenate([p["mu_acc_w"], p["lv_acc_w"],
                               p["mu_spk_w"], p["lv_spk_w"]], axis=1).astype(jnp.float32)
    heads_b = jnp.concatenate([p["mu_acc_b"], p["lv_acc_b"],
                               p["mu_spk_b"], p["lv_spk_b"]], axis=0)
    N = heads_w.shape[1]
    NA = adv_p["w"].shape[1]
    inv_t = 1.0 / float(T)

    def kern(x_ref, rw_r, rb_r, hw_r, hb_r, aw_r, ab_r, heads_ref, prob_ref):
        pooled = jnp.concatenate(
            [jnp.sum(x_ref[b], axis=0, keepdims=True) * inv_t for b in range(B)], axis=0)
        h = jnp.maximum(jnp.dot(pooled, rw_r[...],
                                preferred_element_type=jnp.float32) + rb_r[...], 0.0)
        heads = jnp.dot(h, hw_r[...], preferred_element_type=jnp.float32) + hb_r[...]
        heads_ref[...] = heads
        z_spk = heads[:, 2 * Z_ACC:2 * Z_ACC + Z_SPK]
        logits = jnp.dot(z_spk, aw_r[...], preferred_element_type=jnp.float32) + ab_r[...]
        prob_ref[...] = jax.nn.softmax(logits, axis=-1)

    heads, prob = pl.pallas_call(
        kern,
        out_shape=(jax.ShapeDtypeStruct((B, N), jnp.float32),
                   jax.ShapeDtypeStruct((B, NA), jnp.float32)),
        grid=(1,),
        in_specs=[pl.BlockSpec((B, T, C), lambda i: (0, 0, 0)),
                  pl.BlockSpec((C, H), lambda i: (0, 0)),
                  pl.BlockSpec((1, H), lambda i: (0, 0)),
                  pl.BlockSpec((H, N), lambda i: (0, 0)),
                  pl.BlockSpec((1, N), lambda i: (0, 0)),
                  pl.BlockSpec((Z_SPK, NA), lambda i: (0, 0)),
                  pl.BlockSpec((1, NA), lambda i: (0, 0))],
        out_specs=(pl.BlockSpec((B, N), lambda i: (0, 0)),
                   pl.BlockSpec((B, NA), lambda i: (0, 0))),
    )(mels.astype(jnp.float32), p["ref_w"].astype(jnp.float32),
      p["ref_b"].reshape(1, H).astype(jnp.float32),
      heads_w, heads_b.reshape(1, N).astype(jnp.float32),
      adv_p["w"].astype(jnp.float32), adv_p["b"].reshape(1, NA).astype(jnp.float32))
    return heads, prob


# ----------------------------- fused conv stacks -----------------------------

def pallas_encoder_convs(x, layers):
    """3 x (conv1d + BN(eval) + ReLU) fused; grid=(B,) "parallel" (v7x megacore).
    Padding handled via a pre-zeroed VMEM scratch (no concatenate copies)."""
    B, C, T = x.shape
    pad = ENC_KERNEL // 2
    Tp = T + 2 * pad
    L = len(layers)
    w = jnp.stack([jnp.transpose(l["w"].astype(jnp.float32), (2, 0, 1)) for l in layers],
                  axis=0)                                              # [L, K, C, C]
    b = jnp.stack([l["b"].reshape(C, 1).astype(jnp.float32) for l in layers], axis=0)
    sc = jnp.stack([l["bn_scale"].reshape(C, 1).astype(jnp.float32) for l in layers], axis=0)
    sh = jnp.stack([l["bn_shift"].reshape(C, 1).astype(jnp.float32) for l in layers], axis=0)

    def kern(x_ref, w_ref, b_ref, sc_ref, sh_ref, o_ref, xpad_s):
        xpad_s[...] = jnp.zeros((C, Tp), jnp.float32)
        xpad_s[:, pad:pad + T] = x_ref[0]
        for layer in range(L):
            acc = jnp.zeros((C, T), jnp.float32)
            for k in range(ENC_KERNEL):                                # static unroll over taps
                acc = acc + jnp.dot(w_ref[layer, k], xpad_s[:, k:k + T],
                                    preferred_element_type=jnp.float32)
            y = jnp.maximum((acc + b_ref[layer]) * sc_ref[layer] + sh_ref[layer], 0.0)
            if layer < L - 1:
                xpad_s[:, pad:pad + T] = y       # interior-only re-pad in VMEM scratch
            else:
                o_ref[0] = y

    return pl.pallas_call(
        kern,
        out_shape=jax.ShapeDtypeStruct((B, C, T), jnp.float32),
        grid=(B,),
        in_specs=[pl.BlockSpec((1, C, T), lambda bi: (bi, 0, 0)),
                  pl.BlockSpec((L, ENC_KERNEL, C, C), lambda bi: (0, 0, 0, 0)),
                  pl.BlockSpec((L, C, 1), lambda bi: (0, 0, 0)),
                  pl.BlockSpec((L, C, 1), lambda bi: (0, 0, 0)),
                  pl.BlockSpec((L, C, 1), lambda bi: (0, 0, 0))],
        out_specs=pl.BlockSpec((1, C, T), lambda bi: (bi, 0, 0)),
        scratch_shapes=[pltpu.VMEM((C, Tp), jnp.float32)],
        compiler_params=pltpu.CompilerParams(dimension_semantics=("parallel",)),
    )(x.astype(jnp.float32), w, b, sc, sh)


def pallas_postnet(x, layers):
    """3 x (conv1d + BN(eval) + tanh/tanh/linear) fused; grid=(B,) "parallel".
    Padding via a shared pre-zeroed [POSTNET_CH, T+2*pad] VMEM scratch."""
    B, Cin0, T = x.shape
    pad = POSTNET_KERNEL // 2
    Tp = T + 2 * pad
    CH = POSTNET_CH

    def prep(l):
        cout = l["w"].shape[0]
        return (jnp.transpose(l["w"].astype(jnp.float32), (2, 0, 1)),          # [K, Cout, Cin]
                l["b"].reshape(cout, 1).astype(jnp.float32),
                l["bn_scale"].reshape(cout, 1).astype(jnp.float32),
                l["bn_shift"].reshape(cout, 1).astype(jnp.float32))

    (w1, b1, s1, h1), (w2, b2, s2, h2), (w3, b3, s3, h3) = [prep(l) for l in layers]

    def kern(x_ref, w1r, b1r, s1r, h1r, w2r, b2r, s2r, h2r, w3r, b3r, s3r, h3r,
             o_ref, xpad_s):
        xpad_s[...] = jnp.zeros((CH, Tp), jnp.float32)
        xpad_s[:Cin0, pad:pad + T] = x_ref[0]

        def conv(cin, w_r, b_r, s_r, h_r):
            cout = w_r.shape[1]
            acc = jnp.zeros((cout, T), jnp.float32)
            for k in range(POSTNET_KERNEL):
                acc = acc + jnp.dot(w_r[k], xpad_s[:cin, k:k + T],
                                    preferred_element_type=jnp.float32)
            return (acc + b_r[...]) * s_r[...] + h_r[...]

        y1 = jnp.tanh(conv(Cin0, w1r, b1r, s1r, h1r))
        xpad_s[:, pad:pad + T] = y1
        y2 = jnp.tanh(conv(CH, w2r, b2r, s2r, h2r))
        xpad_s[:, pad:pad + T] = y2
        o_ref[0] = conv(CH, w3r, b3r, s3r, h3r)

    full = lambda a: pl.BlockSpec(a.shape, lambda bi: (0,) * a.ndim)
    return pl.pallas_call(
        kern,
        out_shape=jax.ShapeDtypeStruct((B, N_MEL, T), jnp.float32),
        grid=(B,),
        in_specs=[pl.BlockSpec((1, Cin0, T), lambda bi: (bi, 0, 0)),
                  full(w1), full(b1), full(s1), full(h1),
                  full(w2), full(b2), full(s2), full(h2),
                  full(w3), full(b3), full(s3), full(h3)],
        out_specs=pl.BlockSpec((1, N_MEL, T), lambda bi: (bi, 0, 0)),
        scratch_shapes=[pltpu.VMEM((CH, Tp), jnp.float32)],
        compiler_params=pltpu.CompilerParams(dimension_semantics=("parallel",)),
    )(x.astype(jnp.float32), w1, b1, s1, h1, w2, b2, s2, h2, w3, b3, s3, h3)


# ----------------------------- fused encoder BiLSTM -----------------------------

def pallas_bilstm(xt, fwd, bwd):
    """Bidirectional LSTM: grid=(2 directions,) "parallel", in-kernel fori_loop over T.
    xt: [T, B, D] -> [B, T, 2*H].  Input projection hoisted to one [T*B, D] matmul."""
    T, B, D = xt.shape
    H = ENC_LSTM_H

    def perm_gates(w):   # [i, f, g, o] -> [i, f, o, g]
        return jnp.concatenate([w[..., :2 * H], w[..., 3 * H:4 * H], w[..., 2 * H:3 * H]],
                               axis=-1)

    wih = jnp.stack([perm_gates(fwd["w_ih"]), perm_gates(bwd["w_ih"])], 0).astype(jnp.float32)
    whh = jnp.stack([perm_gates(fwd["w_hh"]), perm_gates(bwd["w_hh"])], 0).astype(jnp.float32)
    bb = jnp.stack([perm_gates(fwd["b"]).reshape(1, 4 * H),
                    perm_gates(bwd["b"]).reshape(1, 4 * H)], 0).astype(jnp.float32)
    x2 = xt.reshape(T * B, D).astype(jnp.float32)

    def kern(x_ref, wih_ref, whh_ref, b_ref, o_ref, xg_s):
        d = pl.program_id(0)
        # hoisted input projection for all time steps at once (better MXU row fill).
        xg_s[...] = (jnp.dot(x_ref[...], wih_ref[0], preferred_element_type=jnp.float32)
                     + b_ref[0])
        whh_l = whh_ref[0]

        def step(tt, carry):
            h, c = carry
            idx = (1 - d) * tt + d * (T - 1 - tt)      # fwd walks t, bwd walks T-1-t
            xg = xg_s[pl.ds(idx * B, B), :]            # [B, 4H]
            gates = xg + jnp.dot(h, whh_l, preferred_element_type=jnp.float32)
            sg = jax.nn.sigmoid(gates[:, :3 * H])
            i, f, o = sg[:, :H], sg[:, H:2 * H], sg[:, 2 * H:3 * H]
            g = jnp.tanh(gates[:, 3 * H:])
            c = f * c + i * g
            h = o * jnp.tanh(c)
            o_ref[0, pl.ds(idx, 1), :, :] = h[None]
            return (h, c)

        lax.fori_loop(0, T, step,
                      (jnp.zeros((B, H), jnp.float32), jnp.zeros((B, H), jnp.float32)))

    hs = pl.pallas_call(
        kern,
        out_shape=jax.ShapeDtypeStruct((2, T, B, H), jnp.float32),
        grid=(2,),
        in_specs=[pl.BlockSpec((T * B, D), lambda d: (0, 0)),
                  pl.BlockSpec((1, D, 4 * H), lambda d: (d, 0, 0)),
                  pl.BlockSpec((1, H, 4 * H), lambda d: (d, 0, 0)),
                  pl.BlockSpec((1, 1, 4 * H), lambda d: (d, 0, 0))],
        out_specs=pl.BlockSpec((1, T, B, H), lambda d: (d, 0, 0, 0)),
        scratch_shapes=[pltpu.VMEM((T * B, 4 * H), jnp.float32)],
        compiler_params=pltpu.CompilerParams(dimension_semantics=("parallel",)),
    )(x2, wih, whh, bb)

    # TODO(synk): packed-sequence src_lens handling for the backward direction omitted.
    out = jnp.concatenate([hs[0], hs[1]], axis=-1)    # [T, B, 2H]
    return jnp.transpose(out, (1, 0, 2))              # [B, T, 2H]


# ----------------------------- fused decoder -----------------------------

def pallas_decoder(dec_p, lp_p, enc_out, vae, decoder_inputs, memory_lengths):
    """Entire teacher-forced decoder as one pallas_call: grid=(B,) "parallel", in-kernel
    fori_loop over T_mel.  lin_proj and processed_memory are fused into the setup."""
    B, T_src, enc_dim = enc_out.shape
    n_mel, T_mel = decoder_inputs.shape[1], decoder_inputs.shape[2]
    E = LIN_PROJ_OUT
    A = ATTN_DIM
    AH = ATTN_RNN_H
    DH = DEC_RNN_H
    NM1 = N_MEL + 1
    K = LOC_KERNEL
    pad = K // 2

    def perm_gates(w, h):   # [i, f, g, o] -> [i, f, o, g]
        return jnp.concatenate([w[..., :2 * h], w[..., 3 * h:4 * h], w[..., 2 * h:3 * h]],
                               axis=-1)

    arnn, drnn = dec_p["attn_rnn"], dec_p["dec_rnn"]
    a_wih = perm_gates(arnn["w_ih"], AH).astype(jnp.float32)
    a_whh = perm_gates(arnn["w_hh"], AH).astype(jnp.float32)
    a_b = perm_gates(arnn["b"], AH).reshape(1, 4 * AH).astype(jnp.float32)
    d_wih = perm_gates(drnn["w_ih"], DH).astype(jnp.float32)
    d_whh = perm_gates(drnn["w_hh"], DH).astype(jnp.float32)
    d_b = perm_gates(drnn["b"], DH).reshape(1, 4 * DH).astype(jnp.float32)
    awihx, awihc = a_wih[:PRENET_DIM], a_wih[PRENET_DIM:]
    dwihh, dwihc = d_wih[:AH], d_wih[AH:]

    # teacher-forced prenet inputs: frame t uses [go, mel_0, ..., mel_{T-2}][t]
    frames = jnp.transpose(decoder_inputs, (0, 2, 1)).astype(jnp.float32)   # [B, T_mel, n_mel]
    dec_in = jnp.concatenate([jnp.zeros((B, 1, n_mel), jnp.float32), frames[:, :-1]], axis=1)
    # TODO(synk): always-on prenet dropout (p=0.5) omitted for a deterministic forward.
    pre = pallas_prenet_proj(dec_in, dec_p["prenet_w1"], dec_p["prenet_w2"], awihx)

    mask_col = (jnp.arange(T_src)[None, :, None]
                < memory_lengths[:, None, None]).astype(jnp.float32)        # [B, T_src, 1]

    # Fold location conv + location dense into one [2K, A] matrix (row = c*K + k).
    loc_comb = jnp.einsum("fck,fa->cka",
                          dec_p["attn_loc_conv_w"].astype(jnp.float32),
                          dec_p["attn_loc_dense_w"].astype(jnp.float32)).reshape(2 * K, A)

    wp = lp_p["w"].astype(jnp.float32)
    wpe, wpv = wp[:enc_dim], wp[enc_dim:]
    lpb = lp_p["b"].reshape(1, E).astype(jnp.float32)
    amw = dec_p["attn_memory_w"].astype(jnp.float32)
    qw = dec_p["attn_query_w"].astype(jnp.float32)
    v_row = dec_p["attn_v"].reshape(1, A).astype(jnp.float32)
    pw = jnp.concatenate([dec_p["proj_w"], dec_p["gate_w"]], axis=1).astype(jnp.float32)
    pwh, pwc = pw[:DH], pw[DH:]
    pb = jnp.concatenate([dec_p["proj_b"], dec_p["gate_b"]],
                         axis=0).reshape(1, NM1).astype(jnp.float32)
    vae3 = vae.reshape(B, 1, LAT_DIM).astype(jnp.float32)

    def kern(pre_ref, enc_ref, vae_ref, mask_ref,
             wpe_r, wpv_r, lpb_r, amw_r,
             awihc_r, awhh_r, ab_r, qw_r, loc_r, v_r,
             dwihh_r, dwihc_r, dwhh_r, db_r,
             pwh_r, pwc_r, pb_r,
             mg_ref, al_ref):
        # --- one-time per-batch setup: lin_proj + processed memory, fused in-kernel ---
        enc = enc_ref[0]                                                   # [T_src, enc_dim]
        mem = (jnp.dot(enc, wpe_r[...], preferred_element_type=jnp.float32)
               + jnp.dot(vae_ref[0], wpv_r[...], preferred_element_type=jnp.float32)
               + lpb_r[...])                                               # [T_src, E]
        pm = jnp.dot(mem, amw_r[...], preferred_element_type=jnp.float32)  # [T_src, A]
        mask_c = mask_ref[0]                                               # [T_src, 1]
        zpad = jnp.zeros((pad, 1), jnp.float32)

        def lstm(gates, c_prev, h):
            sg = jax.nn.sigmoid(gates[:, :3 * h])
            i, f, o = sg[:, :h], sg[:, h:2 * h], sg[:, 2 * h:3 * h]
            g = jnp.tanh(gates[:, 3 * h:])
            c_new = f * c_prev + i * g
            return o * jnp.tanh(c_new), c_new

        def step(t, carry):
            ah, ac, dh, dc, aw, awc, ctx = carry

            # attention RNN (input projection hoisted into the prenet kernel)
            xg = pre_ref[0, pl.ds(t, 1), :]                                # [1, 4*AH]
            gates_a = (xg
                       + jnp.dot(ctx, awihc_r[...], preferred_element_type=jnp.float32)
                       + jnp.dot(ah, awhh_r[...], preferred_element_type=jnp.float32)
                       + ab_r[...])
            ah, ac = lstm(gates_a, ac, AH)

            # location-sensitive attention: window matrix -> one matmul
            pq = jnp.dot(ah, qw_r[...], preferred_element_type=jnp.float32)      # [1, A]
            awp = jnp.concatenate([zpad, aw, zpad], axis=0)                      # [T_src+2p,1]
            awcp = jnp.concatenate([zpad, awc, zpad], axis=0)
            win = jnp.concatenate([awp[k:k + T_src] for k in range(K)]
                                  + [awcp[k:k + T_src] for k in range(K)],
                                  axis=1)                                        # [T_src, 2K]
            ploc = jnp.dot(win, loc_r[...], preferred_element_type=jnp.float32)  # [T_src, A]
            e = jnp.tanh(pq + pm + ploc)                                         # [T_src, A]
            energies = jnp.sum(e * v_r[...], axis=1, keepdims=True)              # [T_src, 1]
            energies = jnp.where(mask_c > 0.5, energies, -1e9)
            mx = jnp.max(energies, axis=0, keepdims=True)
            ex = jnp.exp(energies - mx)
            att = ex / jnp.sum(ex, axis=0, keepdims=True)                        # [T_src, 1]
            ctx_new = jnp.sum(att * mem, axis=0, keepdims=True)                  # [1, E]

            # decoder RNN
            gates_d = (jnp.dot(ah, dwihh_r[...], preferred_element_type=jnp.float32)
                       + jnp.dot(ctx_new, dwihc_r[...], preferred_element_type=jnp.float32)
                       + jnp.dot(dh, dwhh_r[...], preferred_element_type=jnp.float32)
                       + db_r[...])
            dh, dc = lstm(gates_d, dc, DH)

            # fused mel + gate projection -> [1, N_MEL + 1]
            y = (jnp.dot(dh, pwh_r[...], preferred_element_type=jnp.float32)
                 + jnp.dot(ctx_new, pwc_r[...], preferred_element_type=jnp.float32)
                 + pb_r[...])

            mg_ref[0, pl.ds(t, 1), :, :] = y[None]
            al_ref[0, pl.ds(t, 1), :, :] = att[None]
            return (ah, ac, dh, dc, att, awc + att, ctx_new)

        init = (jnp.zeros((1, AH), jnp.float32), jnp.zeros((1, AH), jnp.float32),
                jnp.zeros((1, DH), jnp.float32), jnp.zeros((1, DH), jnp.float32),
                jnp.zeros((T_src, 1), jnp.float32), jnp.zeros((T_src, 1), jnp.float32),
                jnp.zeros((1, E), jnp.float32))
        lax.fori_loop(0, T_mel, step, init)

    mg, al = pl.pallas_call(
        kern,
        out_shape=(jax.ShapeDtypeStruct((B, T_mel, 1, NM1), jnp.float32),
                   jax.ShapeDtypeStruct((B, T_mel, T_src, 1), jnp.float32)),
        grid=(B,),
        in_specs=[
            pl.BlockSpec((1, T_mel, 4 * AH), lambda b: (b, 0, 0)),
            pl.BlockSpec((1, T_src, enc_dim), lambda b: (b, 0, 0)),
            pl.BlockSpec((1, 1, LAT_DIM), lambda b: (b, 0, 0)),
            pl.BlockSpec((1, T_src, 1), lambda b: (b, 0, 0)),
            pl.BlockSpec((enc_dim, E), lambda b: (0, 0)),
            pl.BlockSpec((LAT_DIM, E), lambda b: (0, 0)),
            pl.BlockSpec((1, E), lambda b: (0, 0)),
            pl.BlockSpec((E, A), lambda b: (0, 0)),
            pl.BlockSpec((E, 4 * AH), lambda b: (0, 0)),
            pl.BlockSpec((AH, 4 * AH), lambda b: (0, 0)),
            pl.BlockSpec((1, 4 * AH), lambda b: (0, 0)),
            pl.BlockSpec((AH, A), lambda b: (0, 0)),
            pl.BlockSpec((2 * K, A), lambda b: (0, 0)),
            pl.BlockSpec((1, A), lambda b: (0, 0)),
            pl.BlockSpec((AH, 4 * DH), lambda b: (0, 0)),
            pl.BlockSpec((E, 4 * DH), lambda b: (0, 0)),
            pl.BlockSpec((DH, 4 * DH), lambda b: (0, 0)),
            pl.BlockSpec((1, 4 * DH), lambda b: (0, 0)),
            pl.BlockSpec((DH, NM1), lambda b: (0, 0)),
            pl.BlockSpec((E, NM1), lambda b: (0, 0)),
            pl.BlockSpec((1, NM1), lambda b: (0, 0)),
        ],
        out_specs=(pl.BlockSpec((1, T_mel, 1, NM1), lambda b: (b, 0, 0, 0)),
                   pl.BlockSpec((1, T_mel, T_src, 1), lambda b: (b, 0, 0, 0))),
        compiler_params=pltpu.CompilerParams(dimension_semantics=("parallel",)),
    )(pre, enc_out.astype(jnp.float32), vae3, mask_col,
      wpe, wpv, lpb, amw,
      awihc, a_whh, a_b, qw, loc_comb, v_row,
      dwihh, dwihc, d_whh, d_b,
      pwh, pwc, pb)

    melgate = mg.reshape(B, T_mel, NM1)
    mel_outputs = jnp.transpose(melgate[..., :N_MEL], (0, 2, 1))   # [B, n_mel, T_mel]
    gate_outputs = melgate[..., N_MEL]                             # [B, T_mel]
    alignments = al.reshape(B, T_mel, T_src)                       # [B, T_mel, T_src]
    return mel_outputs, gate_outputs, alignments


# ----------------------------- parameter init -----------------------------

class _Init:
    def __init__(self, key):
        self.key = key
        self.n = 0

    def normal(self, shape, scale=0.1):
        self.n += 1
        return scale * jax.random.normal(jax.random.fold_in(self.key, self.n),
                                         shape, jnp.float32)


def _bn_params(ini, c, eps=1e-5):
    gamma = 1.0 + ini.normal((c,), 0.05)
    beta = ini.normal((c,), 0.05)
    scale = gamma / jnp.sqrt(1.0 + eps)   # eval BatchNorm (mean 0 / var 1) folded
    shift = beta
    return scale, shift


def init_params(key):
    ini = _Init(key)
    p = {}
    p["embedding"] = ini.normal((N_SYMBOLS, EMB_DIM), 0.1)

    p["enc_convs"] = []
    for _ in range(ENC_CONV_LAYERS):
        sc, sh = _bn_params(ini, EMB_DIM)
        p["enc_convs"].append({
            "w": ini.normal((EMB_DIM, EMB_DIM, ENC_KERNEL), 0.08),
            "b": ini.normal((EMB_DIM,), 0.05),
            "bn_scale": sc, "bn_shift": sh,
        })

    def lstm(din, h):
        return {"w_ih": ini.normal((din, 4 * h), 0.1),
                "w_hh": ini.normal((h, 4 * h), 0.1),
                "b": ini.normal((4 * h,), 0.05)}

    p["enc_lstm"] = {"fwd": lstm(EMB_DIM, ENC_LSTM_H), "bwd": lstm(EMB_DIM, ENC_LSTM_H)}

    p["mlvae"] = {
        "ref_w": ini.normal((N_MEL, MLVAE_HIDDEN), 0.1), "ref_b": ini.normal((MLVAE_HIDDEN,), 0.05),
        "mu_acc_w": ini.normal((MLVAE_HIDDEN, Z_ACC), 0.1), "mu_acc_b": ini.normal((Z_ACC,), 0.05),
        "lv_acc_w": ini.normal((MLVAE_HIDDEN, Z_ACC), 0.1), "lv_acc_b": ini.normal((Z_ACC,), 0.05),
        "mu_spk_w": ini.normal((MLVAE_HIDDEN, Z_SPK), 0.1), "mu_spk_b": ini.normal((Z_SPK,), 0.05),
        "lv_spk_w": ini.normal((MLVAE_HIDDEN, Z_SPK), 0.1), "lv_spk_b": ini.normal((Z_SPK,), 0.05),
    }

    p["adv"] = {"w": ini.normal((Z_SPK, N_ACCENTS), 0.1), "b": ini.normal((N_ACCENTS,), 0.05)}

    p["lin_proj"] = {"w": ini.normal((LIN_PROJ_IN, LIN_PROJ_OUT), 0.1),
                     "b": ini.normal((LIN_PROJ_OUT,), 0.05)}

    p["dec"] = {
        "prenet_w1": ini.normal((N_MEL, PRENET_DIM), 0.1),
        "prenet_w2": ini.normal((PRENET_DIM, PRENET_DIM), 0.1),
        "attn_rnn": lstm(PRENET_DIM + LIN_PROJ_OUT, ATTN_RNN_H),
        "attn_query_w": ini.normal((ATTN_RNN_H, ATTN_DIM), 0.1),
        "attn_memory_w": ini.normal((LIN_PROJ_OUT, ATTN_DIM), 0.1),
        "attn_v": ini.normal((ATTN_DIM,), 0.1),
        "attn_loc_conv_w": ini.normal((LOC_FILTERS, 2, LOC_KERNEL), 0.1),
        "attn_loc_dense_w": ini.normal((LOC_FILTERS, ATTN_DIM), 0.1),
        "dec_rnn": lstm(ATTN_RNN_H + LIN_PROJ_OUT, DEC_RNN_H),
        "proj_w": ini.normal((DEC_RNN_H + LIN_PROJ_OUT, N_MEL), 0.1),
        "proj_b": ini.normal((N_MEL,), 0.05),
        "gate_w": ini.normal((DEC_RNN_H + LIN_PROJ_OUT, 1), 0.1),
        "gate_b": ini.normal((1,), 0.05),
    }

    chans = [(POSTNET_CH, N_MEL), (POSTNET_CH, POSTNET_CH), (N_MEL, POSTNET_CH)]
    p["postnet"] = []
    for cout, cin in chans:
        sc, sh = _bn_params(ini, cout)
        p["postnet"].append({
            "w": ini.normal((cout, cin, POSTNET_KERNEL), 0.08),
            "b": ini.normal((cout,), 0.05),
            "bn_scale": sc, "bn_shift": sh,
        })
    return p


# ----------------------------- submodule forwards -----------------------------

def encoder_forward(p, x_bct, src_lens):
    # TODO(synk): conv-stack dropout (p=0.5) omitted (deterministic eval-style forward).
    y = pallas_encoder_convs(x_bct, p["enc_convs"])                      # [B, EMB, T]
    xt = jnp.transpose(y, (2, 0, 1))                                     # [T, B, EMB]
    return pallas_bilstm(xt, p["enc_lstm"]["fwd"], p["enc_lstm"]["bwd"])  # [B, T, ENC_DIM]


def mlvae_adv_forward(mlvae_p, adv_p, mels):
    heads, acc_prob = pallas_mlvae_adv(mels, mlvae_p, adv_p)
    mu_acc = heads[:, :Z_ACC]
    lv_acc = heads[:, Z_ACC:2 * Z_ACC]
    mu_spk = heads[:, 2 * Z_ACC:2 * Z_ACC + Z_SPK]
    lv_spk = heads[:, 2 * Z_ACC + Z_SPK:]
    # TODO(synk): MLVAE reparameterization sampling replaced by deterministic z = mu;
    # acc/spk label conditioning of the accumulated statistics not reproduced.
    z_acc, z_spk = mu_acc, mu_spk
    z_acc_sg = lax.stop_gradient(z_acc)
    return z_acc, z_spk, z_acc_sg, (mu_acc, lv_acc, mu_spk, lv_spk), acc_prob


def parse_output(outputs, mel_lens):
    mel_outputs, mel_post, gate_outputs, alignments, mlvae_stats, acc_prob = outputs
    T_out = mel_outputs.shape[2]
    pad = jnp.arange(T_out)[None, :] >= mel_lens[:, None]     # True where padded
    mel_outputs = jnp.where(pad[:, None, :], 0.0, mel_outputs)
    mel_post = jnp.where(pad[:, None, :], 0.0, mel_post)
    gate_outputs = jnp.where(pad, 1000.0, gate_outputs)
    mel_outputs = jnp.swapaxes(mel_outputs, -2, -1)           # [B, T_mel, n_mel]
    mel_post = jnp.swapaxes(mel_post, -2, -1)
    return [mel_outputs, mel_post, gate_outputs, alignments, mlvae_stats, acc_prob]


# ----------------------------- full Tacotron2 forward -----------------------------

def tacotron2_forward(params, speakers, texts, src_lens, mels, mel_lens, accents):
    B, T_src = texts.shape
    embedded = params["embedding"][texts]                     # [B, T_src, EMB]  (XLA gather)
    embedded = jnp.transpose(embedded, (0, 2, 1))             # [B, EMB, T_src]
    encoder_outputs = encoder_forward(params, embedded, src_lens)        # [B, T_src, ENC_DIM]

    z_acc, z_spk, z_acc_sg, mlvae_stats, acc_prob = mlvae_adv_forward(
        params["mlvae"], params["adv"], mels)

    vae = jnp.concatenate([z_acc, z_spk], axis=1)             # [B, LAT_DIM]

    # lin_proj + processed_memory are fused into the decoder kernel.
    mel_outputs, gate_outputs, alignments = pallas_decoder(
        params["dec"], params["lin_proj"], encoder_outputs, vae,
        jnp.swapaxes(mels, -2, -1), src_lens)

    mel_outputs_postnet = pallas_postnet(mel_outputs, params["postnet"])
    mel_outputs_postnet = mel_outputs + mel_outputs_postnet

    return parse_output([mel_outputs, mel_outputs_postnet, gate_outputs,
                         alignments, mlvae_stats, acc_prob], mel_lens)


# ----------------------------- main -----------------------------

if __name__ == "__main__":
    params = init_params(jax.random.PRNGKey(0))

    B, T_SRC, T_MEL = 2, 8, 12
    k = jax.random.PRNGKey(0)
    k_txt, k_mel = jax.random.split(k, 2)

    speakers = jnp.array([0, 1], jnp.int32)
    texts = jax.random.randint(k_txt, (B, T_SRC), 0, N_SYMBOLS, dtype=jnp.int32)
    src_lens = jnp.array([T_SRC, T_SRC - 2], jnp.int32)
    mels = jax.random.normal(k_mel, (B, T_MEL, N_MEL), jnp.float32)
    mel_lens = jnp.array([T_MEL, T_MEL - 3], jnp.int32)
    accents = jnp.array([1, 2], jnp.int32)

    fwd = jax.jit(tacotron2_forward)
    outs = fwd(params, speakers, texts, src_lens, mels, mel_lens, accents)
    outs = jax.block_until_ready(outs)

    assert outs[0].shape == (B, T_MEL, N_MEL)      # mel_outputs (transposed)
    assert outs[1].shape == (B, T_MEL, N_MEL)      # mel_outputs_postnet
    assert outs[2].shape == (B, T_MEL)             # gate_outputs
    assert outs[3].shape == (B, T_MEL, T_SRC)      # alignments
    assert outs[5].shape == (B, N_ACCENTS)         # acc_prob
    print("KERNEL_OK")
</pallas_src>

<mosaic_0001>
module attributes {stable_mosaic.version = 11 : i64} {
  func.func @kern(%arg0: i32, %arg1: memref<16x32xf32, #tpu.memory_space<vmem>>, %arg2: memref<1x32x64xf32, #tpu.memory_space<vmem>>, %arg3: memref<1x16x64xf32, #tpu.memory_space<vmem>>, %arg4: memref<1x1x64xf32, #tpu.memory_space<vmem>>, %arg5: memref<1x8x2x16xf32, #tpu.memory_space<vmem>>, %arg6: memref<16x64xf32, #tpu.memory_space<vmem>>) attributes {dimension_semantics = [#tpu.dimension_semantics<parallel>], iteration_bounds = array<i64: 2>, scalar_prefetch = 0 : i64, scratch_operands = 1 : i64, tpu.core_type = #tpu.core_type<tc>, window_params = [{pipeline_mode = #tpu.pipeline_mode<synchronous>, transform_indices = @transform_0, window_bounds = array<i64: 16, 32>}, {transform_indices = @transform_1, window_bounds = array<i64: 1, 32, 64>}, {transform_indices = @transform_2, window_bounds = array<i64: 1, 16, 64>}, {transform_indices = @transform_3, window_bounds = array<i64: 1, 1, 64>}, {transform_indices = @transform_4, window_bounds = array<i64: 1, 8, 2, 16>}]} {
    %c0 = arith.constant 0 : index
    %c0_0 = arith.constant 0 : index
    %0 = vector.load %arg1[%c0, %c0_0] : memref<16x32xf32, #tpu.memory_space<vmem>>, vector<16x32xf32>
    %c0_1 = arith.constant 0 : index
    %c0_2 = arith.constant 0 : index
    %c0_3 = arith.constant 0 : index
    %1 = vector.load %arg2[%c0_1, %c0_2, %c0_3] : memref<1x32x64xf32, #tpu.memory_space<vmem>>, vector<1x32x64xf32>
    %2 = vector.shape_cast %1 : vector<1x32x64xf32> to vector<32x64xf32>
    %cst = arith.constant dense<0.000000e+00> : vector<16x64xf32>
    %3 = tpu.matmul %0, %2, %cst {dimension_numbers = #tpu.dot_dimension_numbers<[1], [0], [0], [1], [0, 0, 1, 1], [], []>} : vector<16x32xf32>, vector<32x64xf32>, vector<16x64xf32> -> vector<16x64xf32>
    %c0_4 = arith.constant 0 : index
    %c0_5 = arith.constant 0 : index
    %c0_6 = arith.constant 0 : index
    %4 = vector.load %arg4[%c0_4, %c0_5, %c0_6] : memref<1x1x64xf32, #tpu.memory_space<vmem>>, vector<1x1x64xf32>
    %5 = vector.shape_cast %4 : vector<1x1x64xf32> to vector<1x64xf32>
    %6 = vector.broadcast %5 : vector<1x64xf32> to vector<16x64xf32>
    %7 = arith.addf %3, %6 : vector<16x64xf32>
    %c0_7 = arith.constant 0 : index
    %c0_8 = arith.constant 0 : index
    %8 = vector.load %arg6[%c0_7, %c0_8] : memref<16x64xf32, #tpu.memory_space<vmem>>, vector<16x64xf32>
    tpu.vector_store %arg6[%c0_7, %c0_8], %7 {strides = array<i32>} : memref<16x64xf32, #tpu.memory_space<vmem>>, vector<16x64xf32>,
    %c0_9 = arith.constant 0 : index
    %c0_10 = arith.constant 0 : index
    %c0_11 = arith.constant 0 : index
    %9 = vector.load %arg3[%c0_9, %c0_10, %c0_11] : memref<1x16x64xf32, #tpu.memory_space<vmem>>, vector<1x16x64xf32>
    %10 = vector.shape_cast %9 : vector<1x16x64xf32> to vector<16x64xf32>
    %cst_12 = arith.constant 0.000000e+00 : f32
    %11 = vector.broadcast %cst_12 : f32 to vector<2x16xf32>
    %cst_13 = arith.constant 0.000000e+00 : f32
    %12 = vector.broadcast %cst_13 : f32 to vector<2x16xf32>
    %c0_i32 = arith.constant 0 : i32
    %c8_i32 = arith.constant 8 : i32
    %13 = arith.addi %c0_i32, %c8_i32 : i32
    %c1_i32 = arith.constant 1 : i32
    %14:2 = scf.for %arg7 = %c0_i32 to %13 step %c1_i32 iter_args(%arg8 = %11, %arg9 = %12) -> (vector<2x16xf32>, vector<2x16xf32>)  : i32 {
      %c1_i32_15 = arith.constant 1 : i32
      %15 = arith.subi %c1_i32_15, %arg0 : i32
      %16 = arith.muli %15, %arg7 : i32
      %c7_i32 = arith.constant 7 : i32
      %17 = arith.subi %c7_i32, %arg7 : i32
      %18 = arith.muli %arg0, %17 : i32
      %19 = arith.addi %16, %18 : i32
      %c2_i32 = arith.constant 2 : i32
      %20 = arith.muli %19, %c2_i32 : i32
      %21 = arith.index_cast %20 : i32 to index
      %c0_16 = arith.constant 0 : index
      %22 = vector.load %arg6[%21, %c0_16] : memref<16x64xf32, #tpu.memory_space<vmem>>, vector<2x64xf32>
      %cst_17 = arith.constant dense<0.000000e+00> : vector<2x64xf32>
      %23 = tpu.matmul %arg8, %10, %cst_17 {dimension_numbers = #tpu.dot_dimension_numbers<[1], [0], [0], [1], [0, 0, 1, 1], [], []>} : vector<2x16xf32>, vector<16x64xf32>, vector<2x64xf32> -> vector<2x64xf32>
      %24 = arith.addf %22, %23 : vector<2x64xf32>
      %25 = vector.extract_strided_slice %24 {offsets = [0, 0], sizes = [2, 48], strides = [1, 1]} : vector<2x64xf32> to vector<2x48xf32>
      %26 = arith.negf %25 : vector<2x48xf32>
      %27 = math.exp %26 : vector<2x48xf32>
      %cst_18 = arith.constant 1.000000e+00 : f32
      %28 = vector.broadcast %cst_18 : f32 to vector<2x48xf32>
      %29 = arith.addf %28, %27 : vector<2x48xf32>
      %30 = arith.divf %28, %29 : vector<2x48xf32>
      %31 = vector.extract_strided_slice %30 {offsets = [0, 0], sizes = [2, 16], strides = [1, 1]} : vector<2x48xf32> to vector<2x16xf32>
      %32 = vector.extract_strided_slice %30 {offsets = [0, 16], sizes = [2, 16], strides = [1, 1]} : vector<2x48xf32> to vector<2x16xf32>
      %33 = vector.extract_strided_slice %30 {offsets = [0, 32], sizes = [2, 16], strides = [1, 1]} : vector<2x48xf32> to vector<2x16xf32>
      %34 = vector.extract_strided_slice %24 {offsets = [0, 48], sizes = [2, 16], strides = [1, 1]} : vector<2x64xf32> to vector<2x16xf32>
      %35 = math.tanh %34 : vector<2x16xf32>
      %36 = arith.mulf %32, %arg9 : vector<2x16xf32>
      %37 = arith.mulf %31, %35 : vector<2x16xf32>
      %38 = arith.addf %36, %37 : vector<2x16xf32>
      %39 = math.tanh %38 : vector<2x16xf32>
      %40 = arith.mulf %33, %39 : vector<2x16xf32>
      %41 = vector.shape_cast %40 : vector<2x16xf32> to vector<1x2x16xf32>
      %c0_19 = arith.constant 0 : index
      %42 = arith.index_cast %19 : i32 to index
      %c0_20 = arith.constant 0 : index
      %c0_21 = arith.constant 0 : index
      %43 = vector.load %arg5[%c0_19, %42, %c0_20, %c0_21] : memref<1x8x2x16xf32, #tpu.memory_space<vmem>>, vector<1x1x2x16xf32>
      %44 = vector.shape_cast %43 : vector<1x1x2x16xf32> to vector<1x2x16xf32>
      %45 = vector.shape_cast %41 : vector<1x2x16xf32> to vector<1x1x2x16xf32>
      tpu.vector_store %arg5[%c0_19, %42, %c0_20, %c0_21], %45 {strides = array<i32>} : memref<1x8x2x16xf32, #tpu.memory_space<vmem>>, vector<1x1x2x16xf32>,
      scf.yield %40, %38 : vector<2x16xf32>, vector<2x16xf32>
    }
    %c8_i32_14 = arith.constant 8 : i32
    return
  }
  func.func @transform_0(%arg0: i32) -> (i32, i32) {
    %c0_i32 = arith.constant 0 : i32
    %c0_i32_0 = arith.constant 0 : i32
    %c0_i32_1 = arith.constant 0 : i32
    return %c0_i32, %c0_i32_0 : i32, i32
  }
  func.func @transform_1(%arg0: i32) -> (i32, i32, i32) {
    %c0_i32 = arith.constant 0 : i32
    %c0_i32_0 = arith.constant 0 : i32
    %c0_i32_1 = arith.constant 0 : i32
    return %arg0, %c0_i32, %c0_i32_0 : i32, i32, i32
  }
  func.func @transform_2(%arg0: i32) -> (i32, i32, i32) {
    %c0_i32 = arith.constant 0 : i32
    %c0_i32_0 = arith.constant 0 : i32
    %c0_i32_1 = arith.constant 0 : i32
    return %arg0, %c0_i32, %c0_i32_0 : i32, i32, i32
  }
  func.func @transform_3(%arg0: i32) -> (i32, i32, i32) {
    %c0_i32 = arith.constant 0 : i32
    %c0_i32_0 = arith.constant 0 : i32
    %c0_i32_1 = arith.constant 0 : i32
    return %arg0, %c0_i32, %c0_i32_0 : i32, i32, i32
  }
  func.func @transform_4(%arg0: i32) -> (i32, i32, i32, i32) {
    %c0_i32 = arith.constant 0 : i32
    %c0_i32_0 = arith.constant 0 : i32
    %c0_i32_1 = arith.constant 0 : i32
    %c0_i32_2 = arith.constant 0 : i32
    return %arg0, %c0_i32, %c0_i32_0, %c0_i32_1 : i32, i32, i32, i32
  }
}

module attributes {stable_mosaic.version = 11 : i64} {
  func.func @kern(%arg0: i32, %arg1: memref<1x32x8xf32, #tpu.memory_space<vmem>>, %arg2: memref<3x5x32x32xf32, #tpu.memory_space<vmem>>, %arg3: memref<3x32x1xf32, #tpu.memory_space<vmem>>, %arg4: memref<3x32x1xf32, #tpu.memory_space<vmem>>, %arg5: memref<3x32x1xf32, #tpu.memory_space<vmem>>, %arg6: memref<1x32x8xf32, #tpu.memory_space<vmem>>, %arg7: memref<32x12xf32, #tpu.memory_space<vmem>>) attributes {dimension_semantics = [#tpu.dimension_semantics<parallel>], iteration_bounds = array<i64: 2>, scalar_prefetch = 0 : i64, scratch_operands = 1 : i64, tpu.core_type = #tpu.core_type<tc>, window_params = [{transform_indices = @transform_0, window_bounds = array<i64: 1, 32, 8>}, {pipeline_mode = #tpu.pipeline_mode<synchronous>, transform_indices = @transform_1, window_bounds = array<i64: 3, 5, 32, 32>}, {pipeline_mode = #tpu.pipeline_mode<synchronous>, transform_indices = @transform_2, window_bounds = array<i64: 3, 32, 1>}, {pipeline_mode = #tpu.pipeline_mode<synchronous>, transform_indices = @transform_3, window_bounds = array<i64: 3, 32, 1>}, {pipeline_mode = #tpu.pipeline_mode<synchronous>, transform_indices = @transform_4, window_bounds = array<i64: 3, 32, 1>}, {transform_indices = @transform_5, window_bounds = array<i64: 1, 32, 8>}]} {
    %cst = arith.constant 0.000000e+00 : f32
    %0 = vector.broadcast %cst : f32 to vector<32x12xf32>
    %c0 = arith.constant 0 : index
    %c0_0 = arith.constant 0 : index
    %1 = vector.load %arg7[%c0, %c0_0] : memref<32x12xf32, #tpu.memory_space<vmem>>, vector<32x12xf32>
    tpu.vector_store %arg7[%c0, %c0_0], %0 {strides = array<i32>} : memref<32x12xf32, #tpu.memory_space<vmem>>, vector<32x12xf32>,
    %c0_1 = arith.constant 0 : index
    %c0_2 = arith.constant 0 : index
    %c0_3 = arith.constant 0 : index
    %2 = vector.load %arg1[%c0_1, %c0_2, %c0_3] : memref<1x32x8xf32, #tpu.memory_space<vmem>>, vector<1x32x8xf32>
    %3 = vector.shape_cast %2 : vector<1x32x8xf32> to vector<32x8xf32>
    %c0_4 = arith.constant 0 : index
    %c2 = arith.constant 2 : index
    %4 = vector.load %arg7[%c0_4, %c2] : memref<32x12xf32, #tpu.memory_space<vmem>>, vector<32x8xf32>
    tpu.vector_store %arg7[%c0_4, %c2], %3 {strides = array<i32>} : memref<32x12xf32, #tpu.memory_space<vmem>>, vector<32x8xf32>,
    %cst_5 = arith.constant 0.000000e+00 : f32
    %5 = vector.broadcast %cst_5 : f32 to vector<32x8xf32>
    %c0_6 = arith.constant 0 : index
    %c0_7 = arith.constant 0 : index
    %c0_8 = arith.constant 0 : index
    %c0_9 = arith.constant 0 : index
    %6 = vector.load %arg2[%c0_6, %c0_7, %c0_8, %c0_9] : memref<3x5x32x32xf32, #tpu.memory_space<vmem>>, vector<1x1x32x32xf32>
    %7 = vector.shape_cast %6 : vector<1x1x32x32xf32> to vector<32x32xf32>
    %c0_10 = arith.constant 0 : index
    %c0_11 = arith.constant 0 : index
    %8 = vector.load %arg7[%c0_10, %c0_11] : memref<32x12xf32, #tpu.memory_space<vmem>>, vector<32x8xf32>
    %cst_12 = arith.constant dense<0.000000e+00> : vector<32x8xf32>
    %9 = tpu.matmul %7, %8, %cst_12 {dimension_numbers = #tpu.dot_dimension_numbers<[1], [0], [0], [1], [0, 0, 1, 1], [], []>} : vector<32x32xf32>, vector<32x8xf32>, vector<32x8xf32> -> vector<32x8xf32>
    %10 = arith.addf %5, %9 : vector<32x8xf32>
    %c0_13 = arith.constant 0 : index
    %c1 = arith.constant 1 : index
    %c0_14 = arith.constant 0 : index
    %c0_15 = arith.constant 0 : index
    %11 = vector.load %arg2[%c0_13, %c1, %c0_14, %c0_15] : memref<3x5x32x32xf32, #tpu.memory_space<vmem>>, vector<1x1x32x32xf32>
    %12 = vector.shape_cast %11 : vector<1x1x32x32xf32> to vector<32x32xf32>
    %c0_16 = arith.constant 0 : index
    %c1_17 = arith.constant 1 : index
    %13 = vector.load %arg7[%c0_16, %c1_17] : memref<32x12xf32, #tpu.memory_space<vmem>>, vector<32x8xf32>
    %cst_18 = arith.constant dense<0.000000e+00> : vector<32x8xf32>
    %14 = tpu.matmul %12, %13, %cst_18 {dimension_numbers = #tpu.dot_dimension_numbers<[1], [0], [0], [1], [0, 0, 1, 1], [], []>} : vector<32x32xf32>, vector<32x8xf32>, vector<32x8xf32> -> vector<32x8xf32>
    %15 = arith.addf %10, %14 : vector<32x8xf32>
    %c0_19 = arith.constant 0 : index
    %c2_20 = arith.constant 2 : index
    %c0_21 = arith.constant 0 : index
    %c0_22 = arith.constant 0 : index
    %16 = vector.load %arg2[%c0_19, %c2_20, %c0_21, %c0_22] : memref<3x5x32x32xf32, #tpu.memory_space<vmem>>, vector<1x1x32x32xf32>
    %17 = vector.shape_cast %16 : vector<1x1x32x32xf32> to vector<32x32xf32>
    %c0_23 = arith.constant 0 : index
    %c2_24 = arith.constant 2 : index
    %18 = vector.load %arg7[%c0_23, %c2_24] : memref<32x12xf32, #tpu.memory_space<vmem>>, vector<32x8xf32>
    %cst_25 = arith.constant dense<0.000000e+00> : vector<32x8xf32>
    %19 = tpu.matmul %17, %18, %cst_25 {dimension_numbers = #tpu.dot_dimension_numbers<[1], [0], [0], [1], [0, 0, 1, 1], [], []>} : vector<32x32xf32>, vector<32x8xf32>, vector<32x8xf32> -> vector<32x8xf32>
    %20 = arith.addf %15, %19 : vector<32x8xf32>
    %c0_26 = arith.constant 0 : index
    %c3 = arith.constant 3 : index
    %c0_27 = arith.constant 0 : index
    %c0_28 = arith.constant 0 : index
    %21 = vector.load %arg2[%c0_26, %c3, %c0_27, %c0_28] : memref<3x5x32x32xf32, #tpu.memory_space<vmem>>, vector<1x1x32x32xf32>
    %22 = vector.shape_cast %21 : vector<1x1x32x32xf32> to vector<32x32xf32>
    %c0_29 = arith.constant 0 : index
    %c3_30 = arith.constant 3 : index
    %23 = vector.load %arg7[%c0_29, %c3_30] : memref<32x12xf32, #tpu.memory_space<vmem>>, vector<32x8xf32>
    %cst_31 = arith.constant dense<0.000000e+00> : vector<32x8xf32>
    %24 = tpu.matmul %22, %23, %cst_31 {dimension_numbers = #tpu.dot_dimension_numbers<[1], [0], [0], [1], [0, 0, 1, 1], [], []>} : vector<32x32xf32>, vector<32x8xf32>, vector<32x8xf32> -> vector<32x8xf32>
    %25 = arith.addf %20, %24 : vector<32x8xf32>
    %c0_32 = arith.constant 0 : index
    %c4 = arith.constant 4 : index
    %c0_33 = arith.constant 0 : index
    %c0_34 = arith.constant 0 : index
    %26 = vector.load %arg2[%c0_32, %c4, %c0_33, %c0_34] : memref<3x5x32x32xf32, #tpu.memory_space<vmem>>, vector<1x1x32x32xf32>
    %27 = vector.shape_cast %26 : vector<1x1x32x32xf32> to vector<32x32xf32>
    %c0_35 = arith.constant 0 : index
    %c4_36 = arith.constant 4 : index
    %28 = vector.load %arg7[%c0_35, %c4_36] : memref<32x12xf32, #tpu.memory_space<vmem>>, vector<32x8xf32>
    %cst_37 = arith.constant dense<0.000000e+00> : vector<32x8xf32>
    %29 = tpu.matmul %27, %28, %cst_37 {dimension_numbers = #tpu.dot_dimension_numbers<[1], [0], [0], [1], [0, 0, 1, 1], [], []>} : vector<32x32xf32>, vector<32x8xf32>, vector<32x8xf32> -> vector<32x8xf32>
    %30 = arith.addf %25, %29 : vector<32x8xf32>
    %c0_38 = arith.constant 0 : index
    %c0_39 = arith.constant 0 : index
    %c0_40 = arith.constant 0 : index
    %31 = vector.load %arg3[%c0_38, %c0_39, %c0_40] : memref<3x32x1xf32, #tpu.memory_space<vmem>>, vector<1x32x1xf32>
    %32 = vector.shape_cast %31 : vector<1x32x1xf32> to vector<32x1xf32>
    %33 = vector.broadcast %32 : vector<32x1xf32> to vector<32x8xf32>
    %34 = arith.addf %30, %33 : vector<32x8xf32>
    %c0_41 = arith.constant 0 : index
    %c0_42 = arith.constant 0 : index
    %c0_43 = arith.constant 0 : index
    %35 = vector.load %arg4[%c0_41, %c0_42, %c0_43] : memref<3x32x1xf32, #tpu.memory_space<vmem>>, vector<1x32x1xf32>
    %36 = vector.shape_cast %35 : vector<1x32x1xf32> to vector<32x1xf32>
    %37 = vector.broadcast %36 : vector<32x1xf32> to vector<32x8xf32>
    %38 = arith.mulf %34, %37 : vector<32x8xf32>
    %c0_44 = arith.constant 0 : index
    %c0_45 = arith.constant 0 : index
    %c0_46 = arith.constant 0 : index
    %39 = vector.load %arg5[%c0_44, %c0_45, %c0_46] : memref<3x32x1xf32, #tpu.memory_space<vmem>>, vector<1x32x1xf32>
    %40 = vector.shape_cast %39 : vector<1x32x1xf32> to vector<32x1xf32>
    %41 = vector.broadcast %40 : vector<32x1xf32> to vector<32x8xf32>
    %42 = arith.addf %38, %41 : vector<32x8xf32>
    %cst_47 = arith.constant 0.000000e+00 : f32
    %43 = vector.broadcast %cst_47 : f32 to vector<32x8xf32>
    %44 = arith.maximumf %42, %43 : vector<32x8xf32>
    %c0_48 = arith.constant 0 : index
    %c2_49 = arith.constant 2 : index
    %45 = vector.load %arg7[%c0_48, %c2_49] : memref<32x12xf32, #tpu.memory_space<vmem>>, vector<32x8xf32>
    tpu.vector_store %arg7[%c0_48, %c2_49], %44 {strides = array<i32>} : memref<32x12xf32, #tpu.memory_space<vmem>>, vector<32x8xf32>,
    %cst_50 = arith.constant 0.000000e+00 : f32
    %46 = vector.broadcast %cst_50 : f32 to vector<32x8xf32>
    %c1_51 = arith.constant 1 : index
    %c0_52 = arith.constant 0 : index
    %c0_53 = arith.constant 0 : index
    %c0_54 = arith.constant 0 : index
    %47 = vector.load %arg2[%c1_51, %c0_52, %c0_53, %c0_54] : memref<3x5x32x32xf32, #tpu.memory_space<vmem>>, vector<1x1x32x32xf32>
    %48 = vector.shape_cast %47 : vector<1x1x32x32xf32> to vector<32x32xf32>
    %c0_55 = arith.constant 0 : index
    %c0_56 = arith.constant 0 : index
    %49 = vector.load %arg7[%c0_55, %c0_56] : memref<32x12xf32, #tpu.memory_space<vmem>>, vector<32x8xf32>
    %cst_57 = arith.constant dense<0.000000e+00> : vector<32x8xf32>
    %50 = tpu.matmul %48, %49, %cst_57 {dimension_numbers = #tpu.dot_dimension_numbers<[1], [0], [0], [1], [0, 0, 1, 1], [], []>} : vector<32x32xf32>, vector<32x8xf32>, vector<32x8xf32> -> vector<32x8xf32>
    %51 = arith.addf %46, %50 : vector<32x8xf32>
    %c1_58 = arith.constant 1 : index
    %c1_59 = arith.constant 1 : index
    %c0_60 = arith.constant 0 : index
    %c0_61 = arith.constant 0 : index
    %52 = vector.load %arg2[%c1_58, %c1_59, %c0_60, %c0_61] : memref<3x5x32x32xf32, #tpu.memory_space<vmem>>, vector<1x1x32x32xf32>
    %53 = vector.shape_cast %52 : vector<1x1x32x32xf32> to vector<32x32xf32>
    %c0_62 = arith.constant 0 : index
    %c1_63 = arith.constant 1 : index
    %54 = vector.load %arg7[%c0_62, %c1_63] : memref<32x12xf32, #tpu.memory_space<vmem>>, vector<32x8xf32>
    %cst_64 = arith.constant dense<0.000000e+00> : vector<32x8xf32>
    %55 = tpu.matmul %53, %54, %cst_64 {dimension_numbers = #tpu.dot_dimension_numbers<[1], [0], [0], [1], [0, 0, 1, 1], [], []>} : vector<32x32xf32>, vector<32x8xf32>, vector<32x8xf32> -> vector<32x8xf32>
    %56 = arith.addf %51, %55 : vector<32x8xf32>
    %c1_65 = arith.constant 1 : index
    %c2_66 = arith.constant 2 : index
    %c0_67 = arith.constant 0 : index
    %c0_68 = arith.constant 0 : index
    %57 = vector.load %arg2[%c1_65, %c2_66, %c0_67, %c0_68] : memref<3x5x32x32xf32, #tpu.memory_space<vmem>>, vector<1x1x32x32xf32>
    %58 = vector.shape_cast %57 : vector<1x1x32x32xf32> to vector<32x32xf32>
    %c0_69 = arith.constant 0 : index
    %c2_70 = arith.constant 2 : index
    %59 = vector.load %arg7[%c0_69, %c2_70] : memref<32x12xf32, #tpu.memory_space<vmem>>, vector<32x8xf32>
    %cst_71 = arith.constant dense<0.000000e+00> : vector<32x8xf32>
    %60 = tpu.matmul %58, %59, %cst_71 {dimension_numbers = #tpu.dot_dimension_numbers<[1], [0], [0], [1], [0, 0, 1, 1], [], []>} : vector<32x32xf32>, vector<32x8xf32>, vector<32x8xf32> -> vector<32x8xf32>
    %61 = arith.addf %56, %60 : vector<32x8xf32>
    %c1_72 = arith.constant 1 : index
    %c3_73 = arith.constant 3 : index
    %c0_74 = arith.constant 0 : index
    %c0_75 = arith.constant 0 : index
    %62 = vector.load %arg2[%c1_72, %c3_73, %c0_74, %c0_75] : memref<3x5x32x32xf32, #tpu.memory_space<vmem>>, vector<1x1x32x32xf32>
    %63 = vector.shape_cast %62 : vector<1x1x32x32xf32> to vector<32x32xf32>
    %c0_76 = arith.constant 0 : index
    %c3_77 = arith.constant 3 : index
    %64 = vector.load %arg7[%c0_76, %c3_77] : memref<32x12xf32, #tpu.memory_space<vmem>>, vector<32x8xf32>
    %cst_78 = arith.constant dense<0.000000e+00> : vector<32x8xf32>
    %65 = tpu.matmul %63, %64, %cst_78 {dimension_numbers = #tpu.dot_dimension_numbers<[1], [0], [0], [1], [0, 0, 1, 1], [], []>} : vector<32x32xf32>, vector<32x8xf32>, vector<32x8xf32> -> vector<32x8xf32>
    %66 = arith.addf %61, %65 : vector<32x8xf32>
    %c1_79 = arith.constant 1 : index
    %c4_80 = arith.constant 4 : index
    %c0_81 = arith.constant 0 : index
    %c0_82 = arith.constant 0 : index
    %67 = vector.load %arg2[%c1_79, %c4_80, %c0_81, %c0_82] : memref<3x5x32x32xf32, #tpu.memory_space<vmem>>, vector<1x1x32x32xf32>
    %68 = vector.shape_cast %67 : vector<1x1x32x32xf32> to vector<32x32xf32>
    %c0_83 = arith.constant 0 : index
    %c4_84 = arith.constant 4 : index
    %69 = vector.load %arg7[%c0_83, %c4_84] : memref<32x12xf32, #tpu.memory_space<vmem>>, vector<32x8xf32>
    %cst_85 = arith.constant dense<0.000000e+00> : vector<32x8xf32>
    %70 = tpu.matmul %68, %69, %cst_85 {dimension_numbers = #tpu.dot_dimension_numbers<[1], [0], [0], [1], [0, 0, 1, 1], [], []>} : vector<32x32xf32>, vector<32x8xf32>, vector<32x8xf32> -> vector<32x8xf32>
    %71 = arith.addf %66, %70 : vector<32x8xf32>
    %c1_86 = arith.constant 1 : index
    %c0_87 = arith.constant 0 : index
    %c0_88 = arith.constant 0 : index
    %72 = vector.load %arg3[%c1_86, %c0_87, %c0_88] : memref<3x32x1xf32, #tpu.memory_space<vmem>>, vector<1x32x1xf32>
    %73 = vector.shape_cast %72 : vector<1x32x1xf32> to vector<32x1xf32>
    %74 = vector.broadcast %73 : vector<32x1xf32> to vector<32x8xf32>
    %75 = arith.addf %71, %74 : vector<32x8xf32>
    %c1_89 = arith.constant 1 : index
    %c0_90 = arith.constant 0 : index
    %c0_91 = arith.constant 0 : index
    %76 = vector.load %arg4[%c1_89, %c0_90, %c0_91] : memref<3x32x1xf32, #tpu.memory_space<vmem>>, vector<1x32x1xf32>
    %77 = vector.shape_cast %76 : vector<1x32x1xf32> to vector<32x1xf32>
    %78 = vector.broadcast %77 : vector<32x1xf32> to vector<32x8xf32>
    %79 = arith.mulf %75, %78 : vector<32x8xf32>
    %c1_92 = arith.constant 1 : index
    %c0_93 = arith.constant 0 : index
    %c0_94 = arith.constant 0 : index
    %80 = vector.load %arg5[%c1_92, %c0_93, %c0_94] : memref<3x32x1xf32, #tpu.memory_space<vmem>>, vector<1x32x1xf32>
    %81 = vector.shape_cast %80 : vector<1x32x1xf32> to vector<32x1xf32>
    %82 = vector.broadcast %81 : vector<32x1xf32> to vector<32x8xf32>
    %83 = arith.addf %79, %82 : vector<32x8xf32>
    %cst_95 = arith.constant 0.000000e+00 : f32
    %84 = vector.broadcast %cst_95 : f32 to vector<32x8xf32>
    %85 = arith.maximumf %83, %84 : vector<32x8xf32>
    %c0_96 = arith.constant 0 : index
    %c2_97 = arith.constant 2 : index
    %86 = vector.load %arg7[%c0_96, %c2_97] : memref<32x12xf32, #tpu.memory_space<vmem>>, vector<32x8xf32>
    tpu.vector_store %arg7[%c0_96, %c2_97], %85 {strides = array<i32>} : memref<32x12xf32, #tpu.memory_space<vmem>>, vector<32x8xf32>,
    %cst_98 = arith.constant 0.000000e+00 : f32
    %87 = vector.broadcast %cst_98 : f32 to vector<32x8xf32>
    %c2_99 = arith.constant 2 : index
    %c0_100 = arith.constant 0 : index
    %c0_101 = arith.constant 0 : index
    %c0_102 = arith.constant 0 : index
    %88 = vector.load %arg2[%c2_99, %c0_100, %c0_101, %c0_102] : memref<3x5x32x32xf32, #tpu.memory_space<vmem>>, vector<1x1x32x32xf32>
    %89 = vector.shape_cast %88 : vector<1x1x32x32xf32> to vector<32x32xf32>
    %c0_103 = arith.constant 0 : index
    %c0_104 = arith.constant 0 : index
    %90 = vector.load %arg7[%c0_103, %c0_104] : memref<32x12xf32, #tpu.memory_space<vmem>>, vector<32x8xf32>
    %cst_105 = arith.constant dense<0.000000e+00> : vector<32x8xf32>
    %91 = tpu.matmul %89, %90, %cst_105 {dimension_numbers = #tpu.dot_dimension_numbers<[1], [0], [0], [1], [0, 0, 1, 1], [], []>} : vector<32x32xf32>, vector<32x8xf32>, vector<32x8xf32> -> vector<32x8xf32>
    %92 = arith.addf %87, %91 : vector<32x8xf32>
    %c2_106 = arith.constant 2 : index
    %c1_107 = arith.constant 1 : index
    %c0_108 = arith.constant 0 : index
    %c0_109 = arith.constant 0 : index
    %93 = vector.load %arg2[%c2_106, %c1_107, %c0_108, %c0_109] : memref<3x5x32x32xf32, #tpu.memory_space<vmem>>, vector<1x1x32x32xf32>
    %94 = vector.shape_cast %93 : vector<1x1x32x32xf32> to vector<32x32xf32>
    %c0_110 = arith.constant 0 : index
    %c1_111 = arith.constant 1 : index
    %95 = vector.load %arg7[%c0_110, %c1_111] : memref<32x12xf32, #tpu.memory_space<vmem>>, vector<32x8xf32>
    %cst_112 = arith.constant dense<0.000000e+00> : vector<32x8xf32>
    %96 = tpu.matmul %94, %95, %cst_112 {dimension_numbers = #tpu.dot_dimension_numbers<[1], [0], [0], [1], [0, 0, 1, 1], [], []>} : vector<32x32xf32>, vector<32x8xf32>, vector<32x8xf32> -> vector<32x8xf32>
    %97 = arith.addf %92, %96 : vector<32x8xf32>
    %c2_113 = arith.constant 2 : index
    %c2_114 = arith.constant 2 : index
    %c0_115 = arith.constant 0 : index
    %c0_116 = arith.constant 0 : index
    %98 = vector.load %arg2[%c2_113, %c2_114, %c0_115, %c0_116] : memref<3x5x32x32xf32, #tpu.memory_space<vmem>>, vector<1x1x32x32xf32>
    %99 = vector.shape_cast %98 : vector<1x1x32x32xf32> to vector<32x32xf32>
    %c0_117 = arith.constant 0 : index
    %c2_118 = arith.constant 2 : index
    %100 = vector.load %arg7[%c0_117, %c2_118] : memref<32x12xf32, #tpu.memory_space<vmem>>, vector<32x8xf32>
    %cst_119 = arith.constant dense<0.000000e+00> : vector<32x8xf32>
    %101 = tpu.matmul %99, %100, %cst_119 {dimension_numbers = #tpu.dot_dimension_numbers<[1], [0], [0], [1], [0, 0, 1, 1], [], []>} : vector<32x32xf32>, vector<32x8xf32>, vector<32x8xf32> -> vector<32x8xf32>
    %102 = arith.addf %97, %101 : vector<32x8xf32>
    %c2_120 = arith.constant 2 : index
    %c3_121 = arith.constant 3 : index
    %c0_122 = arith.constant 0 : index
    %c0_123 = arith.constant 0 : index
    %103 = vector.load %arg2[%c2_120, %c3_121, %c0_122, %c0_123] : memref<3x5x32x32xf32, #tpu.memory_space<vmem>>, vector<1x1x32x32xf32>
    %104 = vector.shape_cast %103 : vector<1x1x32x32xf32> to vector<32x32xf32>
    %c0_124 = arith.constant 0 : index
    %c3_125 = arith.constant 3 : index
    %105 = vector.load %arg7[%c0_124, %c3_125] : memref<32x12xf32, #tpu.memory_space<vmem>>, vector<32x8xf32>
    %cst_126 = arith.constant dense<0.000000e+00> : vector<32x8xf32>
    %106 = tpu.matmul %104, %105, %cst_126 {dimension_numbers = #tpu.dot_dimension_numbers<[1], [0], [0], [1], [0, 0, 1, 1], [], []>} : vector<32x32xf32>, vector<32x8xf32>, vector<32x8xf32> -> vector<32x8xf32>
    %107 = arith.addf %102, %106 : vector<32x8xf32>
    %c2_127 = arith.constant 2 : index
    %c4_128 = arith.constant 4 : index
    %c0_129 = arith.constant 0 : index
    %c0_130 = arith.constant 0 : index
    %108 = vector.load %arg2[%c2_127, %c4_128, %c0_129, %c0_130] : memref<3x5x32x32xf32, #tpu.memory_space<vmem>>, vector<1x1x32x32xf32>
    %109 = vector.shape_cast %108 : vector<1x1x32x32xf32> to vector<32x32xf32>
    %c0_131 = arith.constant 0 : index
    %c4_132 = arith.constant 4 : index
    %110 = vector.load %arg7[%c0_131, %c4_132] : memref<32x12xf32, #tpu.memory_space<vmem>>, vector<32x8xf32>
    %cst_133 = arith.constant dense<0.000000e+00> : vector<32x8xf32>
    %111 = tpu.matmul %109, %110, %cst_133 {dimension_numbers = #tpu.dot_dimension_numbers<[1], [0], [0], [1], [0, 0, 1, 1], [], []>} : vector<32x32xf32>, vector<32x8xf32>, vector<32x8xf32> -> vector<32x8xf32>
    %112 = arith.addf %107, %111 : vector<32x8xf32>
    %c2_134 = arith.constant 2 : index
    %c0_135 = arith.constant 0 : index
    %c0_136 = arith.constant 0 : index
    %113 = vector.load %arg3[%c2_134, %c0_135, %c0_136] : memref<3x32x1xf32, #tpu.memory_space<vmem>>, vector<1x32x1xf32>
    %114 = vector.shape_cast %113 : vector<1x32x1xf32> to vector<32x1xf32>
    %115 = vector.broadcast %114 : vector<32x1xf32> to vector<32x8xf32>
    %116 = arith.addf %112, %115 : vector<32x8xf32>
    %c2_137 = arith.constant 2 : index
    %c0_138 = arith.constant 0 : index
    %c0_139 = arith.constant 0 : index
    %117 = vector.load %arg4[%c2_137, %c0_138, %c0_139] : memref<3x32x1xf32, #tpu.memory_space<vmem>>, vector<1x32x1xf32>
    %118 = vector.shape_cast %117 : vector<1x32x1xf32> to vector<32x1xf32>
    %119 = vector.broadcast %118 : vector<32x1xf32> to vector<32x8xf32>
    %120 = arith.mulf %116, %119 : vector<32x8xf32>
    %c2_140 = arith.constant 2 : index
    %c0_141 = arith.constant 0 : index
    %c0_142 = arith.constant 0 : index
    %121 = vector.load %arg5[%c2_140, %c0_141, %c0_142] : memref<3x32x1xf32, #tpu.memory_space<vmem>>, vector<1x32x1xf32>
    %122 = vector.shape_cast %121 : vector<1x32x1xf32> to vector<32x1xf32>
    %123 = vector.broadcast %122 : vector<32x1xf32> to vector<32x8xf32>
    %124 = arith.addf %120, %123 : vector<32x8xf32>
    %cst_143 = arith.constant 0.000000e+00 : f32
    %125 = vector.broadcast %cst_143 : f32 to vector<32x8xf32>
    %126 = arith.maximumf %124, %125 : vector<32x8xf32>
    %c0_144 = arith.constant 0 : index
    %c0_145 = arith.constant 0 : index
    %c0_146 = arith.constant 0 : index
    %127 = vector.load %arg6[%c0_144, %c0_145, %c0_146] : memref<1x32x8xf32, #tpu.memory_space<vmem>>, vector<1x32x8xf32>
    %128 = vector.shape_cast %127 : vector<1x32x8xf32> to vector<32x8xf32>
    %129 = vector.shape_cast %126 : vector<32x8xf32> to vector<1x32x8xf32>
    tpu.vector_store %arg6[%c0_144, %c0_145, %c0_146], %129 {strides = array<i32>} : memref<1x32x8xf32, #tpu.memory_space<vmem>>, vector<1x32x8xf32>,
    return
  }
  func.func @transform_0(%arg0: i32) -> (i32, i32, i32) {
    %c0_i32 = arith.constant 0 : i32
    %c0_i32_0 = arith.constant 0 : i32
    %c0_i32_1 = arith.constant 0 : i32
    return %arg0, %c0_i32, %c0_i32_0 : i32, i32, i32
  }
  func.func @transform_1(%arg0: i32) -> (i32, i32, i32, i32) {
    %c0_i32 = arith.constant 0 : i32
    %c0_i32_0 = arith.constant 0 : i32
    %c0_i32_1 = arith.constant 0 : i32
    %c0_i32_2 = arith.constant 0 : i32
    %c0_i32_3 = arith.constant 0 : i32
    return %c0_i32, %c0_i32_0, %c0_i32_1, %c0_i32_2 : i32, i32, i32, i32
  }
  func.func @transform_2(%arg0: i32) -> (i32, i32, i32) {
    %c0_i32 = arith.constant 0 : i32
    %c0_i32_0 = arith.constant 0 : i32
    %c0_i32_1 = arith.constant 0 : i32
    %c0_i32_2 = arith.constant 0 : i32
    return %c0_i32, %c0_i32_0, %c0_i32_1 : i32, i32, i32
  }
  func.func @transform_3(%arg0: i32) -> (i32, i32, i32) {
    %c0_i32 = arith.constant 0 : i32
    %c0_i32_0 = arith.constant 0 : i32
    %c0_i32_1 = arith.constant 0 : i32
    %c0_i32_2 = arith.constant 0 : i32
    return %c0_i32, %c0_i32_0, %c0_i32_1 : i32, i32, i32
  }
  func.func @transform_4(%arg0: i32) -> (i32, i32, i32) {
    %c0_i32 = arith.constant 0 : i32
    %c0_i32_0 = arith.constant 0 : i32
    %c0_i32_1 = arith.constant 0 : i32
    %c0_i32_2 = arith.constant 0 : i32
    return %c0_i32, %c0_i32_0, %c0_i32_1 : i32, i32, i32
  }
  func.func @transform_5(%arg0: i32) -> (i32, i32, i32) {
    %c0_i32 = arith.constant 0 : i32
    %c0_i32_0 = arith.constant 0 : i32
    %c0_i32_1 = arith.constant 0 : i32
    return %arg0, %c0_i32, %c0_i32_0 : i32, i32, i32
  }
}

module attributes {stable_mosaic.version = 11 : i64} {
  func.func @kern(%arg0: i32, %arg1: memref<2x12x16xf32, #tpu.memory_space<vmem>>, %arg2: memref<16x32xf32, #tpu.memory_space<vmem>>, %arg3: memref<1x32xf32, #tpu.memory_space<vmem>>, %arg4: memref<32x32xf32, #tpu.memory_space<vmem>>, %arg5: memref<1x32xf32, #tpu.memory_space<vmem>>, %arg6: memref<8x4xf32, #tpu.memory_space<vmem>>, %arg7: memref<1x4xf32, #tpu.memory_space<vmem>>, %arg8: memref<2x32xf32, #tpu.memory_space<vmem>>, %arg9: memref<2x4xf32, #tpu.memory_space<vmem>>) attributes {dimension_semantics = [#tpu.dimension_semantics<arbitrary>], iteration_bounds = array<i64: 1>, scalar_prefetch = 0 : i64, scratch_operands = 0 : i64, tpu.core_type = #tpu.core_type<tc>, window_params = [{pipeline_mode = #tpu.pipeline_mode<synchronous>, transform_indices = @transform_0, window_bounds = array<i64: 2, 12, 16>}, {pipeline_mode = #tpu.pipeline_mode<synchronous>, transform_indices = @transform_1, window_bounds = array<i64: 16, 32>}, {pipeline_mode = #tpu.pipeline_mode<synchronous>, transform_indices = @transform_2, window_bounds = array<i64: 1, 32>}, {pipeline_mode = #tpu.pipeline_mode<synchronous>, transform_indices = @transform_3, window_bounds = array<i64: 32, 32>}, {pipeline_mode = #tpu.pipeline_mode<synchronous>, transform_indices = @transform_4, window_bounds = array<i64: 1, 32>}, {pipeline_mode = #tpu.pipeline_mode<synchronous>, transform_indices = @transform_5, window_bounds = array<i64: 8, 4>}, {pipeline_mode = #tpu.pipeline_mode<synchronous>, transform_indices = @transform_6, window_bounds = array<i64: 1, 4>}, {pipeline_mode = #tpu.pipeline_mode<synchronous>, transform_indices = @transform_7, window_bounds = array<i64: 2, 32>}, {pipeline_mode = #tpu.pipeline_mode<synchronous>, transform_indices = @transform_8, window_bounds = array<i64: 2, 4>}]} {
    %c0 = arith.constant 0 : index
    %c0_0 = arith.constant 0 : index
    %c0_1 = arith.constant 0 : index
    %0 = vector.load %arg1[%c0, %c0_0, %c0_1] : memref<2x12x16xf32, #tpu.memory_space<vmem>>, vector<1x12x16xf32>
    %1 = vector.shape_cast %0 : vector<1x12x16xf32> to vector<12x16xf32>
    %cst = arith.constant dense<0.000000e+00> : vector<16xf32>
    %2 = vector.multi_reduction <add>, %1, %cst [0] : vector<12x16xf32> to vector<16xf32>
    %3 = vector.shape_cast %2 : vector<16xf32> to vector<1x16xf32>
    %cst_2 = arith.constant 0.0833333358 : f32
    %4 = vector.broadcast %cst_2 : f32 to vector<1x16xf32>
    %5 = arith.mulf %3, %4 : vector<1x16xf32>
    %c1 = arith.constant 1 : index
    %c0_3 = arith.constant 0 : index
    %c0_4 = arith.constant 0 : index
    %6 = vector.load %arg1[%c1, %c0_3, %c0_4] : memref<2x12x16xf32, #tpu.memory_space<vmem>>, vector<1x12x16xf32>
    %7 = vector.shape_cast %6 : vector<1x12x16xf32> to vector<12x16xf32>
    %cst_5 = arith.constant dense<0.000000e+00> : vector<16xf32>
    %8 = vector.multi_reduction <add>, %7, %cst_5 [0] : vector<12x16xf32> to vector<16xf32>
    %9 = vector.shape_cast %8 : vector<16xf32> to vector<1x16xf32>
    %cst_6 = arith.constant 0.0833333358 : f32
    %10 = vector.broadcast %cst_6 : f32 to vector<1x16xf32>
    %11 = arith.mulf %9, %10 : vector<1x16xf32>
    %12 = tpu.concatenate %5, %11 in 0 : vector<1x16xf32>, vector<1x16xf32> -> vector<2x16xf32>
    %c0_7 = arith.constant 0 : index
    %c0_8 = arith.constant 0 : index
    %13 = vector.load %arg2[%c0_7, %c0_8] : memref<16x32xf32, #tpu.memory_space<vmem>>, vector<16x32xf32>
    %cst_9 = arith.constant dense<0.000000e+00> : vector<2x32xf32>
    %14 = tpu.matmul %12, %13, %cst_9 {dimension_numbers = #tpu.dot_dimension_numbers<[1], [0], [0], [1], [0, 0, 1, 1], [], []>} : vector<2x16xf32>, vector<16x32xf32>, vector<2x32xf32> -> vector<2x32xf32>
    %c0_10 = arith.constant 0 : index
    %c0_11 = arith.constant 0 : index
    %15 = vector.load %arg3[%c0_10, %c0_11] : memref<1x32xf32, #tpu.memory_space<vmem>>, vector<1x32xf32>
    %16 = vector.broadcast %15 : vector<1x32xf32> to vector<2x32xf32>
    %17 = arith.addf %14, %16 : vector<2x32xf32>
    %cst_12 = arith.constant 0.000000e+00 : f32
    %18 = vector.broadcast %cst_12 : f32 to vector<2x32xf32>
    %19 = arith.maximumf %17, %18 : vector<2x32xf32>
    %c0_13 = arith.constant 0 : index
    %c0_14 = arith.constant 0 : index
    %20 = vector.load %arg4[%c0_13, %c0_14] : memref<32x32xf32, #tpu.memory_space<vmem>>, vector<32x32xf32>
    %cst_15 = arith.constant dense<0.000000e+00> : vector<2x32xf32>
    %21 = tpu.matmul %19, %20, %cst_15 {dimension_numbers = #tpu.dot_dimension_numbers<[1], [0], [0], [1], [0, 0, 1, 1], [], []>} : vector<2x32xf32>, vector<32x32xf32>, vector<2x32xf32> -> vector<2x32xf32>
    %c0_16 = arith.constant 0 : index
    %c0_17 = arith.constant 0 : index
    %22 = vector.load %arg5[%c0_16, %c0_17] : memref<1x32xf32, #tpu.memory_space<vmem>>, vector<1x32xf32>
    %23 = vector.broadcast %22 : vector<1x32xf32> to vector<2x32xf32>
    %24 = arith.addf %21, %23 : vector<2x32xf32>
    %c0_18 = arith.constant 0 : index
    %c0_19 = arith.constant 0 : index
    %25 = vector.load %arg8[%c0_18, %c0_19] : memref<2x32xf32, #tpu.memory_space<vmem>>, vector<2x32xf32>
    tpu.vector_store %arg8[%c0_18, %c0_19], %24 {strides = array<i32>} : memref<2x32xf32, #tpu.memory_space<vmem>>, vector<2x32xf32>,
    %26 = vector.extract_strided_slice %24 {offsets = [0, 16], sizes = [2, 8], strides = [1, 1]} : vector<2x32xf32> to vector<2x8xf32>
    %c0_20 = arith.constant 0 : index
    %c0_21 = arith.constant 0 : index
    %27 = vector.load %arg6[%c0_20, %c0_21] : memref<8x4xf32, #tpu.memory_space<vmem>>, vector<8x4xf32>
    %cst_22 = arith.constant dense<0.000000e+00> : vector<2x4xf32>
    %28 = tpu.matmul %26, %27, %cst_22 {dimension_numbers = #tpu.dot_dimension_numbers<[1], [0], [0], [1], [0, 0, 1, 1], [], []>} : vector<2x8xf32>, vector<8x4xf32>, vector<2x4xf32> -> vector<2x4xf32>
    %c0_23 = arith.constant 0 : index
    %c0_24 = arith.constant 0 : index
    %29 = vector.load %arg7[%c0_23, %c0_24] : memref<1x4xf32, #tpu.memory_space<vmem>>, vector<1x4xf32>
    %30 = vector.broadcast %29 : vector<1x4xf32> to vector<2x4xf32>
    %31 = arith.addf %28, %30 : vector<2x4xf32>
    %cst_25 = arith.constant dense<0xFF800000> : vector<2xf32>
    %32 = vector.multi_reduction <maximumf>, %31, %cst_25 [1] : vector<2x4xf32> to vector<2xf32>
    %cst_26 = arith.constant 0xFF800000 : f32
    %33 = vector.broadcast %cst_26 : f32 to vector<2xf32>
    %34 = arith.maximumf %33, %32 : vector<2xf32>
    %35 = vector.shape_cast %34 : vector<2xf32> to vector<2x1xf32>
    %36 = vector.broadcast %35 : vector<2x1xf32> to vector<2x4xf32>
    %37 = arith.subf %31, %36 : vector<2x4xf32>
    %38 = math.exp %37 : vector<2x4xf32>
    %cst_27 = arith.constant dense<0.000000e+00> : vector<2xf32>
    %39 = vector.multi_reduction <add>, %38, %cst_27 [1] : vector<2x4xf32> to vector<2xf32>
    %40 = vector.shape_cast %39 : vector<2xf32> to vector<2x1xf32>
    %41 = vector.broadcast %40 : vector<2x1xf32> to vector<2x4xf32>
    %42 = arith.divf %38, %41 : vector<2x4xf32>
    %c0_28 = arith.constant 0 : index
    %c0_29 = arith.constant 0 : index
    %43 = vector.load %arg9[%c0_28, %c0_29] : memref<2x4xf32, #tpu.memory_space<vmem>>, vector<2x4xf32>
    tpu.vector_store %arg9[%c0_28, %c0_29], %42 {strides = array<i32>} : memref<2x4xf32, #tpu.memory_space<vmem>>, vector<2x4xf32>,
    return
  }
  func.func @transform_0(%arg0: i32) -> (i32, i32, i32) {
    %c0_i32 = arith.constant 0 : i32
    %c0_i32_0 = arith.constant 0 : i32
    %c0_i32_1 = arith.constant 0 : i32
    %c0_i32_2 = arith.constant 0 : i32
    return %c0_i32, %c0_i32_0, %c0_i32_1 : i32, i32, i32
  }
  func.func @transform_1(%arg0: i32) -> (i32, i32) {
    %c0_i32 = arith.constant 0 : i32
    %c0_i32_0 = arith.constant 0 : i32
    %c0_i32_1 = arith.constant 0 : i32
    return %c0_i32, %c0_i32_0 : i32, i32
  }
  func.func @transform_2(%arg0: i32) -> (i32, i32) {
    %c0_i32 = arith.constant 0 : i32
    %c0_i32_0 = arith.constant 0 : i32
    %c0_i32_1 = arith.constant 0 : i32
    return %c0_i32, %c0_i32_0 : i32, i32
  }
  func.func @transform_3(%arg0: i32) -> (i32, i32) {
    %c0_i32 = arith.constant 0 : i32
    %c0_i32_0 = arith.constant 0 : i32
    %c0_i32_1 = arith.constant 0 : i32
    return %c0_i32, %c0_i32_0 : i32, i32
  }
  func.func @transform_4(%arg0: i32) -> (i32, i32) {
    %c0_i32 = arith.constant 0 : i32
    %c0_i32_0 = arith.constant 0 : i32
    %c0_i32_1 = arith.constant 0 : i32
    return %c0_i32, %c0_i32_0 : i32, i32
  }
  func.func @transform_5(%arg0: i32) -> (i32, i32) {
    %c0_i32 = arith.constant 0 : i32
    %c0_i32_0 = arith.constant 0 : i32
    %c0_i32_1 = arith.constant 0 : i32
    return %c0_i32, %c0_i32_0 : i32, i32
  }
  func.func @transform_6(%arg0: i32) -> (i32, i32) {
    %c0_i32 = arith.constant 0 : i32
    %c0_i32_0 = arith.constant 0 : i32
    %c0_i32_1 = arith.constant 0 : i32
    return %c0_i32, %c0_i32_0 : i32, i32
  }
  func.func @transform_7(%arg0: i32) -> (i32, i32) {
    %c0_i32 = arith.constant 0 : i32
    %c0_i32_0 = arith.constant 0 : i32
    %c0_i32_1 = arith.constant 0 : i32
    return %c0_i32, %c0_i32_0 : i32, i32
  }
  func.func @transform_8(%arg0: i32) -> (i32, i32) {
    %c0_i32 = arith.constant 0 : i32
    %c0_i32_0 = arith.constant 0 : i32
    %c0_i32_1 = arith.constant 0 : i32
    return %c0_i32, %c0_i32_0 : i32, i32
  }
}

module attributes {stable_mosaic.version = 11 : i64} {
  func.func @kern(%arg0: i32, %arg1: memref<24x16xf32, #tpu.memory_space<vmem>>, %arg2: memref<16x16xf32, #tpu.memory_space<vmem>>, %arg3: memref<16x16xf32, #tpu.memory_space<vmem>>, %arg4: memref<16x128xf32, #tpu.memory_space<vmem>>, %arg5: memref<24x128xf32, #tpu.memory_space<vmem>>) attributes {dimension_semantics = [#tpu.dimension_semantics<arbitrary>], iteration_bounds = array<i64: 1>, scalar_prefetch = 0 : i64, scratch_operands = 0 : i64, tpu.core_type = #tpu.core_type<tc>, window_params = [{pipeline_mode = #tpu.pipeline_mode<synchronous>, transform_indices = @transform_0, window_bounds = array<i64: 24, 16>}, {pipeline_mode = #tpu.pipeline_mode<synchronous>, transform_indices = @transform_1, window_bounds = array<i64: 16, 16>}, {pipeline_mode = #tpu.pipeline_mode<synchronous>, transform_indices = @transform_2, window_bounds = array<i64: 16, 16>}, {pipeline_mode = #tpu.pipeline_mode<synchronous>, transform_indices = @transform_3, window_bounds = array<i64: 16, 128>}, {pipeline_mode = #tpu.pipeline_mode<synchronous>, transform_indices = @transform_4, window_bounds = array<i64: 24, 128>}]} {
    %c0 = arith.constant 0 : index
    %c0_0 = arith.constant 0 : index
    %0 = vector.load %arg1[%c0, %c0_0] : memref<24x16xf32, #tpu.memory_space<vmem>>, vector<24x16xf32>
    %c0_1 = arith.constant 0 : index
    %c0_2 = arith.constant 0 : index
    %1 = vector.load %arg2[%c0_1, %c0_2] : memref<16x16xf32, #tpu.memory_space<vmem>>, vector<16x16xf32>
    %cst = arith.constant dense<0.000000e+00> : vector<24x16xf32>
    %2 = tpu.matmul %0, %1, %cst {dimension_numbers = #tpu.dot_dimension_numbers<[1], [0], [0], [1], [0, 0, 1, 1], [], []>} : vector<24x16xf32>, vector<16x16xf32>, vector<24x16xf32> -> vector<24x16xf32>
    %cst_3 = arith.constant 0.000000e+00 : f32
    %3 = vector.broadcast %cst_3 : f32 to vector<24x16xf32>
    %4 = arith.maximumf %2, %3 : vector<24x16xf32>
    %c0_4 = arith.constant 0 : index
    %c0_5 = arith.constant 0 : index
    %5 = vector.load %arg3[%c0_4, %c0_5] : memref<16x16xf32, #tpu.memory_space<vmem>>, vector<16x16xf32>
    %cst_6 = arith.constant dense<0.000000e+00> : vector<24x16xf32>
    %6 = tpu.matmul %4, %5, %cst_6 {dimension_numbers = #tpu.dot_dimension_numbers<[1], [0], [0], [1], [0, 0, 1, 1], [], []>} : vector<24x16xf32>, vector<16x16xf32>, vector<24x16xf32> -> vector<24x16xf32>
    %cst_7 = arith.constant 0.000000e+00 : f32
    %7 = vector.broadcast %cst_7 : f32 to vector<24x16xf32>
    %8 = arith.maximumf %6, %7 : vector<24x16xf32>
    %c0_8 = arith.constant 0 : index
    %c0_9 = arith.constant 0 : index
    %9 = vector.load %arg4[%c0_8, %c0_9] : memref<16x128xf32, #tpu.memory_space<vmem>>, vector<16x128xf32>
    %cst_10 = arith.constant dense<0.000000e+00> : vector<24x128xf32>
    %10 = tpu.matmul %8, %9, %cst_10 {dimension_numbers = #tpu.dot_dimension_numbers<[1], [0], [0], [1], [0, 0, 1, 1], [], []>} : vector<24x16xf32>, vector<16x128xf32>, vector<24x128xf32> -> vector<24x128xf32>
    %c0_11 = arith.constant 0 : index
    %c0_12 = arith.constant 0 : index
    %11 = vector.load %arg5[%c0_11, %c0_12] : memref<24x128xf32, #tpu.memory_space<vmem>>, vector<24x128xf32>
    tpu.vector_store %arg5[%c0_11, %c0_12], %10 {strides = array<i32>} : memref<24x128xf32, #tpu.memory_space<vmem>>, vector<24x128xf32>,
    return
  }
  func.func @transform_0(%arg0: i32) -> (i32, i32) {
    %c0_i32 = arith.constant 0 : i32
    %c0_i32_0 = arith.constant 0 : i32
    %c0_i32_1 = arith.constant 0 : i32
    return %c0_i32, %c0_i32_0 : i32, i32
  }
  func.func @transform_1(%arg0: i32) -> (i32, i32) {
    %c0_i32 = arith.constant 0 : i32
    %c0_i32_0 = arith.constant 0 : i32
    %c0_i32_1 = arith.constant 0 : i32
    return %c0_i32, %c0_i32_0 : i32, i32
  }
  func.func @transform_2(%arg0: i32) -> (i32, i32) {
    %c0_i32 = arith.constant 0 : i32
    %c0_i32_0 = arith.constant 0 : i32
    %c0_i32_1 = arith.constant 0 : i32
    return %c0_i32, %c0_i32_0 : i32, i32
  }
  func.func @transform_3(%arg0: i32) -> (i32, i32) {
    %c0_i32 = arith.constant 0 : i32
    %c0_i32_0 = arith.constant 0 : i32
    %c0_i32_1 = arith.constant 0 : i32
    return %c0_i32, %c0_i32_0 : i32, i32
  }
  func.func @transform_4(%arg0: i32) -> (i32, i32) {
    %c0_i32 = arith.constant 0 : i32
    %c0_i32_0 = arith.constant 0 : i32
    %c0_i32_1 = arith.constant 0 : i32
    return %c0_i32, %c0_i32_0 : i32, i32
  }
}

module attributes {stable_mosaic.version = 11 : i64} {
  func.func @kern(%arg0: i32, %arg1: memref<1x12x128xf32, #tpu.memory_space<vmem>>, %arg2: memref<1x8x32xf32, #tpu.memory_space<vmem>>, %arg3: memref<1x1x16xf32, #tpu.memory_space<vmem>>, %arg4: memref<1x8x1xf32, #tpu.memory_space<vmem>>, %arg5: memref<32x32xf32, #tpu.memory_space<vmem>>, %arg6: memref<16x32xf32, #tpu.memory_space<vmem>>, %arg7: memref<1x32xf32, #tpu.memory_space<vmem>>, %arg8: memref<32x16xf32, #tpu.memory_space<vmem>>, %arg9: memref<32x128xf32, #tpu.memory_space<vmem>>, %arg10: memref<32x128xf32, #tpu.memory_space<vmem>>, %arg11: memref<1x128xf32, #tpu.memory_space<vmem>>, %arg12: memref<32x16xf32, #tpu.memory_space<vmem>>, %arg13: memref<14x16xf32, #tpu.memory_space<vmem>>, %arg14: memref<1x16xf32, #tpu.memory_space<vmem>>, %arg15: memref<32x128xf32, #tpu.memory_space<vmem>>, %arg16: memref<32x128xf32, #tpu.memory_space<vmem>>, %arg17: memref<32x128xf32, #tpu.memory_space<vmem>>, %arg18: memref<1x128xf32, #tpu.memory_space<vmem>>, %arg19: memref<32x17xf32, #tpu.memory_space<vmem>>, %arg20: memref<32x17xf32, #tpu.memory_space<vmem>>, %arg21: memref<1x17xf32, #tpu.memory_space<vmem>>, %arg22: memref<1x12x1x17xf32, #tpu.memory_space<vmem>>, %arg23: memref<1x12x8x1xf32, #tpu.memory_space<vmem>>) attributes {dimension_semantics = [#tpu.dimension_semantics<parallel>], iteration_bounds = array<i64: 2>, scalar_prefetch = 0 : i64, scratch_operands = 0 : i64, tpu.core_type = #tpu.core_type<tc>, window_params = [{transform_indices = @transform_0, window_bounds = array<i64: 1, 12, 128>}, {transform_indices = @transform_1, window_bounds = array<i64: 1, 8, 32>}, {transform_indices = @transform_2, window_bounds = array<i64: 1, 1, 16>}, {transform_indices = @transform_3, window_bounds = array<i64: 1, 8, 1>}, {pipeline_mode = #tpu.pipeline_mode<synchronous>, transform_indices = @transform_4, window_bounds = array<i64: 32, 32>}, {pipeline_mode = #tpu.pipeline_mode<synchronous>, transform_indices = @transform_5, window_bounds = array<i64: 16, 32>}, {pipeline_mode = #tpu.pipeline_mode<synchronous>, transform_indices = @transform_6, window_bounds = array<i64: 1, 32>}, {pipeline_mode = #tpu.pipeline_mode<synchronous>, transform_indices = @transform_7, window_bounds = array<i64: 32, 16>}, {pipeline_mode = #tpu.pipeline_mode<synchronous>, transform_indices = @transform_8, window_bounds = array<i64: 32, 128>}, {pipeline_mode = #tpu.pipeline_mode<synchronous>, transform_indices = @transform_9, window_bounds = array<i64: 32, 128>}, {pipeline_mode = #tpu.pipeline_mode<synchronous>, transform_indices = @transform_10, window_bounds = array<i64: 1, 128>}, {pipeline_mode = #tpu.pipeline_mode<synchronous>, transform_indices = @transform_11, window_bounds = array<i64: 32, 16>}, {pipeline_mode = #tpu.pipeline_mode<synchronous>, transform_indices = @transform_12, window_bounds = array<i64: 14, 16>}, {pipeline_mode = #tpu.pipeline_mode<synchronous>, transform_indices = @transform_13, window_bounds = array<i64: 1, 16>}, {pipeline_mode = #tpu.pipeline_mode<synchronous>, transform_indices = @transform_14, window_bounds = array<i64: 32, 128>}, {pipeline_mode = #tpu.pipeline_mode<synchronous>, transform_indices = @transform_15, window_bounds = array<i64: 32, 128>}, {pipeline_mode = #tpu.pipeline_mode<synchronous>, transform_indices = @transform_16, window_bounds = array<i64: 32, 128>}, {pipeline_mode = #tpu.pipeline_mode<synchronous>, transform_indices = @transform_17, window_bounds = array<i64: 1, 128>}, {pipeline_mode = #tpu.pipeline_mode<synchronous>, transform_indices = @transform_18, window_bounds = array<i64: 32, 17>}, {pipeline_mode = #tpu.pipeline_mode<synchronous>, transform_indices = @transform_19, window_bounds = array<i64: 32, 17>}, {pipeline_mode = #tpu.pipeline_mode<synchronous>, transform_indices = @transform_20, window_bounds = array<i64: 1, 17>}, {transform_indices = @transform_21, window_bounds = array<i64: 1, 12, 1, 17>}, {transform_indices = @transform_22, window_bounds = array<i64: 1, 12, 8, 1>}]} {
    %c0 = arith.constant 0 : index
    %c0_0 = arith.constant 0 : index
    %c0_1 = arith.constant 0 : index
    %0 = vector.load %arg2[%c0, %c0_0, %c0_1] : memref<1x8x32xf32, #tpu.memory_space<vmem>>, vector<1x8x32xf32>
    %1 = vector.shape_cast %0 : vector<1x8x32xf32> to vector<8x32xf32>
    %c0_2 = arith.constant 0 : index
    %c0_3 = arith.constant 0 : index
    %2 = vector.load %arg5[%c0_2, %c0_3] : memref<32x32xf32, #tpu.memory_space<vmem>>, vector<32x32xf32>
    %cst = arith.constant dense<0.000000e+00> : vector<8x32xf32>
    %3 = tpu.matmul %1, %2, %cst {dimension_numbers = #tpu.dot_dimension_numbers<[1], [0], [0], [1], [0, 0, 1, 1], [], []>} : vector<8x32xf32>, vector<32x32xf32>, vector<8x32xf32> -> vector<8x32xf32>
    %c0_4 = arith.constant 0 : index
    %c0_5 = arith.constant 0 : index
    %c0_6 = arith.constant 0 : index
    %4 = vector.load %arg3[%c0_4, %c0_5, %c0_6] : memref<1x1x16xf32, #tpu.memory_space<vmem>>, vector<1x1x16xf32>
    %5 = vector.shape_cast %4 : vector<1x1x16xf32> to vector<1x16xf32>
    %c0_7 = arith.constant 0 : index
    %c0_8 = arith.constant 0 : index
    %6 = vector.load %arg6[%c0_7, %c0_8] : memref<16x32xf32, #tpu.memory_space<vmem>>, vector<16x32xf32>
    %cst_9 = arith.constant dense<0.000000e+00> : vector<1x32xf32>
    %7 = tpu.matmul %5, %6, %cst_9 {dimension_numbers = #tpu.dot_dimension_numbers<[1], [0], [0], [1], [0, 0, 1, 1], [], []>} : vector<1x16xf32>, vector<16x32xf32>, vector<1x32xf32> -> vector<1x32xf32>
    %8 = vector.broadcast %7 : vector<1x32xf32> to vector<8x32xf32>
    %9 = arith.addf %3, %8 : vector<8x32xf32>
    %c0_10 = arith.constant 0 : index
    %c0_11 = arith.constant 0 : index
    %10 = vector.load %arg7[%c0_10, %c0_11] : memref<1x32xf32, #tpu.memory_space<vmem>>, vector<1x32xf32>
    %11 = vector.broadcast %10 : vector<1x32xf32> to vector<8x32xf32>
    %12 = arith.addf %9, %11 : vector<8x32xf32>
    %c0_12 = arith.constant 0 : index
    %c0_13 = arith.constant 0 : index
    %13 = vector.load %arg8[%c0_12, %c0_13] : memref<32x16xf32, #tpu.memory_space<vmem>>, vector<32x16xf32>
    %cst_14 = arith.constant dense<0.000000e+00> : vector<8x16xf32>
    %14 = tpu.matmul %12, %13, %cst_14 {dimension_numbers = #tpu.dot_dimension_numbers<[1], [0], [0], [1], [0, 0, 1, 1], [], []>} : vector<8x32xf32>, vector<32x16xf32>, vector<8x16xf32> -> vector<8x16xf32>
    %c0_15 = arith.constant 0 : index
    %c0_16 = arith.constant 0 : index
    %c0_17 = arith.constant 0 : index
    %15 = vector.load %arg4[%c0_15, %c0_16, %c0_17] : memref<1x8x1xf32, #tpu.memory_space<vmem>>, vector<1x8x1xf32>
    %16 = vector.shape_cast %15 : vector<1x8x1xf32> to vector<8x1xf32>
    %cst_18 = arith.constant 0.000000e+00 : f32
    %17 = vector.broadcast %cst_18 : f32 to vector<3x1xf32>
    %cst_19 = arith.constant 0.000000e+00 : f32
    %18 = vector.broadcast %cst_19 : f32 to vector<1x32xf32>
    %cst_20 = arith.constant 0.000000e+00 : f32
    %19 = vector.broadcast %cst_20 : f32 to vector<1x32xf32>
    %cst_21 = arith.constant 0.000000e+00 : f32
    %20 = vector.broadcast %cst_21 : f32 to vector<1x32xf32>
    %cst_22 = arith.constant 0.000000e+00 : f32
    %21 = vector.broadcast %cst_22 : f32 to vector<1x32xf32>
    %cst_23 = arith.constant 0.000000e+00 : f32
    %22 = vector.broadcast %cst_23 : f32 to vector<8x1xf32>
    %cst_24 = arith.constant 0.000000e+00 : f32
    %23 = vector.broadcast %cst_24 : f32 to vector<8x1xf32>
    %cst_25 = arith.constant 0.000000e+00 : f32
    %24 = vector.broadcast %cst_25 : f32 to vector<1x32xf32>
    %c0_i32 = arith.constant 0 : i32
    %c12_i32 = arith.constant 12 : i32
    %25 = arith.addi %c0_i32, %c12_i32 : i32
    %c1_i32 = arith.constant 1 : i32
    %26:7 = scf.for %arg24 = %c0_i32 to %25 step %c1_i32 iter_args(%arg25 = %18, %arg26 = %19, %arg27 = %20, %arg28 = %21, %arg29 = %22, %arg30 = %23, %arg31 = %24) -> (vector<1x32xf32>, vector<1x32xf32>, vector<1x32xf32>, vector<1x32xf32>, vector<8x1xf32>, vector<8x1xf32>, vector<1x32xf32>)  : i32 {
      %c0_27 = arith.constant 0 : index
      %27 = arith.index_cast %arg24 : i32 to index
      %c0_28 = arith.constant 0 : index
      %28 = vector.load %arg1[%c0_27, %27, %c0_28] : memref<1x12x128xf32, #tpu.memory_space<vmem>>, vector<1x1x128xf32>
      %29 = vector.shape_cast %28 : vector<1x1x128xf32> to vector<1x128xf32>
      %c0_29 = arith.constant 0 : index
      %c0_30 = arith.constant 0 : index
      %30 = vector.load %arg9[%c0_29, %c0_30] : memref<32x128xf32, #tpu.memory_space<vmem>>, vector<32x128xf32>
      %cst_31 = arith.constant dense<0.000000e+00> : vector<1x128xf32>
      %31 = tpu.matmul %arg31, %30, %cst_31 {dimension_numbers = #tpu.dot_dimension_numbers<[1], [0], [0], [1], [0, 0, 1, 1], [], []>} : vector<1x32xf32>, vector<32x128xf32>, vector<1x128xf32> -> vector<1x128xf32>
      %32 = arith.addf %29, %31 : vector<1x128xf32>
      %c0_32 = arith.constant 0 : index
      %c0_33 = arith.constant 0 : index
      %33 = vector.load %arg10[%c0_32, %c0_33] : memref<32x128xf32, #tpu.memory_space<vmem>>, vector<32x128xf32>
      %cst_34 = arith.constant dense<0.000000e+00> : vector<1x128xf32>
      %34 = tpu.matmul %arg25, %33, %cst_34 {dimension_numbers = #tpu.dot_dimension_numbers<[1], [0], [0], [1], [0, 0, 1, 1], [], []>} : vector<1x32xf32>, vector<32x128xf32>, vector<1x128xf32> -> vector<1x128xf32>
      %35 = arith.addf %32, %34 : vector<1x128xf32>
      %c0_35 = arith.constant 0 : index
      %c0_36 = arith.constant 0 : index
      %36 = vector.load %arg11[%c0_35, %c0_36] : memref<1x128xf32, #tpu.memory_space<vmem>>, vector<1x128xf32>
      %37 = arith.addf %35, %36 : vector<1x128xf32>
      %38 = vector.extract_strided_slice %37 {offsets = [0, 0], sizes = [1, 96], strides = [1, 1]} : vector<1x128xf32> to vector<1x96xf32>
      %39 = arith.negf %38 : vector<1x96xf32>
      %40 = math.exp %39 : vector<1x96xf32>
      %cst_37 = arith.constant 1.000000e+00 : f32
      %41 = vector.broadcast %cst_37 : f32 to vector<1x96xf32>
      %42 = arith.addf %41, %40 : vector<1x96xf32>
      %43 = arith.divf %41, %42 : vector<1x96xf32>
      %44 = vector.extract_strided_slice %43 {offsets = [0, 0], sizes = [1, 32], strides = [1, 1]} : vector<1x96xf32> to vector<1x32xf32>
      %45 = vector.extract_strided_slice %43 {offsets = [0, 32], sizes = [1, 32], strides = [1, 1]} : vector<1x96xf32> to vector<1x32xf32>
      %46 = vector.extract_strided_slice %43 {offsets = [0, 64], sizes = [1, 32], strides = [1, 1]} : vector<1x96xf32> to vector<1x32xf32>
      %47 = vector.extract_strided_slice %37 {offsets = [0, 96], sizes = [1, 32], strides = [1, 1]} : vector<1x128xf32> to vector<1x32xf32>
      %48 = math.tanh %47 : vector<1x32xf32>
      %49 = arith.mulf %45, %arg26 : vector<1x32xf32>
      %50 = arith.mulf %44, %48 : vector<1x32xf32>
      %51 = arith.addf %49, %50 : vector<1x32xf32>
      %52 = math.tanh %51 : vector<1x32xf32>
      %53 = arith.mulf %46, %52 : vector<1x32xf32>
      %c0_38 = arith.constant 0 : index
      %c0_39 = arith.constant 0 : index
      %54 = vector.load %arg12[%c0_38, %c0_39] : memref<32x16xf32, #tpu.memory_space<vmem>>, vector<32x16xf32>
      %cst_40 = arith.constant dense<0.000000e+00> : vector<1x16xf32>
      %55 = tpu.matmul %53, %54, %cst_40 {dimension_numbers = #tpu.dot_dimension_numbers<[1], [0], [0], [1], [0, 0, 1, 1], [], []>} : vector<1x32xf32>, vector<32x16xf32>, vector<1x16xf32> -> vector<1x16xf32>
      %56 = tpu.concatenate %17, %arg29, %17 in 0 : vector<3x1xf32>, vector<8x1xf32>, vector<3x1xf32> -> vector<14x1xf32>
      %57 = tpu.concatenate %17, %arg30, %17 in 0 : vector<3x1xf32>, vector<8x1xf32>, vector<3x1xf32> -> vector<14x1xf32>
      %58 = vector.extract_strided_slice %56 {offsets = [0, 0], sizes = [8, 1], strides = [1, 1]} : vector<14x1xf32> to vector<8x1xf32>
      %59 = vector.extract_strided_slice %56 {offsets = [1, 0], sizes = [8, 1], strides = [1, 1]} : vector<14x1xf32> to vector<8x1xf32>
      %60 = vector.extract_strided_slice %56 {offsets = [2, 0], sizes = [8, 1], strides = [1, 1]} : vector<14x1xf32> to vector<8x1xf32>
      %61 = vector.extract_strided_slice %56 {offsets = [3, 0], sizes = [8, 1], strides = [1, 1]} : vector<14x1xf32> to vector<8x1xf32>
      %62 = vector.extract_strided_slice %56 {offsets = [4, 0], sizes = [8, 1], strides = [1, 1]} : vector<14x1xf32> to vector<8x1xf32>
      %63 = vector.extract_strided_slice %56 {offsets = [5, 0], sizes = [8, 1], strides = [1, 1]} : vector<14x1xf32> to vector<8x1xf32>
      %64 = vector.extract_strided_slice %56 {offsets = [6, 0], sizes = [8, 1], strides = [1, 1]} : vector<14x1xf32> to vector<8x1xf32>
      %65 = vector.extract_strided_slice %57 {offsets = [0, 0], sizes = [8, 1], strides = [1, 1]} : vector<14x1xf32> to vector<8x1xf32>
      %66 = vector.extract_strided_slice %57 {offsets = [1, 0], sizes = [8, 1], strides = [1, 1]} : vector<14x1xf32> to vector<8x1xf32>
      %67 = vector.extract_strided_slice %57 {offsets = [2, 0], sizes = [8, 1], strides = [1, 1]} : vector<14x1xf32> to vector<8x1xf32>
      %68 = vector.extract_strided_slice %57 {offsets = [3, 0], sizes = [8, 1], strides = [1, 1]} : vector<14x1xf32> to vector<8x1xf32>
      %69 = vector.extract_strided_slice %57 {offsets = [4, 0], sizes = [8, 1], strides = [1, 1]} : vector<14x1xf32> to vector<8x1xf32>
      %70 = vector.extract_strided_slice %57 {offsets = [5, 0], sizes = [8, 1], strides = [1, 1]} : vector<14x1xf32> to vector<8x1xf32>
      %71 = vector.extract_strided_slice %57 {offsets = [6, 0], sizes = [8, 1], strides = [1, 1]} : vector<14x1xf32> to vector<8x1xf32>
      %72 = tpu.concatenate %58, %59, %60, %61, %62, %63, %64, %65, %66, %67, %68, %69, %70, %71 in 1 : vector<8x1xf32>, vector<8x1xf32>, vector<8x1xf32>, vector<8x1xf32>, vector<8x1xf32>, vector<8x1xf32>, vector<8x1xf32>, vector<8x1xf32>, vector<8x1xf32>, vector<8x1xf32>, vector<8x1xf32>, vector<8x1xf32>, vector<8x1xf32>, vector<8x1xf32> -> vector<8x14xf32>
      %c0_41 = arith.constant 0 : index
      %c0_42 = arith.constant 0 : index
      %73 = vector.load %arg13[%c0_41, %c0_42] : memref<14x16xf32, #tpu.memory_space<vmem>>, vector<14x16xf32>
      %cst_43 = arith.constant dense<0.000000e+00> : vector<8x16xf32>
      %74 = tpu.matmul %72, %73, %cst_43 {dimension_numbers = #tpu.dot_dimension_numbers<[1], [0], [0], [1], [0, 0, 1, 1], [], []>} : vector<8x14xf32>, vector<14x16xf32>, vector<8x16xf32> -> vector<8x16xf32>
      %75 = vector.broadcast %55 : vector<1x16xf32> to vector<8x16xf32>
      %76 = arith.addf %75, %14 : vector<8x16xf32>
      %77 = arith.addf %76, %74 : vector<8x16xf32>
      %78 = math.tanh %77 : vector<8x16xf32>
      %c0_44 = arith.constant 0 : index
      %c0_45 = arith.constant 0 : index
      %79 = vector.load %arg14[%c0_44, %c0_45] : memref<1x16xf32, #tpu.memory_space<vmem>>, vector<1x16xf32>
      %80 = vector.broadcast %79 : vector<1x16xf32> to vector<8x16xf32>
      %81 = arith.mulf %78, %80 : vector<8x16xf32>
      %cst_46 = arith.constant dense<0.000000e+00> : vector<8xf32>
      %82 = vector.multi_reduction <add>, %81, %cst_46 [1] : vector<8x16xf32> to vector<8xf32>
      %83 = vector.shape_cast %82 : vector<8xf32> to vector<8x1xf32>
      %cst_47 = arith.constant 5.000000e-01 : f32
      %84 = vector.broadcast %cst_47 : f32 to vector<8x1xf32>
      %85 = arith.cmpf ogt, %16, %84 : vector<8x1xf32>
      %cst_48 = arith.constant -1.000000e+09 : f32
      %86 = vector.broadcast %cst_48 : f32 to vector<8x1xf32>
      %87 = arith.select %85, %83, %86 : vector<8x1xi1>, vector<8x1xf32>
      %cst_49 = arith.constant dense<0xFF800000> : vector<1xf32>
      %88 = vector.multi_reduction <maximumf>, %87, %cst_49 [0] : vector<8x1xf32> to vector<1xf32>
      %89 = vector.shape_cast %88 : vector<1xf32> to vector<1x1xf32>
      %90 = vector.broadcast %89 : vector<1x1xf32> to vector<8x1xf32>
      %91 = arith.subf %87, %90 : vector<8x1xf32>
      %92 = math.exp %91 : vector<8x1xf32>
      %cst_50 = arith.constant dense<0.000000e+00> : vector<1xf32>
      %93 = vector.multi_reduction <add>, %92, %cst_50 [0] : vector<8x1xf32> to vector<1xf32>
      %94 = vector.shape_cast %93 : vector<1xf32> to vector<1x1xf32>
      %95 = vector.broadcast %94 : vector<1x1xf32> to vector<8x1xf32>
      %96 = arith.divf %92, %95 : vector<8x1xf32>
      %97 = vector.broadcast %96 : vector<8x1xf32> to vector<8x32xf32>
      %98 = arith.mulf %97, %12 : vector<8x32xf32>
      %cst_51 = arith.constant dense<0.000000e+00> : vector<32xf32>
      %99 = vector.multi_reduction <add>, %98, %cst_51 [0] : vector<8x32xf32> to vector<32xf32>
      %100 = vector.shape_cast %99 : vector<32xf32> to vector<1x32xf32>
      %c0_52 = arith.constant 0 : index
      %c0_53 = arith.constant 0 : index
      %101 = vector.load %arg15[%c0_52, %c0_53] : memref<32x128xf32, #tpu.memory_space<vmem>>, vector<32x128xf32>
      %cst_54 = arith.constant dense<0.000000e+00> : vector<1x128xf32>
      %102 = tpu.matmul %53, %101, %cst_54 {dimension_numbers = #tpu.dot_dimension_numbers<[1], [0], [0], [1], [0, 0, 1, 1], [], []>} : vector<1x32xf32>, vector<32x128xf32>, vector<1x128xf32> -> vector<1x128xf32>
      %c0_55 = arith.constant 0 : index
      %c0_56 = arith.constant 0 : index
      %103 = vector.load %arg16[%c0_55, %c0_56] : memref<32x128xf32, #tpu.memory_space<vmem>>, vector<32x128xf32>
      %cst_57 = arith.constant dense<0.000000e+00> : vector<1x128xf32>
      %104 = tpu.matmul %100, %103, %cst_57 {dimension_numbers = #tpu.dot_dimension_numbers<[1], [0], [0], [1], [0, 0, 1, 1], [], []>} : vector<1x32xf32>, vector<32x128xf32>, vector<1x128xf32> -> vector<1x128xf32>
      %105 = arith.addf %102, %104 : vector<1x128xf32>
      %c0_58 = arith.constant 0 : index
      %c0_59 = arith.constant 0 : index
      %106 = vector.load %arg17[%c0_58, %c0_59] : memref<32x128xf32, #tpu.memory_space<vmem>>, vector<32x128xf32>
      %cst_60 = arith.constant dense<0.000000e+00> : vector<1x128xf32>
      %107 = tpu.matmul %arg27, %106, %cst_60 {dimension_numbers = #tpu.dot_dimension_numbers<[1], [0], [0], [1], [0, 0, 1, 1], [], []>} : vector<1x32xf32>, vector<32x128xf32>, vector<1x128xf32> -> vector<1x128xf32>
      %108 = arith.addf %105, %107 : vector<1x128xf32>
      %c0_61 = arith.constant 0 : index
      %c0_62 = arith.constant 0 : index
      %109 = vector.load %arg18[%c0_61, %c0_62] : memref<1x128xf32, #tpu.memory_space<vmem>>, vector<1x128xf32>
      %110 = arith.addf %108, %109 : vector<1x128xf32>
      %111 = vector.extract_strided_slice %110 {offsets = [0, 0], sizes = [1, 96], strides = [1, 1]} : vector<1x128xf32> to vector<1x96xf32>
      %112 = arith.negf %111 : vector<1x96xf32>
      %113 = math.exp %112 : vector<1x96xf32>
      %cst_63 = arith.constant 1.000000e+00 : f32
      %114 = vector.broadcast %cst_63 : f32 to vector<1x96xf32>
      %115 = arith.addf %114, %113 : vector<1x96xf32>
      %116 = arith.divf %114, %115 : vector<1x96xf32>
      %117 = vector.extract_strided_slice %116 {offsets = [0, 0], sizes = [1, 32], strides = [1, 1]} : vector<1x96xf32> to vector<1x32xf32>
      %118 = vector.extract_strided_slice %116 {offsets = [0, 32], sizes = [1, 32], strides = [1, 1]} : vector<1x96xf32> to vector<1x32xf32>
      %119 = vector.extract_strided_slice %116 {offsets = [0, 64], sizes = [1, 32], strides = [1, 1]} : vector<1x96xf32> to vector<1x32xf32>
      %120 = vector.extract_strided_slice %110 {offsets = [0, 96], sizes = [1, 32], strides = [1, 1]} : vector<1x128xf32> to vector<1x32xf32>
      %121 = math.tanh %120 : vector<1x32xf32>
      %122 = arith.mulf %118, %arg28 : vector<1x32xf32>
      %123 = arith.mulf %117, %121 : vector<1x32xf32>
      %124 = arith.addf %122, %123 : vector<1x32xf32>
      %125 = math.tanh %124 : vector<1x32xf32>
      %126 = arith.mulf %119, %125 : vector<1x32xf32>
      %c0_64 = arith.constant 0 : index
      %c0_65 = arith.constant 0 : index
      %127 = vector.load %arg19[%c0_64, %c0_65] : memref<32x17xf32, #tpu.memory_space<vmem>>, vector<32x17xf32>
      %cst_66 = arith.constant dense<0.000000e+00> : vector<1x17xf32>
      %128 = tpu.matmul %126, %127, %cst_66 {dimension_numbers = #tpu.dot_dimension_numbers<[1], [0], [0], [1], [0, 0, 1, 1], [], []>} : vector<1x32xf32>, vector<32x17xf32>, vector<1x17xf32> -> vector<1x17xf32>
      %c0_67 = arith.constant 0 : index
      %c0_68 = arith.constant 0 : index
      %129 = vector.load %arg20[%c0_67, %c0_68] : memref<32x17xf32, #tpu.memory_space<vmem>>, vector<32x17xf32>
      %cst_69 = arith.constant dense<0.000000e+00> : vector<1x17xf32>
      %130 = tpu.matmul %100, %129, %cst_69 {dimension_numbers = #tpu.dot_dimension_numbers<[1], [0], [0], [1], [0, 0, 1, 1], [], []>} : vector<1x32xf32>, vector<32x17xf32>, vector<1x17xf32> -> vector<1x17xf32>
      %131 = arith.addf %128, %130 : vector<1x17xf32>
      %c0_70 = arith.constant 0 : index
      %c0_71 = arith.constant 0 : index
      %132 = vector.load %arg21[%c0_70, %c0_71] : memref<1x17xf32, #tpu.memory_space<vmem>>, vector<1x17xf32>
      %133 = arith.addf %131, %132 : vector<1x17xf32>
      %134 = vector.shape_cast %133 : vector<1x17xf32> to vector<1x1x17xf32>
      %c0_72 = arith.constant 0 : index
      %135 = arith.index_cast %arg24 : i32 to index
      %c0_73 = arith.constant 0 : index
      %c0_74 = arith.constant 0 : index
      %136 = vector.load %arg22[%c0_72, %135, %c0_73, %c0_74] : memref<1x12x1x17xf32, #tpu.memory_space<vmem>>, vector<1x1x1x17xf32>
      %137 = vector.shape_cast %136 : vector<1x1x1x17xf32> to vector<1x1x17xf32>
      %138 = vector.shape_cast %134 : vector<1x1x17xf32> to vector<1x1x1x17xf32>
      tpu.vector_store %arg22[%c0_72, %135, %c0_73, %c0_74], %138 {strides = array<i32>} : memref<1x12x1x17xf32, #tpu.memory_space<vmem>>, vector<1x1x1x17xf32>,
      %139 = vector.shape_cast %96 : vector<8x1xf32> to vector<1x8x1xf32>
      %c0_75 = arith.constant 0 : index
      %140 = arith.index_cast %arg24 : i32 to index
      %c0_76 = arith.constant 0 : index
      %c0_77 = arith.constant 0 : index
      %141 = vector.load %arg23[%c0_75, %140, %c0_76, %c0_77] : memref<1x12x8x1xf32, #tpu.memory_space<vmem>>, vector<1x1x8x1xf32>
      %142 = vector.shape_cast %141 : vector<1x1x8x1xf32> to vector<1x8x1xf32>
      %143 = vector.shape_cast %139 : vector<1x8x1xf32> to vector<1x1x8x1xf32>
      tpu.vector_store %arg23[%c0_75, %140, %c0_76, %c0_77], %143 {strides = array<i32>} : memref<1x12x8x1xf32, #tpu.memory_space<vmem>>, vector<1x1x8x1xf32>,
      %144 = arith.addf %arg30, %96 : vector<8x1xf32>
      scf.yield %53, %51, %126, %124, %96, %144, %100 : vector<1x32xf32>, vector<1x32xf32>, vector<1x32xf32>, vector<1x32xf32>, vector<8x1xf32>, vector<8x1xf32>, vector<1x32xf32>
    }
    %c12_i32_26 = arith.constant 12 : i32
    return
  }
  func.func @transform_0(%arg0: i32) -> (i32, i32, i32) {
    %c0_i32 = arith.constant 0 : i32
    %c0_i32_0 = arith.constant 0 : i32
    %c0_i32_1 = arith.constant 0 : i32
    return %arg0, %c0_i32, %c0_i32_0 : i32, i32, i32
  }
  func.func @transform_1(%arg0: i32) -> (i32, i32, i32) {
    %c0_i32 = arith.constant 0 : i32
    %c0_i32_0 = arith.constant 0 : i32
    %c0_i32_1 = arith.constant 0 : i32
    return %arg0, %c0_i32, %c0_i32_0 : i32, i32, i32
  }
  func.func @transform_2(%arg0: i32) -> (i32, i32, i32) {
    %c0_i32 = arith.constant 0 : i32
    %c0_i32_0 = arith.constant 0 : i32
    %c0_i32_1 = arith.constant 0 : i32
    return %arg0, %c0_i32, %c0_i32_0 : i32, i32, i32
  }
  func.func @transform_3(%arg0: i32) -> (i32, i32, i32) {
    %c0_i32 = arith.constant 0 : i32
    %c0_i32_0 = arith.constant 0 : i32
    %c0_i32_1 = arith.constant 0 : i32
    return %arg0, %c0_i32, %c0_i32_0 : i32, i32, i32
  }
  func.func @transform_4(%arg0: i32) -> (i32, i32) {
    %c0_i32 = arith.constant 0 : i32
    %c0_i32_0 = arith.constant 0 : i32
    %c0_i32_1 = arith.constant 0 : i32
    return %c0_i32, %c0_i32_0 : i32, i32
  }
  func.func @transform_5(%arg0: i32) -> (i32, i32) {
    %c0_i32 = arith.constant 0 : i32
    %c0_i32_0 = arith.constant 0 : i32
    %c0_i32_1 = arith.constant 0 : i32
    return %c0_i32, %c0_i32_0 : i32, i32
  }
  func.func @transform_6(%arg0: i32) -> (i32, i32) {
    %c0_i32 = arith.constant 0 : i32
    %c0_i32_0 = arith.constant 0 : i32
    %c0_i32_1 = arith.constant 0 : i32
    return %c0_i32, %c0_i32_0 : i32, i32
  }
  func.func @transform_7(%arg0: i32) -> (i32, i32) {
    %c0_i32 = arith.constant 0 : i32
    %c0_i32_0 = arith.constant 0 : i32
    %c0_i32_1 = arith.constant 0 : i32
    return %c0_i32, %c0_i32_0 : i32, i32
  }
  func.func @transform_8(%arg0: i32) -> (i32, i32) {
    %c0_i32 = arith.constant 0 : i32
    %c0_i32_0 = arith.constant 0 : i32
    %c0_i32_1 = arith.constant 0 : i32
    return %c0_i32, %c0_i32_0 : i32, i32
  }
  func.func @transform_9(%arg0: i32) -> (i32, i32) {
    %c0_i32 = arith.constant 0 : i32
    %c0_i32_0 = arith.constant 0 : i32
    %c0_i32_1 = arith.constant 0 : i32
    return %c0_i32, %c0_i32_0 : i32, i32
  }
  func.func @transform_10(%arg0: i32) -> (i32, i32) {
    %c0_i32 = arith.constant 0 : i32
    %c0_i32_0 = arith.constant 0 : i32
    %c0_i32_1 = arith.constant 0 : i32
    return %c0_i32, %c0_i32_0 : i32, i32
  }
  func.func @transform_11(%arg0: i32) -> (i32, i32) {
    %c0_i32 = arith.constant 0 : i32
    %c0_i32_0 = arith.constant 0 : i32
    %c0_i32_1 = arith.constant 0 : i32
    return %c0_i32, %c0_i32_0 : i32, i32
  }
  func.func @transform_12(%arg0: i32) -> (i32, i32) {
    %c0_i32 = arith.constant 0 : i32
    %c0_i32_0 = arith.constant 0 : i32
    %c0_i32_1 = arith.constant 0 : i32
    return %c0_i32, %c0_i32_0 : i32, i32
  }
  func.func @transform_13(%arg0: i32) -> (i32, i32) {
    %c0_i32 = arith.constant 0 : i32
    %c0_i32_0 = arith.constant 0 : i32
    %c0_i32_1 = arith.constant 0 : i32
    return %c0_i32, %c0_i32_0 : i32, i32
  }
  func.func @transform_14(%arg0: i32) -> (i32, i32) {
    %c0_i32 = arith.constant 0 : i32
    %c0_i32_0 = arith.constant 0 : i32
    %c0_i32_1 = arith.constant 0 : i32
    return %c0_i32, %c0_i32_0 : i32, i32
  }
  func.func @transform_15(%arg0: i32) -> (i32, i32) {
    %c0_i32 = arith.constant 0 : i32
    %c0_i32_0 = arith.constant 0 : i32
    %c0_i32_1 = arith.constant 0 : i32
    return %c0_i32, %c0_i32_0 : i32, i32
  }
  func.func @transform_16(%arg0: i32) -> (i32, i32) {
    %c0_i32 = arith.constant 0 : i32
    %c0_i32_0 = arith.constant 0 : i32
    %c0_i32_1 = arith.constant 0 : i32
    return %c0_i32, %c0_i32_0 : i32, i32
  }
  func.func @transform_17(%arg0: i32) -> (i32, i32) {
    %c0_i32 = arith.constant 0 : i32
    %c0_i32_0 = arith.constant 0 : i32
    %c0_i32_1 = arith.constant 0 : i32
    return %c0_i32, %c0_i32_0 : i32, i32
  }
  func.func @transform_18(%arg0: i32) -> (i32, i32) {
    %c0_i32 = arith.constant 0 : i32
    %c0_i32_0 = arith.constant 0 : i32
    %c0_i32_1 = arith.constant 0 : i32
    return %c0_i32, %c0_i32_0 : i32, i32
  }
  func.func @transform_19(%arg0: i32) -> (i32, i32) {
    %c0_i32 = arith.constant 0 : i32
    %c0_i32_0 = arith.constant 0 : i32
    %c0_i32_1 = arith.constant 0 : i32
    return %c0_i32, %c0_i32_0 : i32, i32
  }
  func.func @transform_20(%arg0: i32) -> (i32, i32) {
    %c0_i32 = arith.constant 0 : i32
    %c0_i32_0 = arith.constant 0 : i32
    %c0_i32_1 = arith.constant 0 : i32
    return %c0_i32, %c0_i32_0 : i32, i32
  }
  func.func @transform_21(%arg0: i32) -> (i32, i32, i32, i32) {
    %c0_i32 = arith.constant 0 : i32
    %c0_i32_0 = arith.constant 0 : i32
    %c0_i32_1 = arith.constant 0 : i32
    %c0_i32_2 = arith.constant 0 : i32
    return %arg0, %c0_i32, %c0_i32_0, %c0_i32_1 : i32, i32, i32, i32
  }
  func.func @transform_22(%arg0: i32) -> (i32, i32, i32, i32) {
    %c0_i32 = arith.constant 0 : i32
    %c0_i32_0 = arith.constant 0 : i32
    %c0_i32_1 = arith.constant 0 : i32
    %c0_i32_2 = arith.constant 0 : i32
    return %arg0, %c0_i32, %c0_i32_0, %c0_i32_1 : i32, i32, i32, i32
  }
}

module attributes {stable_mosaic.version = 11 : i64} {
  func.func @kern(%arg0: i32, %arg1: memref<1x16x12xf32, #tpu.memory_space<vmem>>, %arg2: memref<5x32x16xf32, #tpu.memory_space<vmem>>, %arg3: memref<32x1xf32, #tpu.memory_space<vmem>>, %arg4: memref<32x1xf32, #tpu.memory_space<vmem>>, %arg5: memref<32x1xf32, #tpu.memory_space<vmem>>, %arg6: memref<5x32x32xf32, #tpu.memory_space<vmem>>, %arg7: memref<32x1xf32, #tpu.memory_space<vmem>>, %arg8: memref<32x1xf32, #tpu.memory_space<vmem>>, %arg9: memref<32x1xf32, #tpu.memory_space<vmem>>, %arg10: memref<5x16x32xf32, #tpu.memory_space<vmem>>, %arg11: memref<16x1xf32, #tpu.memory_space<vmem>>, %arg12: memref<16x1xf32, #tpu.memory_space<vmem>>, %arg13: memref<16x1xf32, #tpu.memory_space<vmem>>, %arg14: memref<1x16x12xf32, #tpu.memory_space<vmem>>, %arg15: memref<32x16xf32, #tpu.memory_space<vmem>>) attributes {dimension_semantics = [#tpu.dimension_semantics<parallel>], iteration_bounds = array<i64: 2>, scalar_prefetch = 0 : i64, scratch_operands = 1 : i64, tpu.core_type = #tpu.core_type<tc>, window_params = [{transform_indices = @transform_0, window_bounds = array<i64: 1, 16, 12>}, {pipeline_mode = #tpu.pipeline_mode<synchronous>, transform_indices = @transform_1, window_bounds = array<i64: 5, 32, 16>}, {pipeline_mode = #tpu.pipeline_mode<synchronous>, transform_indices = @transform_2, window_bounds = array<i64: 32, 1>}, {pipeline_mode = #tpu.pipeline_mode<synchronous>, transform_indices = @transform_3, window_bounds = array<i64: 32, 1>}, {pipeline_mode = #tpu.pipeline_mode<synchronous>, transform_indices = @transform_4, window_bounds = array<i64: 32, 1>}, {pipeline_mode = #tpu.pipeline_mode<synchronous>, transform_indices = @transform_5, window_bounds = array<i64: 5, 32, 32>}, {pipeline_mode = #tpu.pipeline_mode<synchronous>, transform_indices = @transform_6, window_bounds = array<i64: 32, 1>}, {pipeline_mode = #tpu.pipeline_mode<synchronous>, transform_indices = @transform_7, window_bounds = array<i64: 32, 1>}, {pipeline_mode = #tpu.pipeline_mode<synchronous>, transform_indices = @transform_8, window_bounds = array<i64: 32, 1>}, {pipeline_mode = #tpu.pipeline_mode<synchronous>, transform_indices = @transform_9, window_bounds = array<i64: 5, 16, 32>}, {pipeline_mode = #tpu.pipeline_mode<synchronous>, transform_indices = @transform_10, window_bounds = array<i64: 16, 1>}, {pipeline_mode = #tpu.pipeline_mode<synchronous>, transform_indices = @transform_11, window_bounds = array<i64: 16, 1>}, {pipeline_mode = #tpu.pipeline_mode<synchronous>, transform_indices = @transform_12, window_bounds = array<i64: 16, 1>}, {transform_indices = @transform_13, window_bounds = array<i64: 1, 16, 12>}]} {
    %cst = arith.constant 0.000000e+00 : f32
    %0 = vector.broadcast %cst : f32 to vector<32x16xf32>
    %c0 = arith.constant 0 : index
    %c0_0 = arith.constant 0 : index
    %1 = vector.load %arg15[%c0, %c0_0] : memref<32x16xf32, #tpu.memory_space<vmem>>, vector<32x16xf32>
    tpu.vector_store %arg15[%c0, %c0_0], %0 {strides = array<i32>} : memref<32x16xf32, #tpu.memory_space<vmem>>, vector<32x16xf32>,
    %c0_1 = arith.constant 0 : index
    %c0_2 = arith.constant 0 : index
    %c0_3 = arith.constant 0 : index
    %2 = vector.load %arg1[%c0_1, %c0_2, %c0_3] : memref<1x16x12xf32, #tpu.memory_space<vmem>>, vector<1x16x12xf32>
    %3 = vector.shape_cast %2 : vector<1x16x12xf32> to vector<16x12xf32>
    %c0_4 = arith.constant 0 : index
    %c2 = arith.constant 2 : index
    %4 = vector.load %arg15[%c0_4, %c2] : memref<32x16xf32, #tpu.memory_space<vmem>>, vector<16x12xf32>
    tpu.vector_store %arg15[%c0_4, %c2], %3 {strides = array<i32>} : memref<32x16xf32, #tpu.memory_space<vmem>>, vector<16x12xf32>,
    %cst_5 = arith.constant 0.000000e+00 : f32
    %5 = vector.broadcast %cst_5 : f32 to vector<32x12xf32>
    %c0_6 = arith.constant 0 : index
    %c0_7 = arith.constant 0 : index
    %c0_8 = arith.constant 0 : index
    %6 = vector.load %arg2[%c0_6, %c0_7, %c0_8] : memref<5x32x16xf32, #tpu.memory_space<vmem>>, vector<1x32x16xf32>
    %7 = vector.shape_cast %6 : vector<1x32x16xf32> to vector<32x16xf32>
    %c0_9 = arith.constant 0 : index
    %c0_10 = arith.constant 0 : index
    %8 = vector.load %arg15[%c0_9, %c0_10] : memref<32x16xf32, #tpu.memory_space<vmem>>, vector<16x12xf32>
    %cst_11 = arith.constant dense<0.000000e+00> : vector<32x12xf32>
    %9 = tpu.matmul %7, %8, %cst_11 {dimension_numbers = #tpu.dot_dimension_numbers<[1], [0], [0], [1], [0, 0, 1, 1], [], []>} : vector<32x16xf32>, vector<16x12xf32>, vector<32x12xf32> -> vector<32x12xf32>
    %10 = arith.addf %5, %9 : vector<32x12xf32>
    %c1 = arith.constant 1 : index
    %c0_12 = arith.constant 0 : index
    %c0_13 = arith.constant 0 : index
    %11 = vector.load %arg2[%c1, %c0_12, %c0_13] : memref<5x32x16xf32, #tpu.memory_space<vmem>>, vector<1x32x16xf32>
    %12 = vector.shape_cast %11 : vector<1x32x16xf32> to vector<32x16xf32>
    %c0_14 = arith.constant 0 : index
    %c1_15 = arith.constant 1 : index
    %13 = vector.load %arg15[%c0_14, %c1_15] : memref<32x16xf32, #tpu.memory_space<vmem>>, vector<16x12xf32>
    %cst_16 = arith.constant dense<0.000000e+00> : vector<32x12xf32>
    %14 = tpu.matmul %12, %13, %cst_16 {dimension_numbers = #tpu.dot_dimension_numbers<[1], [0], [0], [1], [0, 0, 1, 1], [], []>} : vector<32x16xf32>, vector<16x12xf32>, vector<32x12xf32> -> vector<32x12xf32>
    %15 = arith.addf %10, %14 : vector<32x12xf32>
    %c2_17 = arith.constant 2 : index
    %c0_18 = arith.constant 0 : index
    %c0_19 = arith.constant 0 : index
    %16 = vector.load %arg2[%c2_17, %c0_18, %c0_19] : memref<5x32x16xf32, #tpu.memory_space<vmem>>, vector<1x32x16xf32>
    %17 = vector.shape_cast %16 : vector<1x32x16xf32> to vector<32x16xf32>
    %c0_20 = arith.constant 0 : index
    %c2_21 = arith.constant 2 : index
    %18 = vector.load %arg15[%c0_20, %c2_21] : memref<32x16xf32, #tpu.memory_space<vmem>>, vector<16x12xf32>
    %cst_22 = arith.constant dense<0.000000e+00> : vector<32x12xf32>
    %19 = tpu.matmul %17, %18, %cst_22 {dimension_numbers = #tpu.dot_dimension_numbers<[1], [0], [0], [1], [0, 0, 1, 1], [], []>} : vector<32x16xf32>, vector<16x12xf32>, vector<32x12xf32> -> vector<32x12xf32>
    %20 = arith.addf %15, %19 : vector<32x12xf32>
    %c3 = arith.constant 3 : index
    %c0_23 = arith.constant 0 : index
    %c0_24 = arith.constant 0 : index
    %21 = vector.load %arg2[%c3, %c0_23, %c0_24] : memref<5x32x16xf32, #tpu.memory_space<vmem>>, vector<1x32x16xf32>
    %22 = vector.shape_cast %21 : vector<1x32x16xf32> to vector<32x16xf32>
    %c0_25 = arith.constant 0 : index
    %c3_26 = arith.constant 3 : index
    %23 = vector.load %arg15[%c0_25, %c3_26] : memref<32x16xf32, #tpu.memory_space<vmem>>, vector<16x12xf32>
    %cst_27 = arith.constant dense<0.000000e+00> : vector<32x12xf32>
    %24 = tpu.matmul %22, %23, %cst_27 {dimension_numbers = #tpu.dot_dimension_numbers<[1], [0], [0], [1], [0, 0, 1, 1], [], []>} : vector<32x16xf32>, vector<16x12xf32>, vector<32x12xf32> -> vector<32x12xf32>
    %25 = arith.addf %20, %24 : vector<32x12xf32>
    %c4 = arith.constant 4 : index
    %c0_28 = arith.constant 0 : index
    %c0_29 = arith.constant 0 : index
    %26 = vector.load %arg2[%c4, %c0_28, %c0_29] : memref<5x32x16xf32, #tpu.memory_space<vmem>>, vector<1x32x16xf32>
    %27 = vector.shape_cast %26 : vector<1x32x16xf32> to vector<32x16xf32>
    %c0_30 = arith.constant 0 : index
    %c4_31 = arith.constant 4 : index
    %28 = vector.load %arg15[%c0_30, %c4_31] : memref<32x16xf32, #tpu.memory_space<vmem>>, vector<16x12xf32>
    %cst_32 = arith.constant dense<0.000000e+00> : vector<32x12xf32>
    %29 = tpu.matmul %27, %28, %cst_32 {dimension_numbers = #tpu.dot_dimension_numbers<[1], [0], [0], [1], [0, 0, 1, 1], [], []>} : vector<32x16xf32>, vector<16x12xf32>, vector<32x12xf32> -> vector<32x12xf32>
    %30 = arith.addf %25, %29 : vector<32x12xf32>
    %c0_33 = arith.constant 0 : index
    %c0_34 = arith.constant 0 : index
    %31 = vector.load %arg3[%c0_33, %c0_34] : memref<32x1xf32, #tpu.memory_space<vmem>>, vector<32x1xf32>
    %32 = vector.broadcast %31 : vector<32x1xf32> to vector<32x12xf32>
    %33 = arith.addf %30, %32 : vector<32x12xf32>
    %c0_35 = arith.constant 0 : index
    %c0_36 = arith.constant 0 : index
    %34 = vector.load %arg4[%c0_35, %c0_36] : memref<32x1xf32, #tpu.memory_space<vmem>>, vector<32x1xf32>
    %35 = vector.broadcast %34 : vector<32x1xf32> to vector<32x12xf32>
    %36 = arith.mulf %33, %35 : vector<32x12xf32>
    %c0_37 = arith.constant 0 : index
    %c0_38 = arith.constant 0 : index
    %37 = vector.load %arg5[%c0_37, %c0_38] : memref<32x1xf32, #tpu.memory_space<vmem>>, vector<32x1xf32>
    %38 = vector.broadcast %37 : vector<32x1xf32> to vector<32x12xf32>
    %39 = arith.addf %36, %38 : vector<32x12xf32>
    %40 = math.tanh %39 : vector<32x12xf32>
    %c0_39 = arith.constant 0 : index
    %c2_40 = arith.constant 2 : index
    %41 = vector.load %arg15[%c0_39, %c2_40] : memref<32x16xf32, #tpu.memory_space<vmem>>, vector<32x12xf32>
    tpu.vector_store %arg15[%c0_39, %c2_40], %40 {strides = array<i32>} : memref<32x16xf32, #tpu.memory_space<vmem>>, vector<32x12xf32>,
    %cst_41 = arith.constant 0.000000e+00 : f32
    %42 = vector.broadcast %cst_41 : f32 to vector<32x12xf32>
    %c0_42 = arith.constant 0 : index
    %c0_43 = arith.constant 0 : index
    %c0_44 = arith.constant 0 : index
    %43 = vector.load %arg6[%c0_42, %c0_43, %c0_44] : memref<5x32x32xf32, #tpu.memory_space<vmem>>, vector<1x32x32xf32>
    %44 = vector.shape_cast %43 : vector<1x32x32xf32> to vector<32x32xf32>
    %c0_45 = arith.constant 0 : index
    %c0_46 = arith.constant 0 : index
    %45 = vector.load %arg15[%c0_45, %c0_46] : memref<32x16xf32, #tpu.memory_space<vmem>>, vector<32x12xf32>
    %cst_47 = arith.constant dense<0.000000e+00> : vector<32x12xf32>
    %46 = tpu.matmul %44, %45, %cst_47 {dimension_numbers = #tpu.dot_dimension_numbers<[1], [0], [0], [1], [0, 0, 1, 1], [], []>} : vector<32x32xf32>, vector<32x12xf32>, vector<32x12xf32> -> vector<32x12xf32>
    %47 = arith.addf %42, %46 : vector<32x12xf32>
    %c1_48 = arith.constant 1 : index
    %c0_49 = arith.constant 0 : index
    %c0_50 = arith.constant 0 : index
    %48 = vector.load %arg6[%c1_48, %c0_49, %c0_50] : memref<5x32x32xf32, #tpu.memory_space<vmem>>, vector<1x32x32xf32>
    %49 = vector.shape_cast %48 : vector<1x32x32xf32> to vector<32x32xf32>
    %c0_51 = arith.constant 0 : index
    %c1_52 = arith.constant 1 : index
    %50 = vector.load %arg15[%c0_51, %c1_52] : memref<32x16xf32, #tpu.memory_space<vmem>>, vector<32x12xf32>
    %cst_53 = arith.constant dense<0.000000e+00> : vector<32x12xf32>
    %51 = tpu.matmul %49, %50, %cst_53 {dimension_numbers = #tpu.dot_dimension_numbers<[1], [0], [0], [1], [0, 0, 1, 1], [], []>} : vector<32x32xf32>, vector<32x12xf32>, vector<32x12xf32> -> vector<32x12xf32>
    %52 = arith.addf %47, %51 : vector<32x12xf32>
    %c2_54 = arith.constant 2 : index
    %c0_55 = arith.constant 0 : index
    %c0_56 = arith.constant 0 : index
    %53 = vector.load %arg6[%c2_54, %c0_55, %c0_56] : memref<5x32x32xf32, #tpu.memory_space<vmem>>, vector<1x32x32xf32>
    %54 = vector.shape_cast %53 : vector<1x32x32xf32> to vector<32x32xf32>
    %c0_57 = arith.constant 0 : index
    %c2_58 = arith.constant 2 : index
    %55 = vector.load %arg15[%c0_57, %c2_58] : memref<32x16xf32, #tpu.memory_space<vmem>>, vector<32x12xf32>
    %cst_59 = arith.constant dense<0.000000e+00> : vector<32x12xf32>
    %56 = tpu.matmul %54, %55, %cst_59 {dimension_numbers = #tpu.dot_dimension_numbers<[1], [0], [0], [1], [0, 0, 1, 1], [], []>} : vector<32x32xf32>, vector<32x12xf32>, vector<32x12xf32> -> vector<32x12xf32>
    %57 = arith.addf %52, %56 : vector<32x12xf32>
    %c3_60 = arith.constant 3 : index
    %c0_61 = arith.constant 0 : index
    %c0_62 = arith.constant 0 : index
    %58 = vector.load %arg6[%c3_60, %c0_61, %c0_62] : memref<5x32x32xf32, #tpu.memory_space<vmem>>, vector<1x32x32xf32>
    %59 = vector.shape_cast %58 : vector<1x32x32xf32> to vector<32x32xf32>
    %c0_63 = arith.constant 0 : index
    %c3_64 = arith.constant 3 : index
    %60 = vector.load %arg15[%c0_63, %c3_64] : memref<32x16xf32, #tpu.memory_space<vmem>>, vector<32x12xf32>
    %cst_65 = arith.constant dense<0.000000e+00> : vector<32x12xf32>
    %61 = tpu.matmul %59, %60, %cst_65 {dimension_numbers = #tpu.dot_dimension_numbers<[1], [0], [0], [1], [0, 0, 1, 1], [], []>} : vector<32x32xf32>, vector<32x12xf32>, vector<32x12xf32> -> vector<32x12xf32>
    %62 = arith.addf %57, %61 : vector<32x12xf32>
    %c4_66 = arith.constant 4 : index
    %c0_67 = arith.constant 0 : index
    %c0_68 = arith.constant 0 : index
    %63 = vector.load %arg6[%c4_66, %c0_67, %c0_68] : memref<5x32x32xf32, #tpu.memory_space<vmem>>, vector<1x32x32xf32>
    %64 = vector.shape_cast %63 : vector<1x32x32xf32> to vector<32x32xf32>
    %c0_69 = arith.constant 0 : index
    %c4_70 = arith.constant 4 : index
    %65 = vector.load %arg15[%c0_69, %c4_70] : memref<32x16xf32, #tpu.memory_space<vmem>>, vector<32x12xf32>
    %cst_71 = arith.constant dense<0.000000e+00> : vector<32x12xf32>
    %66 = tpu.matmul %64, %65, %cst_71 {dimension_numbers = #tpu.dot_dimension_numbers<[1], [0], [0], [1], [0, 0, 1, 1], [], []>} : vector<32x32xf32>, vector<32x12xf32>, vector<32x12xf32> -> vector<32x12xf32>
    %67 = arith.addf %62, %66 : vector<32x12xf32>
    %c0_72 = arith.constant 0 : index
    %c0_73 = arith.constant 0 : index
    %68 = vector.load %arg7[%c0_72, %c0_73] : memref<32x1xf32, #tpu.memory_space<vmem>>, vector<32x1xf32>
    %69 = vector.broadcast %68 : vector<32x1xf32> to vector<32x12xf32>
    %70 = arith.addf %67, %69 : vector<32x12xf32>
    %c0_74 = arith.constant 0 : index
    %c0_75 = arith.constant 0 : index
    %71 = vector.load %arg8[%c0_74, %c0_75] : memref<32x1xf32, #tpu.memory_space<vmem>>, vector<32x1xf32>
    %72 = vector.broadcast %71 : vector<32x1xf32> to vector<32x12xf32>
    %73 = arith.mulf %70, %72 : vector<32x12xf32>
    %c0_76 = arith.constant 0 : index
    %c0_77 = arith.constant 0 : index
    %74 = vector.load %arg9[%c0_76, %c0_77] : memref<32x1xf32, #tpu.memory_space<vmem>>, vector<32x1xf32>
    %75 = vector.broadcast %74 : vector<32x1xf32> to vector<32x12xf32>
    %76 = arith.addf %73, %75 : vector<32x12xf32>
    %77 = math.tanh %76 : vector<32x12xf32>
    %c0_78 = arith.constant 0 : index
    %c2_79 = arith.constant 2 : index
    %78 = vector.load %arg15[%c0_78, %c2_79] : memref<32x16xf32, #tpu.memory_space<vmem>>, vector<32x12xf32>
    tpu.vector_store %arg15[%c0_78, %c2_79], %77 {strides = array<i32>} : memref<32x16xf32, #tpu.memory_space<vmem>>, vector<32x12xf32>,
    %cst_80 = arith.constant 0.000000e+00 : f32
    %79 = vector.broadcast %cst_80 : f32 to vector<16x12xf32>
    %c0_81 = arith.constant 0 : index
    %c0_82 = arith.constant 0 : index
    %c0_83 = arith.constant 0 : index
    %80 = vector.load %arg10[%c0_81, %c0_82, %c0_83] : memref<5x16x32xf32, #tpu.memory_space<vmem>>, vector<1x16x32xf32>
    %81 = vector.shape_cast %80 : vector<1x16x32xf32> to vector<16x32xf32>
    %c0_84 = arith.constant 0 : index
    %c0_85 = arith.constant 0 : index
    %82 = vector.load %arg15[%c0_84, %c0_85] : memref<32x16xf32, #tpu.memory_space<vmem>>, vector<32x12xf32>
    %cst_86 = arith.constant dense<0.000000e+00> : vector<16x12xf32>
    %83 = tpu.matmul %81, %82, %cst_86 {dimension_numbers = #tpu.dot_dimension_numbers<[1], [0], [0], [1], [0, 0, 1, 1], [], []>} : vector<16x32xf32>, vector<32x12xf32>, vector<16x12xf32> -> vector<16x12xf32>
    %84 = arith.addf %79, %83 : vector<16x12xf32>
    %c1_87 = arith.constant 1 : index
    %c0_88 = arith.constant 0 : index
    %c0_89 = arith.constant 0 : index
    %85 = vector.load %arg10[%c1_87, %c0_88, %c0_89] : memref<5x16x32xf32, #tpu.memory_space<vmem>>, vector<1x16x32xf32>
    %86 = vector.shape_cast %85 : vector<1x16x32xf32> to vector<16x32xf32>
    %c0_90 = arith.constant 0 : index
    %c1_91 = arith.constant 1 : index
    %87 = vector.load %arg15[%c0_90, %c1_91] : memref<32x16xf32, #tpu.memory_space<vmem>>, vector<32x12xf32>
    %cst_92 = arith.constant dense<0.000000e+00> : vector<16x12xf32>
    %88 = tpu.matmul %86, %87, %cst_92 {dimension_numbers = #tpu.dot_dimension_numbers<[1], [0], [0], [1], [0, 0, 1, 1], [], []>} : vector<16x32xf32>, vector<32x12xf32>, vector<16x12xf32> -> vector<16x12xf32>
    %89 = arith.addf %84, %88 : vector<16x12xf32>
    %c2_93 = arith.constant 2 : index
    %c0_94 = arith.constant 0 : index
    %c0_95 = arith.constant 0 : index
    %90 = vector.load %arg10[%c2_93, %c0_94, %c0_95] : memref<5x16x32xf32, #tpu.memory_space<vmem>>, vector<1x16x32xf32>
    %91 = vector.shape_cast %90 : vector<1x16x32xf32> to vector<16x32xf32>
    %c0_96 = arith.constant 0 : index
    %c2_97 = arith.constant 2 : index
    %92 = vector.load %arg15[%c0_96, %c2_97] : memref<32x16xf32, #tpu.memory_space<vmem>>, vector<32x12xf32>
    %cst_98 = arith.constant dense<0.000000e+00> : vector<16x12xf32>
    %93 = tpu.matmul %91, %92, %cst_98 {dimension_numbers = #tpu.dot_dimension_numbers<[1], [0], [0], [1], [0, 0, 1, 1], [], []>} : vector<16x32xf32>, vector<32x12xf32>, vector<16x12xf32> -> vector<16x12xf32>
    %94 = arith.addf %89, %93 : vector<16x12xf32>
    %c3_99 = arith.constant 3 : index
    %c0_100 = arith.constant 0 : index
    %c0_101 = arith.constant 0 : index
    %95 = vector.load %arg10[%c3_99, %c0_100, %c0_101] : memref<5x16x32xf32, #tpu.memory_space<vmem>>, vector<1x16x32xf32>
    %96 = vector.shape_cast %95 : vector<1x16x32xf32> to vector<16x32xf32>
    %c0_102 = arith.constant 0 : index
    %c3_103 = arith.constant 3 : index
    %97 = vector.load %arg15[%c0_102, %c3_103] : memref<32x16xf32, #tpu.memory_space<vmem>>, vector<32x12xf32>
    %cst_104 = arith.constant dense<0.000000e+00> : vector<16x12xf32>
    %98 = tpu.matmul %96, %97, %cst_104 {dimension_numbers = #tpu.dot_dimension_numbers<[1], [0], [0], [1], [0, 0, 1, 1], [], []>} : vector<16x32xf32>, vector<32x12xf32>, vector<16x12xf32> -> vector<16x12xf32>
    %99 = arith.addf %94, %98 : vector<16x12xf32>
    %c4_105 = arith.constant 4 : index
    %c0_106 = arith.constant 0 : index
    %c0_107 = arith.constant 0 : index
    %100 = vector.load %arg10[%c4_105, %c0_106, %c0_107] : memref<5x16x32xf32, #tpu.memory_space<vmem>>, vector<1x16x32xf32>
    %101 = vector.shape_cast %100 : vector<1x16x32xf32> to vector<16x32xf32>
    %c0_108 = arith.constant 0 : index
    %c4_109 = arith.constant 4 : index
    %102 = vector.load %arg15[%c0_108, %c4_109] : memref<32x16xf32, #tpu.memory_space<vmem>>, vector<32x12xf32>
    %cst_110 = arith.constant dense<0.000000e+00> : vector<16x12xf32>
    %103 = tpu.matmul %101, %102, %cst_110 {dimension_numbers = #tpu.dot_dimension_numbers<[1], [0], [0], [1], [0, 0, 1, 1], [], []>} : vector<16x32xf32>, vector<32x12xf32>, vector<16x12xf32> -> vector<16x12xf32>
    %104 = arith.addf %99, %103 : vector<16x12xf32>
    %c0_111 = arith.constant 0 : index
    %c0_112 = arith.constant 0 : index
    %105 = vector.load %arg11[%c0_111, %c0_112] : memref<16x1xf32, #tpu.memory_space<vmem>>, vector<16x1xf32>
    %106 = vector.broadcast %105 : vector<16x1xf32> to vector<16x12xf32>
    %107 = arith.addf %104, %106 : vector<16x12xf32>
    %c0_113 = arith.constant 0 : index
    %c0_114 = arith.constant 0 : index
    %108 = vector.load %arg12[%c0_113, %c0_114] : memref<16x1xf32, #tpu.memory_space<vmem>>, vector<16x1xf32>
    %109 = vector.broadcast %108 : vector<16x1xf32> to vector<16x12xf32>
    %110 = arith.mulf %107, %109 : vector<16x12xf32>
    %c0_115 = arith.constant 0 : index
    %c0_116 = arith.constant 0 : index
    %111 = vector.load %arg13[%c0_115, %c0_116] : memref<16x1xf32, #tpu.memory_space<vmem>>, vector<16x1xf32>
    %112 = vector.broadcast %111 : vector<16x1xf32> to vector<16x12xf32>
    %113 = arith.addf %110, %112 : vector<16x12xf32>
    %c0_117 = arith.constant 0 : index
    %c0_118 = arith.constant 0 : index
    %c0_119 = arith.constant 0 : index
    %114 = vector.load %arg14[%c0_117, %c0_118, %c0_119] : memref<1x16x12xf32, #tpu.memory_space<vmem>>, vector<1x16x12xf32>
    %115 = vector.shape_cast %114 : vector<1x16x12xf32> to vector<16x12xf32>
    %116 = vector.shape_cast %113 : vector<16x12xf32> to vector<1x16x12xf32>
    tpu.vector_store %arg14[%c0_117, %c0_118, %c0_119], %116 {strides = array<i32>} : memref<1x16x12xf32, #tpu.memory_space<vmem>>, vector<1x16x12xf32>,
    return
  }
  func.func @transform_0(%arg0: i32) -> (i32, i32, i32) {
    %c0_i32 = arith.constant 0 : i32
    %c0_i32_0 = arith.constant 0 : i32
    %c0_i32_1 = arith.constant 0 : i32
    return %arg0, %c0_i32, %c0_i32_0 : i32, i32, i32
  }
  func.func @transform_1(%arg0: i32) -> (i32, i32, i32) {
    %c0_i32 = arith.constant 0 : i32
    %c0_i32_0 = arith.constant 0 : i32
    %c0_i32_1 = arith.constant 0 : i32
    %c0_i32_2 = arith.constant 0 : i32
    return %c0_i32, %c0_i32_0, %c0_i32_1 : i32, i32, i32
  }
  func.func @transform_2(%arg0: i32) -> (i32, i32) {
    %c0_i32 = arith.constant 0 : i32
    %c0_i32_0 = arith.constant 0 : i32
    %c0_i32_1 = arith.constant 0 : i32
    return %c0_i32, %c0_i32_0 : i32, i32
  }
  func.func @transform_3(%arg0: i32) -> (i32, i32) {
    %c0_i32 = arith.constant 0 : i32
    %c0_i32_0 = arith.constant 0 : i32
    %c0_i32_1 = arith.constant 0 : i32
    return %c0_i32, %c0_i32_0 : i32, i32
  }
  func.func @transform_4(%arg0: i32) -> (i32, i32) {
    %c0_i32 = arith.constant 0 : i32
    %c0_i32_0 = arith.constant 0 : i32
    %c0_i32_1 = arith.constant 0 : i32
    return %c0_i32, %c0_i32_0 : i32, i32
  }
  func.func @transform_5(%arg0: i32) -> (i32, i32, i32) {
    %c0_i32 = arith.constant 0 : i32
    %c0_i32_0 = arith.constant 0 : i32
    %c0_i32_1 = arith.constant 0 : i32
    %c0_i32_2 = arith.constant 0 : i32
    return %c0_i32, %c0_i32_0, %c0_i32_1 : i32, i32, i32
  }
  func.func @transform_6(%arg0: i32) -> (i32, i32) {
    %c0_i32 = arith.constant 0 : i32
    %c0_i32_0 = arith.constant 0 : i32
    %c0_i32_1 = arith.constant 0 : i32
    return %c0_i32, %c0_i32_0 : i32, i32
  }
  func.func @transform_7(%arg0: i32) -> (i32, i32) {
    %c0_i32 = arith.constant 0 : i32
    %c0_i32_0 = arith.constant 0 : i32
    %c0_i32_1 = arith.constant 0 : i32
    return %c0_i32, %c0_i32_0 : i32, i32
  }
  func.func @transform_8(%arg0: i32) -> (i32, i32) {
    %c0_i32 = arith.constant 0 : i32
    %c0_i32_0 = arith.constant 0 : i32
    %c0_i32_1 = arith.constant 0 : i32
    return %c0_i32, %c0_i32_0 : i32, i32
  }
  func.func @transform_9(%arg0: i32) -> (i32, i32, i32) {
    %c0_i32 = arith.constant 0 : i32
    %c0_i32_0 = arith.constant 0 : i32
    %c0_i32_1 = arith.constant 0 : i32
    %c0_i32_2 = arith.constant 0 : i32
    return %c0_i32, %c0_i32_0, %c0_i32_1 : i32, i32, i32
  }
  func.func @transform_10(%arg0: i32) -> (i32, i32) {
    %c0_i32 = arith.constant 0 : i32
    %c0_i32_0 = arith.constant 0 : i32
    %c0_i32_1 = arith.constant 0 : i32
    return %c0_i32, %c0_i32_0 : i32, i32
  }
  func.func @transform_11(%arg0: i32) -> (i32, i32) {
    %c0_i32 = arith.constant 0 : i32
    %c0_i32_0 = arith.constant 0 : i32
    %c0_i32_1 = arith.constant 0 : i32
    return %c0_i32, %c0_i32_0 : i32, i32
  }
  func.func @transform_12(%arg0: i32) -> (i32, i32) {
    %c0_i32 = arith.constant 0 : i32
    %c0_i32_0 = arith.constant 0 : i32
    %c0_i32_1 = arith.constant 0 : i32
    return %c0_i32, %c0_i32_0 : i32, i32
  }
  func.func @transform_13(%arg0: i32) -> (i32, i32, i32) {
    %c0_i32 = arith.constant 0 : i32
    %c0_i32_0 = arith.constant 0 : i32
    %c0_i32_1 = arith.constant 0 : i32
    return %arg0, %c0_i32, %c0_i32_0 : i32, i32, i32
  }
}

</mosaic_0001>

<bundles_post_ra>
// kernel: tacotron2_forward.7
= control target key start
LH: loop header
LB: loop body
LE: loop exit
PB: predicated region body
PF: predicated region fallthrough
CT: control target
= control target key end

     0   :  { %s718_s15 = smov 0   ;;  %s785_s0 = inlined_call_operand.vmem [shape: f32[16,32], index: 0, kind: input, shape index: {}]   ;;  %s786_s1 = inlined_call_operand.vmem [shape: f32[2,32,64], index: 1, kind: input, shape index: {}]   ;;  %s787_s2 = inlined_call_operand.vmem [shape: f32[2,16,64], index: 2, kind: input, shape index: {}]   ;;  %s788_s3 = inlined_call_operand.vmem [shape: f32[2,1,64], index: 3, kind: input, shape index: {}]   ;;  %s789_s4 = inlined_call_operand.vmem [shape: f32[2,8,2,16], index: 4, kind: output, shape index: {}]  }
   0x1 LB: > { %s724_s16 = sadd.s32 4294967295, %s673_s15   ;;  %p553_p0 = scmp.ge.s32.totalorder %s673_s15, 1  ;;  %s673_s15 = sphi %s718_s15, %s14_s15  }
   0x2   : > { %p180_p1 = scmp.lt.s32.totalorder %s673_s15, 3 }
   0x4   : > { %p181_p2 = pnand %p553_p0, %p180_p1 }
   0x5   : > { %p214_p3 = scmp.lt.s32.totalorder (!%p181_p2), %s724_s16, 1  ;;  %v232_v0 = vld [vmem:[%s785_s0] sm:$0xff] (!%p181_p2)  ;;  %vm245_vm0 = vcmask (!%p181_p2), 261120   ;;  %v233_v9 = vld [vmem:[%s785_s0 + $0x8] sm:$0xff] (!%p181_p2)  ;;  %vm327_vm1 = vcmask (!%p181_p2), 523264   ;;  %v756_v15 = vmov (!%p181_p2), 0.0  }
   0x6   : > { %184 = sbr.rel (%p181_p2) target bundleno = 1063 (0x427), region = 36  ;;  %588 = vmatprep.mubr.msk.f32.mxu0 (!%p181_p2), %vm245_vm0, %v232_v0  ;;  %v679_v16 = vmov (!%p181_p2), 0.0   ;;  %s758_s10 = smov (!%p181_p2), 0  }
   0xd   : > { %s215_s19 = scalar_select %p214_p3, %s724_s16, 1 }
   0xf   : > { %s568_s20 = sshll.u32 %s215_s19, 5  ;;  %s569_s21 = sshll.u32 %s215_s19, 4 }
  0x10   : > { %s218_s24 = scalar_lea.vmem %s786_s1, %s568_s20  ;;  %s223_s27 = scalar_lea.vmem %s787_s2, %s569_s21 }
  0x11   : > { %s743_s30 = scalar_lea.vmem %s789_s4, %s569_s21  ;;  %v234_v1 = vld [vmem:[%s218_s24] sm:$0xff]  ;;  %v235_v2 = vld [vmem:[%s218_s24 + $0x8] sm:$0xff]  ;;  %v236_v6 = vld [vmem:[%s218_s24 + $0x10] sm:$0xff]  ;;  %s226_s9 = scalar_lea.vmem %s788_s3, %s215_s19 }
  0x12   : > { %v745_v3 = vld [vmem:[%s223_s27] sm:$0xff]  ;;  %v598_v4 = vpack.c.bf16 %v235_v2, %v234_v1  ;;  %v747_v5 = vld [vmem:[%s223_s27 + $0x8] sm:$0xff]  ;;  %v237_v7 = vld [vmem:[%s218_s24 + $0x18] sm:$0xff] }
  0x13   : > { %v602_v8 = vpack.c.bf16 %v237_v7, %v236_v6  ;;  %v560_v10 = vld [vmem:[%s226_s9] ss:$0 sm:$0xff] }
  0x14   : > { %599 = vmatprep.subr.bf16.mxu0 %v598_v4 }
  0x15   : > { %601 = vmatpush3.bf16.msra.mxu0 %v598_v4 }
  0x16   : > { %603 = vmatprep.subr.bf16.mxu0 %v602_v8 }
  0x19   : > { %605 = vmatpush3.bf16.msra.mxu0 %v602_v8 }
  0x1c   : > { %589 = vmatmul.mubr.msk.f32.vlgmr.msra.gmra.mrb[0].mxu0 %vm245_vm0, %v233_v9 }
  0xef   : > { %v590_v11 = vpop.f32.mrb[0].mxu0 }
  0xf0   : > { %v324_v12 = vadd.f32 %v590_v11, %v560_v10  ;;  %v318_v13 = vpop.f32.mrb[1].mxu0 }
  0xf1   : > { %v319_v14 = vadd.f32 %v560_v10, %v318_v13 }
  0xf2   : > { %329 = vst.msk [vmem:[#allocation2 + $0x8] sm:$0xff] %vm327_vm1, %v324_v12 }
  0xf3   : > { %328 = vst.msk [vmem:[#allocation2] sm:$0xff] %vm327_vm1, %v319_v14 }
  0xf4 LB: >> { %v607_v17 = vpack.c.bf16 %v747_v5, %v745_v3  ;;  %v687_v18 = vmov 0.0|0.0   ;;  %s688_s11 = smov 96   ;;  %vm689_vm2 = vmmov 0   ;;  %v690_v19 = vmov 0.0   ;;  %s340_s12 = ssub.s32 1, %s724_s16  ;;  %s685_s10 = sphi %s758_s10, %s337_s10   ;;  %v681_v16 = vphi %v679_v16, %v448_v16   ;;  %v677_v15 = vphi %v756_v15, %v442_v15  }
  0xf5   : >> { %606 = vmatprep.subr.bf16.mxu0 %v687_v18  ;;  %349 = vrot.lane.b32.xlu0 %v681_v16, %s688_s11  ;;  %vm351_vm3 = vcmask 130048   ;;  %s342_s13 = ssub.s32 7, %s685_s10  ;;  %s341_s14 = smul.u32 %s685_s10, %s340_s12  ;;  %vm454_vm4 = vcmask 123904  }
  0xf6   : >> { %608 = vmatpush3.bf16.msra.mxu0 %v607_v17  ;;  %595 = vmatprep.mubr.msk.f32.mxu0 %vm689_vm2, %v690_v19  ;;  %s343_s17 = smul.u32 %s724_s16, %s342_s13  ;;  %s691_s21 = smov 80  }
  0xf7   : >> { %s692_s22 = smov 16   ;;  %s337_s10 = sadd.s32 1, %s685_s10  }
  0xf8   : >> { %s344_s18 = sadd.s32 %s343_s17, %s341_s14  ;;  %p334_p4 = scmp.ge.s32.totalorder %s337_s10, 8  }
  0xf9   : >> { %s771_s19 = sshll.u32 %s344_s18, 1 }
  0xfa   : >> { %s346_s20 = scalar_lea.vmem [#allocation2], %s771_s19  ;;  %s453_s23 = scalar_lea.vmem %s743_s30, %s771_s19 }
  0xfb   : >> { %v347_v21 = vld [vmem:[%s346_s20] sm:$0x3] }
 0x167   : >> { %v350_v20 = vpop.permute.xlu0 %349 }
 0x168   : >> { %596 = vmatmul.mubr.msk.f32.vlgmr.msra.gmra.mrb[0].mxu0 %vm351_vm3, %v350_v20 }
 0x23b   : >> { %v420_v22 = vpop.f32.mrb[0].mxu0 }
 0x23c   : >> { %v424_v23 = vadd.f32 %v420_v22, %v347_v21  ;;  %v597_v24 = vpop.f32.mrb[1].mxu0 }
 0x23e   : >> { %647 = vtanh.f32 %v424_v23  ;;  %v565_v26 = vmul.f32 -1.442695, %v424_v23 }
 0x240   : >> { %649 = vpow2.f32 %v565_v26 }
 0x248   : >> { %v648_v25 = vpop.eup %647 }
 0x249   : >> { %434 = vrot.lane.b32.xlu0 %v648_v25, %s691_s21 }
 0x24a   : >> { %v650_v27 = vpop.eup %649 }
 0x24b   : >> { %v428_v28 = vadd.f32 1.0, %v650_v27 }
 0x24d   : >> { %651 = vrcp.f32 %v428_v28 }
 0x257   : >> { %v652_v29 = vpop.eup %651 }
 0x258   : >> { %v432_v32 = vmul.f32 %v677_v15, %v652_v29 }
 0x2bb   : >> { %v435_v30 = vpop.permute.xlu0 %434 }
 0x2bc   : >> { %v437_v31 = vmul.f32 %v652_v29, %v435_v30 }
 0x2be   : >> { %439 = vrot.lane.b32.xlu1 %v437_v31, %s692_s22 }
 0x330   : >> { %v440_v33 = vpop.permute.xlu1 %439 }
 0x331   : >> { %v442_v15 = vadd.f32 %v440_v33, %v432_v32  }
 0x333   : >> { %653 = vtanh.f32 %v442_v15 }
 0x33d   : >> { %v654_v34 = vpop.eup %653 }
 0x33e   : >> { %445 = vrot.lane.b32.xlu1 %v654_v34, %s692_s22 }
 0x3b0   : >> { %v446_v35 = vpop.permute.xlu1 %445 }
 0x3b1   : >> { %v448_v16 = vmul.f32 %v652_v29, %v446_v35  }
 0x3b3   : >> { %450 = vrot.lane.b32.xlu0 %v448_v16, %s688_s11 }
 0x420   : > { %336 = sbr.rel (!%p334_p4) target bundleno = 244 (0xf4), region = 81 }
 0x425   : >> { %v451_v36 = vpop.permute.xlu0 %450 }
 0x426   : >> { %455 = vst.msk [vmem:[%s453_s23] sm:$0x3] %vm454_vm4, %v451_v36 }
 0x427 PF: > { %s14_s15 = sadd.s32 1, %s673_s15  }
 0x428   : > { %p11_p5 = scmp.ge.s32.totalorder %s14_s15, 4  }
 0x42a   :  { %13 = sbr.rel (!%p11_p5) target bundleno = 1 (0x1), region = 92 }

// kernel: tacotron2_forward.8
= control target key start
LH: loop header
LB: loop body
LE: loop exit
PB: predicated region body
PF: predicated region fallthrough
CT: control target
= control target key end

     0   :  { %v426_v3 = vmov 0.0|0.0   ;;  %vm427_vm0 = vmmov 0   ;;  %v428_v5 = vmov 0.0   ;;  %vm31_vm1 = vcmask 130048   ;;  %s542_s0 = inlined_call_operand.vmem [shape: f32[2,12,16], index: 0, kind: input, shape index: {}]   ;;  %s543_s1 = inlined_call_operand.vmem [shape: f32[16,32], index: 1, kind: input, shape index: {}]   ;;  %s544_s2 = inlined_call_operand.vmem [shape: f32[1,32], index: 2, kind: input, shape index: {}]   ;;  %s545_s3 = inlined_call_operand.vmem [shape: f32[32,32], index: 3, kind: input, shape index: {}]   ;;  %s546_s4 = inlined_call_operand.vmem [shape: f32[1,32], index: 4, kind: input, shape index: {}]   ;;  %s547_s5 = inlined_call_operand.vmem [shape: f32[8,4], index: 5, kind: input, shape index: {}]   ;;  %s548_s6 = inlined_call_operand.vmem [shape: f32[1,4], index: 6, kind: input, shape index: {}]   ;;  %s549_s7 = inlined_call_operand.vmem [shape: f32[2,32], index: 7, kind: output, shape index: {0}]   ;;  %s550_s8 = inlined_call_operand.hbm [shape: f32[2,4], index: 8, kind: output, shape index: {1}]  }
   0x1   :  { %v58_v0 = vld [vmem:[%s543_s1] sm:$0xff]  ;;  %v59_v1 = vld [vmem:[%s543_s1 + $0x8] sm:$0xff]  ;;  %384 = vmatprep.subr.bf16.mxu0 %v426_v3  ;;  %365 = vmatprep.mubr.msk.f32.mxu0 %vm427_vm0, %v428_v5  ;;  %vm33_vm2 = vcmask 125952   ;;  %v343_v7 = vld [vmem:[%s542_s0 + $0x10] sm:$0xff] }
   0x2   :  { %v29_v2 = vld [vmem:[%s542_s0] sm:$0xff]  ;;  %v385_v4 = vpack.c.bf16 %v59_v1, %v58_v0  ;;  %v30_v6 = vld [vmem:[%s542_s0 + $0x8] sm:$0xf]  ;;  %v344_v10 = vld [vmem:[%s542_s0 + $0x18] sm:$0xf]  ;;  %v46_v11 = vsel %vm31_vm1, %v343_v7, 0.0  ;;  %387 = vmatprep.subr.bf16.mxu1 %v426_v3  ;;  %376 = vmatprep.mubr.msk.f32.mxu1 %vm427_vm0, %v428_v5 }
   0x3   :  { %v32_v8 = vsel %vm31_vm1, %v29_v2, 0.0  ;;  %v34_v9 = vsel %vm33_vm2, %v30_v6, 0.0  ;;  %v141_v12 = vld [vmem:[%s545_s3] sm:$0xff]  ;;  %v47_v14 = vsel %vm33_vm2, %v344_v10, 0.0  ;;  %v142_v15 = vld [vmem:[%s545_s3 + $0x8] sm:$0xff] }
   0x4   :  { %386 = vmatpush3.bf16.msra.mxu0 %v385_v4  ;;  %v35_v13 = vadd.f32 %v34_v9, %v32_v8 }
   0x5   :  { %14 = vsyncpa [#allocation3], 0  ;;  %v48_v16 = vadd.f32 %v47_v14, %v46_v11  ;;  %v388_v17 = vpack.c.bf16 %v142_v15, %v141_v12  ;;  %379 = vmatprep.subr.mxu0 %v428_v5  ;;  %vm56_vm3 = vcmask 1040384   ;;  %v143_v33 = vld [vmem:[%s545_s3 + $0x10] sm:$0xff]  ;;  %v144_v34 = vld [vmem:[%s545_s3 + $0x18] sm:$0xff]  ;;  %vm152_vm4 = vcmask 261120  }
   0x6   :  { %v36_v18 = vrot.slane %v35_v13, 4  ;;  %v391_v35 = vpack.c.bf16 %v144_v34, %v143_v33  ;;  %v345_v36 = vld [vmem:[%s544_s2] ss:$0 sm:$0xff]  ;;  %vm226_vm5 = vcmask 254976   ;;  %s429_s29 = smov 112   ;;  %vm239_vm6 = vcmask 64512  }
   0x7   :  { %v49_v19 = vrot.slane %v48_v16, 4  ;;  %389 = vmatpush3.bf16.msra.mxu1 %v388_v17  ;;  %v228_v41 = vld [vmem:[%s547_s5] sm:$0xff]  ;;  %vm312_vm7 = vcmask 25600  }
   0x8   :  { %v37_v20 = vadd.f32 %v36_v18, %v35_v13  ;;  %390 = vmatprep.subr.bf16.mxu1 %v426_v3  ;;  %v347_v42 = vld [vmem:[%s546_s4] ss:$0 sm:$0xff]  ;;  %s430_s4 = smov [#allocation2]  }
   0x9   :  { %v50_v21 = vadd.f32 %v49_v19, %v48_v16  ;;  %v349_v47 = vld [vmem:[%s548_s6] ss:$0 sm:$0xff] }
   0xa   :  { %v38_v22 = vrot.slane %v37_v20, 2 }
   0xb   :  { %v51_v23 = vrot.slane %v50_v21, 2  ;;  %392 = vmatpush3.bf16.msra.mxu1 %v391_v35 }
   0xc   :  { %v39_v24 = vadd.f32 %v38_v22, %v37_v20 }
   0xd   :  { %v52_v25 = vadd.f32 %v51_v23, %v50_v21 }
   0xe   :  { %v40_v26 = vrot.slane %v39_v24, 1 }
   0xf   :  { %v53_v27 = vrot.slane %v52_v25, 1 }
  0x10   :  { %v41_v28 = vadd.f32 %v40_v26, %v39_v24 }
  0x11   :  { %v54_v29 = vadd.f32 %v53_v27, %v52_v25 }
  0x12   :  { %v42_v30 = vmul.f32 0.083333336, %v41_v28 }
  0x13   :  { %v55_v31 = vmul.f32 0.083333336, %v54_v29 }
  0x15   :  { %v57_v32 = vsel %vm56_vm3, %v42_v30, %v55_v31 }
  0x16   :  { %366 = vmatmul.mubr.msk.f32.vlgmr.msra.gmra.mrb[0].mxu0 %vm31_vm1, %v57_v32 }
  0x17   :  { %381 = vmatprep.mubr.msk.f32.mxu0 %vm427_vm0, %v428_v5  ;;  %380 = vmatpush3.msra.mxu0 %v228_v41 }
  0xe9   :  { %v136_v37 = vpop.f32.mrb[0].mxu0 }
  0xea   :  { %v137_v38 = vadd.f32 %v345_v36, %v136_v37  ;;  %v367_v39 = vpop.f32.mrb[1].mxu0 }
  0xec   :  { %v140_v40 = vmax.f32 %v137_v38, 0.0 }
  0xee   :  { %377 = vmatmul.mubr.msk.f32.vlgmr.msra.gmra.mrb[0].mxu1 %vm152_vm4, %v140_v40 }
 0x1c1   :  { %v222_v43 = vpop.f32.mrb[0].mxu1 }
 0x1c2   :  { %v223_v44 = vadd.f32 %v347_v42, %v222_v43  ;;  %v378_v45 = vpop.f32.mrb[1].mxu1 }
 0x1c4   :  { %227 = vst.msk [vmem:[%s549_s7] sm:$0x3] %vm226_vm5, %v223_v44  ;;  %237 = vrot.lane.b32.xlu0 %v223_v44, %s429_s29  ;;  %s333_s7 = sshll.u32 %s430_s4, 4  ;;  %s334_s7 = int_to_ptr.vmem [resolvable:$true] %s333_s7 }
 0x1c5   :  { %s402_s6 = scalar_lea.vmem %s334_s7, 32  ;;  %p407_p1 = scmp.lt.s32.totalorder %s334_s7, %s334_s7 }
 0x1c6   :  { %p403_p0 = scmp.ne.s32.totalorder %s334_s7, %s402_s6  ;;  %p408_p2 = scmp.lt.s32.totalorder %s402_s6, %s402_s6 }
 0x1c8   :  { %p409_p3 = por %p408_p2, %p407_p1 }
 0x1ca   :  { %p410_p4 = pnand %p409_p3, %p403_p0 }
 0x236   :  { %v238_v46 = vpop.permute.xlu0 %237 }
 0x237   :  { %382 = vmatmul.mubr.msk.f32.vlgmr.msra.gmra.mrb[2].mxu0 %vm239_vm6, %v238_v46 }
 0x30a   :  { %v308_v48 = vpop.f32.mrb[2].mxu0 }
 0x30b   :  { %v309_v49 = vadd.f32 %v349_v47, %v308_v48  ;;  %v383_v50 = vpop.f32.mrb[3].mxu0 }
 0x30d   :  { %v313_v51 = vsel %vm312_vm7, %v309_v49, -inf }
 0x30e   :  { %314 = vmax.xlane.f32.xlu0 %v313_v51 }
 0x39b   :  { %v315_v52 = vpop.xlane.xlu0 %314 }
 0x39c   :  { %v316_v53 = vsub.f32 %v309_v49, %v315_v52 }
 0x39e   :  { %v317_v54 = vmul.f32 1.442695, %v316_v53 }
 0x3a0   :  { %398 = vpow2.f32 %v317_v54 }
 0x3aa   :  { %v399_v55 = vpop.eup %398 }
 0x3ab   :  { %v319_v56 = vsel %vm312_vm7, %v399_v55, 0.0 }
 0x3ac   :  { %320 = vadd.xlane.f32.xlu1 %v319_v56 }
 0x439   :  { %v321_v57 = vpop.xlane.xlu1 %320 }
 0x43a   :  { %400 = vrcp.f32 %v321_v57 }
 0x444   :  { %v401_v58 = vpop.eup %400 }
 0x445   :  { %v323_v59 = vmul.f32 %v401_v58, %v399_v55 }
 0x447   :  { %324 = vst.msk [vmem:[#allocation2] sm:$0x3] %vm312_vm7, %v323_v59 }
 0x448   :  { %413 = shalt.err (!%p410_p4)
}
 0x449   :  { %s414_s11 = scalar_lea.hbm %s550_s8, 32 }
 0x44a   :  { %p415_p5 = scmp.ne.s32.totalorder %s550_s8, %s414_s11  ;;  %p418_p6 = scmp.lt.u32.totalorder %s414_s11, %s550_s8 }
 0x44c   :  { %p420_p7 = pnand %p418_p6, %p415_p5 }
 0x44e   :  { %423 = shalt.err (!%p420_p7)
}
 0x44f   :  { %336 = dma.vmem_to_hbm [thread:$0]  %s334_s7, 32, %s550_s8, [#allocation3]  }
 0x450   :  { %424 = dma.done.wait [#allocation3], 32  }
 0x451   :  { %425 = vsyncadd [#allocation3], 4294967264 }
 0x452   :  { %342 = vsyncpa [#allocation3], 1 }

// kernel: tacotron2_forward.9
= control target key start
LH: loop header
LB: loop body
LE: loop exit
PB: predicated region body
PF: predicated region fallthrough
CT: control target
= control target key end

     0   :  { %v384_v0 = vmov 0.0|0.0   ;;  %vm385_vm0 = vmmov 0   ;;  %v386_v4 = vmov 0.0   ;;  %vm22_vm1 = vcmask 130048   ;;  %s466_s1 = inlined_call_operand.vmem [shape: f32[16,16], index: 1, kind: input, shape index: {}]   ;;  %s467_s2 = inlined_call_operand.vmem [shape: f32[16,16], index: 2, kind: input, shape index: {}]   ;;  %s468_s0 = inlined_call_operand.vmem [shape: f32[24,16], index: 0, kind: input, shape index: {}]   ;;  %s469_s3 = inlined_call_operand.vmem [shape: f32[16,128], index: 3, kind: input, shape index: {}]   ;;  %s470_s4 = inlined_call_operand.vmem [shape: f32[24,128], index: 4, kind: output, shape index: {}]  }
   0x1   :  { %370 = vmatprep.subr.bf16.mxu0 %v384_v0  ;;  %v20_v1 = vld [vmem:[%s466_s1] sm:$0xff]  ;;  %v21_v2 = vld [vmem:[%s466_s1 + $0x8] sm:$0xff]  ;;  %379 = vmatprep.subr.bf16.mxu1 %v384_v0  ;;  %v19_v10 = vld [vmem:[%s468_s0 + $0x10] sm:$0xff] }
   0x2   :  { %v371_v3 = vpack.c.bf16 %v21_v2, %v20_v1  ;;  %335 = vmatprep.mubr.msk.f32.mxu0 %vm385_vm0, %v386_v4  ;;  %338 = vmatprep.mubr.msk.f32.mxu1 %vm385_vm0, %v386_v4  ;;  %v115_v5 = vld [vmem:[%s467_s2] sm:$0xff]  ;;  %v116_v6 = vld [vmem:[%s467_s2 + $0x8] sm:$0xff] }
   0x3   :  { %v17_v7 = vld [vmem:[%s468_s0] sm:$0xff]  ;;  %v18_v8 = vld [vmem:[%s468_s0 + $0x8] sm:$0xff]  ;;  %v374_v9 = vpack.c.bf16 %v116_v6, %v115_v5 }
   0x4   :  { %372 = vmatpush3.bf16.msra.mxu0 %v371_v3  ;;  %380 = vmatpush3.bf16.msra.mxu1 %v371_v3  ;;  %v209_v11 = vld [vmem:[%s469_s3] sm:$0xff]  ;;  %v210_v12 = vld [vmem:[%s469_s3 + $0x8] sm:$0xff] }
   0x5   :  { %373 = vmatprep.subr.bf16.mxu1 %v384_v0  ;;  %376 = vmatprep.subr.bf16.mxu0 %v384_v0  ;;  %v377_v13 = vpack.c.bf16 %v210_v12, %v209_v11 }
   0x7   :  { %336 = vmatmul.mubr.msk.f32.vlgmr.msra.gmra.mrb[0].mxu0 %vm22_vm1, %v17_v7  ;;  %339 = vmatmul.mubr.msk.f32.vlgmr.msra.gmra.mrb[0].mxu1 %vm22_vm1, %v18_v8 }
   0x8   :  { %341 = vmatprep.mubr.msk.f32.mxu1 %vm385_vm0, %v386_v4  ;;  %375 = vmatpush3.bf16.msra.mxu1 %v374_v9 }
   0x9   :  { %361 = vmatprep.mubr.msk.f32.mxu0 %vm385_vm0, %v386_v4  ;;  %378 = vmatpush3.bf16.msra.mxu0 %v377_v13 }
   0xb   :  { %342 = vmatmul.mubr.msk.f32.gmra.mrb[2].mxu1 %vm22_vm1, %v19_v10 }
   0xc   :  { %348 = vmatprep.mubr.msk.f32.mxu1 %vm385_vm0, %v386_v4 }
  0xda   :  { %v98_v14 = vpop.f32.mrb[0].mxu0  ;;  %v103_v15 = vpop.f32.mrb[0].mxu1 }
  0xdb   :  { %v112_v16 = vmax.f32 %v98_v14, 0.0  ;;  %v337_v17 = vpop.f32.mrb[1].mxu0  ;;  %v340_v18 = vpop.f32.mrb[1].mxu1  ;;  %v113_v19 = vmax.f32 %v103_v15, 0.0 }
  0xdd   :  { %349 = vmatmul.mubr.msk.f32.vlgmr.msra.gmra.mrb[4].mxu1 %vm22_vm1, %v112_v16 }
  0xde   :  { %351 = vmatprep.mubr.msk.f32.mxu1 %vm385_vm0, %v386_v4  ;;  %v108_v20 = vpop.f32.mrb[2].mxu1 }
  0xdf   :  { %v343_v21 = vpop.f32.mrb[3].mxu1  ;;  %v114_v22 = vmax.f32 %v108_v20, 0.0 }
  0xe1   :  { %352 = vmatmul.mubr.msk.f32.gmra.mrb[6].mxu1 %vm22_vm1, %v113_v19 }
  0xe2   :  { %354 = vmatprep.mubr.msk.f32.mxu1 %vm385_vm0, %v386_v4 }
  0xe5   :  { %355 = vmatmul.mubr.msk.f32.gmra.mrb[8].mxu1 %vm22_vm1, %v114_v22 }
 0x1b0   :  { %v192_v23 = vpop.f32.mrb[4].mxu1 }
 0x1b1   :  { %v206_v24 = vmax.f32 %v192_v23, 0.0  ;;  %v350_v25 = vpop.f32.mrb[5].mxu1 }
 0x1b3   :  { %362 = vmatmul.mubr.msk.f32.vlgmr.msra.gmra.mrb[2].mxu0 %vm22_vm1, %v206_v24 }
 0x1b4   :  { %v197_v26 = vpop.f32.mrb[6].mxu1  ;;  %364 = vmatprep.mubr.msk.f32.mxu0 %vm385_vm0, %v386_v4 }
 0x1b5   :  { %v207_v27 = vmax.f32 %v197_v26, 0.0  ;;  %v353_v28 = vpop.f32.mrb[7].mxu1 }
 0x1b7   :  { %365 = vmatmul.mubr.msk.f32.gmra.mrb[4].mxu0 %vm22_vm1, %v207_v27 }
 0x1b8   :  { %v202_v29 = vpop.f32.mrb[8].mxu1  ;;  %367 = vmatprep.mubr.msk.f32.mxu0 %vm385_vm0, %v386_v4 }
 0x1b9   :  { %v208_v30 = vmax.f32 %v202_v29, 0.0  ;;  %v356_v31 = vpop.f32.mrb[9].mxu1 }
 0x1bb   :  { %368 = vmatmul.mubr.msk.f32.gmra.mrb[6].mxu0 %vm22_vm1, %v208_v30 }
 0x286   :  { %v286_v32 = vpop.f32.mrb[2].mxu0 }
 0x287   :  { %300 = vst [vmem:[%s470_s4] sm:$0xff] %v286_v32  ;;  %v363_v33 = vpop.f32.mrb[3].mxu0 }
 0x28a   :  { %v291_v34 = vpop.f32.mrb[4].mxu0 }
 0x28b   :  { %301 = vst [vmem:[%s470_s4 + $0x8] sm:$0xff] %v291_v34  ;;  %v366_v35 = vpop.f32.mrb[5].mxu0 }
 0x28e   :  { %v296_v36 = vpop.f32.mrb[6].mxu0 }
 0x28f   :  { %302 = vst [vmem:[%s470_s4 + $0x10] sm:$0xff] %v296_v36  ;;  %v369_v37 = vpop.f32.mrb[7].mxu0 }

// kernel: tacotron2_forward.6
= control target key start
LH: loop header
LB: loop body
LE: loop exit
PB: predicated region body
PF: predicated region fallthrough
CT: control target
= control target key end

     0   :  { %s3196_s18 = smov 0   ;;  %s3640_s0 = inlined_call_operand.vmem [shape: f32[2,32,8], index: 0, kind: input, shape index: {}]   ;;  %s3641_s1 = inlined_call_operand.vmem [shape: f32[3,5,32,32], index: 1, kind: input, shape index: {}]   ;;  %s3642_s2 = inlined_call_operand.vmem [shape: f32[3,32,1], index: 2, kind: input, shape index: {}]   ;;  %s3643_s3 = inlined_call_operand.vmem [shape: f32[3,32,1], index: 3, kind: input, shape index: {}]   ;;  %s3644_s4 = inlined_call_operand.vmem [shape: f32[3,32,1], index: 4, kind: input, shape index: {}]   ;;  %s3645_s5 = inlined_call_operand.vmem [shape: f32[2,32,8], index: 5, kind: output, shape index: {}]  }
   0x1 LB: > { %s2359_s19 = sadd.s32 4294967295, %s3157_s18   ;;  %p2363_p0 = scmp.ge.s32.totalorder %s3157_s18, 1  ;;  %s3157_s18 = sphi %s3196_s18, %s15_s18  }
   0x2   : > { %p187_p1 = scmp.lt.s32.totalorder %s3157_s18, 3 }
   0x4   : > { %p188_p2 = pnand %p2363_p0, %p187_p1 }
   0x5   : > { %p215_p3 = scmp.lt.s32.totalorder (!%p188_p2), %s2359_s19, 1  ;;  %vm225_vm0 = vcmask (!%p188_p2), 97280   ;;  %v3159_v0 = vmov (!%p188_p2), 0.0   ;;  %s3160_s24 = smov (!%p188_p2), 2   ;;  %vm250_vm1 = vcmask (!%p188_p2), 80912   ;;  %vm284_vm2 = vcmask (!%p188_p2), 261120  }
   0x6   : > { %191 = sbr.rel (%p188_p2) target bundleno = 1523 (0x5f3), region = 40  ;;  %228 = vst.msk [vmem:[#allocation2 + $0x10] sm:$0xff] (!%p188_p2), %vm225_vm0, %v3159_v0  ;;  %226 = vst.msk [vmem:[#allocation2] sm:$0xff] (!%p188_p2), %vm225_vm0, %v3159_v0  ;;  %v2380_v13 = vld [vmem:[%s3641_s1 + $0x40] sm:$0xff] (!%p188_p2)  ;;  %s3161_s27 = smov (!%p188_p2), 126   ;;  %v834_v17 = vld [vmem:[%s3642_s2 + $0x8] sm:$0xff] (!%p188_p2) }
   0x7   : > { %227 = vst.msk [vmem:[#allocation2 + $0x8] sm:$0xff] (!%p188_p2), %vm225_vm0, %v3159_v0  ;;  %229 = vst.msk [vmem:[#allocation2 + $0x18] sm:$0xff] (!%p188_p2), %vm225_vm0, %v3159_v0  ;;  %2668 = vmatprep.mubr.msk.f32.mxu0 (!%p188_p2), %vm284_vm2, %v2380_v13  ;;  %v2368_v16 = vld [vmem:[%s3641_s1 + $0x20] sm:$0xff] (!%p188_p2)  ;;  %s3162_s30 = smov (!%p188_p2), 125   ;;  %s3163_s6 = smov (!%p188_p2), 127   ;;  %v3165_v19 = vmov (!%p188_p2), 0  }
   0x8   : > { %2640 = vmatprep.mubr.msk.f32.mxu1 (!%p188_p2), %vm284_vm2, %v2368_v16  ;;  %s3164_s7 = smov (!%p188_p2), 124   ;;  %v833_v18 = vld [vmem:[%s3642_s2] sm:$0xff] (!%p188_p2)  ;;  %3070 = vset.pattern.permute.xlu1 (!%p188_p2), %v3165_v19  ;;  %v862_v21 = vld [vmem:[%s3643_s3 + $0x8] sm:$0xff] (!%p188_p2)  ;;  %v835_v22 = vld [vmem:[%s3642_s2 + $0x10] sm:$0xff] (!%p188_p2)  ;;  %vm2299_vm3 = vcmask (!%p188_p2), 64512  }
   0x9   : > { %3069 = vset.pattern.permute.xlu0 (!%p188_p2), %v3165_v19  ;;  %v861_v20 = vld [vmem:[%s3643_s3] sm:$0xff] (!%p188_p2)  ;;  %v836_v23 = vld [vmem:[%s3642_s2 + $0x18] sm:$0xff] (!%p188_p2)  ;;  %v890_v25 = vld [vmem:[%s3644_s4 + $0x8] sm:$0xff] (!%p188_p2) }
   0xa   : > { %v889_v24 = vld [vmem:[%s3644_s4] sm:$0xff] (!%p188_p2)  ;;  %v863_v26 = vld [vmem:[%s3643_s3 + $0x10] sm:$0xff] (!%p188_p2)  ;;  %v864_v27 = vld [vmem:[%s3643_s3 + $0x18] sm:$0xff] (!%p188_p2) }
   0xb   : > { %v891_v28 = vld [vmem:[%s3644_s4 + $0x10] sm:$0xff] (!%p188_p2)  ;;  %v892_v29 = vld [vmem:[%s3644_s4 + $0x18] sm:$0xff] (!%p188_p2)  ;;  %v2381_v52 = vld [vmem:[%s3641_s1 + $0x48] sm:$0xff] (!%p188_p2) }
   0xc   : > { %v2382_v59 = vld [vmem:[%s3641_s1 + $0x50] sm:$0xff] (!%p188_p2)  ;;  %v2369_v61 = vld [vmem:[%s3641_s1 + $0x28] sm:$0xff] (!%p188_p2)  ;;  %v2383_v62 = vld [vmem:[%s3641_s1 + $0x58] sm:$0xff] (!%p188_p2) }
   0xd   : > { %s3647_s19 = smov (!%p215_p3, %s2359_s19), 1  ;;  %v2396_v13 = vld [vmem:[%s3641_s1 + $0x80] sm:$0xff]  ;;  %v2398_v16 = vld [vmem:[%s3641_s1 + $0x90] sm:$0xff] }
   0xe   : > { %s2510_s20 = sshll.u32 %s3647_s19, 5 }
   0xf   : > { %s219_s23 = scalar_lea.vmem %s3640_s0, %s2510_s20  ;;  %s224_s13 = scalar_lea.vmem %s3645_s5, %s2510_s20 }
  0x10   : > { %v232_v1 = vld [vmem:[%s219_s23 + $0x10] sm:$0xff]  ;;  %v230_v2 = vld [vmem:[%s219_s23] sm:$0xff]  ;;  %v233_v3 = vld [vmem:[%s219_s23 + $0x18] sm:$0xff] }
  0x11   : > { %242 = vrot.lane.b32.xlu1 %v232_v1, %s3160_s24  ;;  %238 = vrot.lane.b32.xlu0 %v230_v2, %s3160_s24  ;;  %v231_v4 = vld [vmem:[%s219_s23 + $0x8] sm:$0xff] }
  0x15   : > { %244 = vrot.lane.b32.xlu1 %v233_v3, %s3160_s24  ;;  %240 = vrot.lane.b32.xlu0 %v231_v4, %s3160_s24  ;;  %v2370_v3 = vld [vmem:[%s3641_s1 + $0x30] sm:$0xff]  ;;  %v2388_v4 = vld [vmem:[%s3641_s1 + $0x60] sm:$0xff] }
  0x83   : > { %v243_v5 = vpop.permute.xlu1 %242  ;;  %v239_v6 = vpop.permute.xlu0 %238 }
  0x84   : > { %253 = vst.msk [vmem:[#allocation2 + $0x10] sm:$0xff] %vm250_vm1, %v243_v5  ;;  %251 = vst.msk [vmem:[#allocation2] sm:$0xff] %vm250_vm1, %v239_v6  ;;  %v2371_v5 = vld [vmem:[%s3641_s1 + $0x38] sm:$0xff]  ;;  %v2389_v6 = vld [vmem:[%s3641_s1 + $0x68] sm:$0xff] }
  0x87   : > { %v245_v7 = vpop.permute.xlu1 %244  ;;  %v241_v8 = vpop.permute.xlu0 %240 }
  0x88   : > { %254 = vst.msk [vmem:[#allocation2 + $0x18] sm:$0xff] %vm250_vm1, %v245_v7  ;;  %252 = vst.msk [vmem:[#allocation2 + $0x8] sm:$0xff] %vm250_vm1, %v241_v8  ;;  %v255_v7 = vld [vmem:[%s3641_s1] sm:$0xff] }
  0x8b   : > { %v3220_v9 = vld [vmem:[#allocation2 + $0x10] sm:$0xff]  ;;  %v3222_v10 = vld [vmem:[#allocation2] sm:$0xff] }
  0x8f   : > { %v3224_v11 = vld [vmem:[#allocation2 + $0x18] sm:$0xff]  ;;  %v3226_v12 = vld [vmem:[#allocation2 + $0x8] sm:$0xff] }
  0x90   : > { %v3034_v14 = vpack.i.bf16 %v3224_v11, %v3220_v9  ;;  %v3029_v15 = vpack.i.bf16 %v3226_v12, %v3222_v10  ;;  %v2850_v58 = vpack.c.bf16 %v3226_v12, %v3222_v10  ;;  %v2854_v2 = vpack.c.bf16 %v3224_v11, %v3220_v9  ;;  %v2390_v9 = vld [vmem:[%s3641_s1 + $0x70] sm:$0xff]  ;;  %v256_v10 = vld [vmem:[%s3641_s1 + $0x8] sm:$0xff]  ;;  %v2391_v11 = vld [vmem:[%s3641_s1 + $0x78] sm:$0xff] }
  0x91   : > { %v257_v12 = vld [vmem:[%s3641_s1 + $0x10] sm:$0xff] }
  0x92   : > { %3035 = vrot.lane.b32.xlu1 %v3034_v14, %s3161_s27  ;;  %3030 = vrot.lane.b32.xlu0 %v3029_v15, %s3161_s27 }
  0x96   : > { %3045 = vrot.lane.b32.xlu1 %v3029_v15, %s3162_s30  ;;  %3040 = vrot.lane.b32.xlu0 %v3029_v15, %s3163_s6 }
  0x9a   : > { %3055 = vrot.lane.b32.xlu1 %v3034_v14, %s3162_s30  ;;  %3050 = vrot.lane.b32.xlu0 %v3034_v14, %s3163_s6 }
  0x9e   : > { %3065 = vrot.lane.b32.xlu1 %v3034_v14, %s3164_s7  ;;  %3060 = vrot.lane.b32.xlu0 %v3029_v15, %s3164_s7  ;;  %v258_v14 = vld [vmem:[%s3641_s1 + $0x18] sm:$0xff]  ;;  %v2397_v15 = vld [vmem:[%s3641_s1 + $0x88] sm:$0xff] }
  0xa2   : > { %844 = vperm.xlu1 %3070, %v834_v17   ;;  %839 = vperm.xlu0 %3069, %v833_v18   ;;  %v2399_v17 = vld [vmem:[%s3641_s1 + $0x98] sm:$0xff] }
  0xa6   : > { %867 = vperm.xlu1 %3070, %v861_v20   ;;  %872 = vperm.xlu0 %3069, %v862_v21  }
  0xaa   : > { %849 = vperm.xlu1 %3070, %v835_v22   ;;  %854 = vperm.xlu0 %3069, %v836_v23  }
  0xae   : > { %895 = vperm.xlu1 %3070, %v889_v24   ;;  %900 = vperm.xlu0 %3069, %v890_v25  }
  0xb2   : > { %877 = vperm.xlu1 %3070, %v863_v26   ;;  %882 = vperm.xlu0 %3069, %v864_v27  }
  0xb6   : > { %905 = vperm.xlu1 %3070, %v891_v28   ;;  %910 = vperm.xlu0 %3069, %v892_v29  }
 0x104   : > { %v3036_v30 = vpop.permute.xlu1 %3035  ;;  %v3031_v31 = vpop.permute.xlu0 %3030 }
 0x105   : > { %v3038_v32 = vunpack.i.h.bf16 %v3036_v30  ;;  %v3037_v33 = vunpack.i.l.bf16 %v3036_v30  ;;  %v3033_v34 = vunpack.i.h.bf16 %v3031_v31  ;;  %v3032_v35 = vunpack.i.l.bf16 %v3031_v31 }
 0x107   : > { %v2858_v36 = vpack.c.bf16 %v3033_v34, %v3032_v35  ;;  %v2862_v37 = vpack.c.bf16 %v3038_v32, %v3037_v33 }
 0x108   : > { %v3046_v38 = vpop.permute.xlu1 %3045  ;;  %v3041_v39 = vpop.permute.xlu0 %3040 }
 0x109   : > { %v3048_v40 = vunpack.i.h.bf16 %v3046_v38  ;;  %v3047_v41 = vunpack.i.l.bf16 %v3046_v38  ;;  %v3043_v42 = vunpack.i.h.bf16 %v3041_v39  ;;  %v3042_v43 = vunpack.i.l.bf16 %v3041_v39  ;;  %2859 = vmatprep.subr.bf16.mxu0 %v2858_v36 }
 0x10a   : > { %2861 = vmatpush3.bf16.msra.mxu0 %v2858_v36 }
 0x10b   : > { %2863 = vmatprep.subr.bf16.mxu0 %v2862_v37  ;;  %v2842_v44 = vpack.c.bf16 %v3043_v42, %v3042_v43  ;;  %v2866_v45 = vpack.c.bf16 %v3048_v40, %v3047_v41 }
 0x10c   : > { %v3056_v46 = vpop.permute.xlu1 %3055  ;;  %v3051_v47 = vpop.permute.xlu0 %3050 }
 0x10d   : > { %v3058_v48 = vunpack.i.h.bf16 %v3056_v46  ;;  %v3057_v49 = vunpack.i.l.bf16 %v3056_v46  ;;  %v3053_v50 = vunpack.i.h.bf16 %v3051_v47  ;;  %v3052_v51 = vunpack.i.l.bf16 %v3051_v47  ;;  %2843 = vmatprep.subr.bf16.mxu1 %v2842_v44 }
 0x10e   : > { %2845 = vmatpush3.bf16.msra.mxu1 %v2842_v44  ;;  %2865 = vmatpush3.bf16.msra.mxu0 %v2862_v37 }
 0x10f   : > { %v2846_v53 = vpack.c.bf16 %v3053_v50, %v3052_v51  ;;  %2867 = vmatprep.subr.bf16.mxu0 %v2866_v45  ;;  %v2870_v55 = vpack.c.bf16 %v3058_v48, %v3057_v49 }
 0x110   : > { %v3061_v54 = vpop.permute.xlu0 %3060  ;;  %v3066_v60 = vpop.permute.xlu1 %3065 }
 0x111   : > { %v3063_v56 = vunpack.i.h.bf16 %v3061_v54  ;;  %v3062_v57 = vunpack.i.l.bf16 %v3061_v54  ;;  %2847 = vmatprep.subr.bf16.mxu1 %v2846_v53  ;;  %2669 = vmatmul.mubr.msk.f32.vlgmr.msra.gmra.mrb[0].mxu0 %vm284_vm2, %v2381_v52  ;;  %v3068_v63 = vunpack.i.h.bf16 %v3066_v60  ;;  %v3067_v0 = vunpack.i.l.bf16 %v3066_v60 }
 0x112   : > { %2849 = vmatpush3.bf16.msra.mxu1 %v2846_v53  ;;  %2869 = vmatpush3.bf16.msra.mxu0 %v2866_v45 }
 0x113   : > { %2851 = vmatprep.subr.bf16.mxu1 %v2850_v58  ;;  %2871 = vmatprep.subr.bf16.mxu0 %v2870_v55  ;;  %v2874_v1 = vpack.c.bf16 %v3063_v56, %v3062_v57  ;;  %v2878_v8 = vpack.c.bf16 %v3068_v63, %v3067_v0  ;;  %v2408_v0 = vld [vmem:[%s3641_s1 + $0xc0] sm:$0xff] }
 0x114   : > { %2671 = vmatprep.mubr.msk.f32.mxu0 %vm284_vm2, %v2382_v59 }
 0x115   : > { %2641 = vmatmul.mubr.msk.f32.vlgmr.msra.gmra.mrb[0].mxu1 %vm284_vm2, %v2369_v61  ;;  %2672 = vmatmul.mubr.msk.f32.gmra.mrb[2].mxu0 %vm284_vm2, %v2383_v62 }
 0x116   : > { %2853 = vmatpush3.bf16.msra.mxu1 %v2850_v58  ;;  %2873 = vmatpush3.bf16.msra.mxu0 %v2870_v55 }
 0x117   : > { %2855 = vmatprep.subr.bf16.mxu1 %v2854_v2  ;;  %2875 = vmatprep.subr.bf16.mxu0 %v2874_v1 }
 0x118   : > { %2643 = vmatprep.mubr.msk.f32.mxu1 %vm284_vm2, %v2370_v3  ;;  %2682 = vmatprep.mubr.msk.f32.mxu0 %vm284_vm2, %v2388_v4 }
 0x119   : > { %2644 = vmatmul.mubr.msk.f32.gmra.mrb[2].mxu1 %vm284_vm2, %v2371_v5  ;;  %2683 = vmatmul.mubr.msk.f32.vlgmr.msra.gmra.mrb[0].mxu0 %vm284_vm2, %v2389_v6  ;;  %v2444_v5 = vld [vmem:[%s3642_s2 + $0x20] sm:$0xff] }
 0x11a   : > { %2857 = vmatpush3.bf16.msra.mxu1 %v2854_v2  ;;  %2877 = vmatpush3.bf16.msra.mxu0 %v2874_v1  ;;  %v2448_v6 = vld [vmem:[%s3643_s3 + $0x20] sm:$0xff] }
 0x11b   : > { %2879 = vmatprep.subr.bf16.mxu0 %v2878_v8  ;;  %2654 = vmatprep.mubr.msk.f32.mxu1 %vm284_vm2, %v255_v7  ;;  %v2445_v7 = vld [vmem:[%s3642_s2 + $0x28] sm:$0xff] }
 0x11c   : > { %2685 = vmatprep.mubr.msk.f32.mxu0 %vm284_vm2, %v2390_v9  ;;  %v2449_v9 = vld [vmem:[%s3643_s3 + $0x28] sm:$0xff] }
 0x11d   : > { %2655 = vmatmul.mubr.msk.f32.vlgmr.msra.gmra.mrb[0].mxu1 %vm284_vm2, %v256_v10  ;;  %2686 = vmatmul.mubr.msk.f32.gmra.mrb[2].mxu0 %vm284_vm2, %v2391_v11  ;;  %v2452_v10 = vld [vmem:[%s3644_s4 + $0x20] sm:$0xff]  ;;  %v2447_v11 = vld [vmem:[%s3642_s2 + $0x38] sm:$0xff] }
 0x11e   : > { %2881 = vmatpush3.bf16.msra.mxu0 %v2878_v8  ;;  %2657 = vmatprep.mubr.msk.f32.mxu1 %vm284_vm2, %v257_v12  ;;  %v2446_v8 = vld [vmem:[%s3642_s2 + $0x30] sm:$0xff] }
 0x11f   : > { %2696 = vmatprep.mubr.msk.f32.mxu0 %vm284_vm2, %v2396_v13  ;;  %v2450_v12 = vld [vmem:[%s3643_s3 + $0x30] sm:$0xff]  ;;  %v2453_v13 = vld [vmem:[%s3644_s4 + $0x28] sm:$0xff] }
 0x121   : > { %2658 = vmatmul.mubr.msk.f32.gmra.mrb[2].mxu1 %vm284_vm2, %v258_v14  ;;  %2697 = vmatmul.mubr.msk.f32.vlgmr.msra.gmra.mrb[0].mxu0 %vm284_vm2, %v2397_v15  ;;  %v840_v18 = vpop.permute.xlu0 %839  ;;  %v845_v19 = vpop.permute.xlu1 %844  ;;  %v2454_v14 = vld [vmem:[%s3644_s4 + $0x30] sm:$0xff]  ;;  %v2451_v15 = vld [vmem:[%s3643_s3 + $0x38] sm:$0xff] }
 0x122   : > { %2699 = vmatprep.mubr.msk.f32.mxu0 %vm284_vm2, %v2398_v16  ;;  %2710 = vmatprep.mubr.msk.f32.mxu1 %vm284_vm2, %v2408_v0  ;;  %v2455_v16 = vld [vmem:[%s3644_s4 + $0x38] sm:$0xff] }
 0x125   : > { %2700 = vmatmul.mubr.msk.f32.gmra.mrb[2].mxu0 %vm284_vm2, %v2399_v17  ;;  %v873_v20 = vpop.permute.xlu0 %872  ;;  %v868_v21 = vpop.permute.xlu1 %867 }
 0x129   : > { %v855_v22 = vpop.permute.xlu0 %854  ;;  %v850_v23 = vpop.permute.xlu1 %849 }
 0x12d   : > { %v901_v26 = vpop.permute.xlu0 %900  ;;  %v896_v27 = vpop.permute.xlu1 %895 }
 0x131   : > { %v883_v35 = vpop.permute.xlu0 %882  ;;  %v878_v38 = vpop.permute.xlu1 %877 }
 0x135   : > { %v911_v50 = vpop.permute.xlu0 %910  ;;  %v906_v53 = vpop.permute.xlu1 %905 }
 0x1f0   : > { %v2656_v24 = vpop.f32.mrb[0].mxu1 }
 0x1f1   : > { %v460_v25 = vpop.f32.mrb[1].mxu1 }
 0x1f4   : > { %v2659_v28 = vpop.f32.mrb[2].mxu1  ;;  %v2698_v29 = vpop.f32.mrb[0].mxu0 }
 0x1f5   : > { %v2966_v30 = vadd.f32 %v2698_v29, %v2656_v24  ;;  %v470_v31 = vpop.f32.mrb[3].mxu1  ;;  %v810_v32 = vpop.f32.mrb[1].mxu0 }
 0x1f6   : > { %v2967_v33 = vadd.f32 %v810_v32, %v460_v25 }
 0x1f7   : > { %v858_v34 = vadd.f32 %v2966_v30, %v845_v19 }
 0x1f8   : > { %v857_v36 = vadd.f32 %v2967_v33, %v840_v18  ;;  %v2701_v37 = vpop.f32.mrb[2].mxu0  ;;  %v2411_v33 = vld [vmem:[%s3641_s1 + $0xd8] sm:$0xff] }
 0x1f9   : > { %v886_v39 = vmul.f32 %v873_v20, %v858_v34  ;;  %v2968_v40 = vadd.f32 %v2701_v37, %v2659_v28  ;;  %v820_v41 = vpop.f32.mrb[3].mxu0  ;;  %v2410_v28 = vld [vmem:[%s3641_s1 + $0xd0] sm:$0xff]  ;;  %v2404_v34 = vld [vmem:[%s3641_s1 + $0xa0] sm:$0xff] }
 0x1fa   : > { %v885_v42 = vmul.f32 %v868_v21, %v857_v36  ;;  %v2969_v43 = vadd.f32 %v820_v41, %v470_v31 }
 0x1fb   : > { %v860_v44 = vadd.f32 %v2968_v40, %v855_v22  ;;  %v914_v45 = vadd.f32 %v901_v26, %v886_v39  ;;  %v2405_v39 = vld [vmem:[%s3641_s1 + $0xa8] sm:$0xff]  ;;  %v2406_v40 = vld [vmem:[%s3641_s1 + $0xb0] sm:$0xff] }
 0x1fc   : > { %v859_v46 = vadd.f32 %v2969_v43, %v850_v23  ;;  %v913_v47 = vadd.f32 %v896_v27, %v885_v42  ;;  %v2409_v27 = vld [vmem:[%s3641_s1 + $0xc8] sm:$0xff] }
 0x1fd   : > { %v888_v48 = vmul.f32 %v883_v35, %v860_v44  ;;  %v918_v49 = vmax.f32 %v914_v45, 0.0  ;;  %v2407_v45 = vld [vmem:[%s3641_s1 + $0xb8] sm:$0xff] }
 0x1fe   : > { %v887_v51 = vmul.f32 %v878_v38, %v859_v46  ;;  %v917_v52 = vmax.f32 %v913_v47, 0.0  ;;  %v2420_v46 = vld [vmem:[%s3641_s1 + $0xe0] sm:$0xff] }
 0x1ff   : > { %927 = vrot.lane.b32.xlu0 %v918_v49, %s3160_s24  ;;  %v916_v54 = vadd.f32 %v911_v50, %v888_v48 }
 0x200   : > { %925 = vrot.lane.b32.xlu1 %v917_v52, %s3160_s24  ;;  %v915_v55 = vadd.f32 %v906_v53, %v887_v51  ;;  %v2421_v51 = vld [vmem:[%s3641_s1 + $0xe8] sm:$0xff]  ;;  %v2422_v52 = vld [vmem:[%s3641_s1 + $0xf0] sm:$0xff] }
 0x201   : > { %v920_v56 = vmax.f32 %v916_v54, 0.0 }
 0x202   : > { %v919_v57 = vmax.f32 %v915_v55, 0.0 }
 0x203   : > { %931 = vrot.lane.b32.xlu0 %v920_v56, %s3160_s24 }
 0x204   : > { %929 = vrot.lane.b32.xlu1 %v919_v57, %s3160_s24  ;;  %v2423_v57 = vld [vmem:[%s3641_s1 + $0xf8] sm:$0xff] }
 0x271   : > { %v928_v58 = vpop.permute.xlu0 %927 }
 0x272   : > { %938 = vst.msk [vmem:[#allocation2 + $0x8] sm:$0xff] %vm250_vm1, %v928_v58  ;;  %v926_v59 = vpop.permute.xlu1 %925  ;;  %v2428_v58 = vld [vmem:[%s3641_s1 + $0x100] sm:$0xff] }
 0x273   : > { %937 = vst.msk [vmem:[#allocation2] sm:$0xff] %vm250_vm1, %v926_v59 }
 0x275   : > { %v932_v60 = vpop.permute.xlu0 %931 }
 0x276   : > { %940 = vst.msk [vmem:[#allocation2 + $0x18] sm:$0xff] %vm250_vm1, %v932_v60  ;;  %v930_v61 = vpop.permute.xlu1 %929 }
 0x277   : > { %939 = vst.msk [vmem:[#allocation2 + $0x10] sm:$0xff] %vm250_vm1, %v930_v61 }
 0x279   : > { %v947_v62 = vld [vmem:[#allocation2 + $0x8] sm:$0xff] }
 0x27a   : > { %v946_v63 = vld [vmem:[#allocation2] sm:$0xff] }
 0x27b   : > { %v3071_v1 = vpack.i.bf16 %v947_v62, %v946_v63  ;;  %v2890_v25 = vpack.c.bf16 %v947_v62, %v946_v63  ;;  %v2429_v62 = vld [vmem:[%s3641_s1 + $0x108] sm:$0xff]  ;;  %v2430_v63 = vld [vmem:[%s3641_s1 + $0x110] sm:$0xff] }
 0x27d   : > { %3072 = vrot.lane.b32.xlu1 %v3071_v1, %s3163_s6  ;;  %v949_v2 = vld [vmem:[#allocation2 + $0x18] sm:$0xff] }
 0x27e   : > { %v948_v3 = vld [vmem:[#allocation2 + $0x10] sm:$0xff] }
 0x27f   : > { %v3076_v4 = vpack.i.bf16 %v949_v2, %v948_v3  ;;  %v2894_v31 = vpack.c.bf16 %v949_v2, %v948_v3  ;;  %v2436_v2 = vld [vmem:[%s3641_s1 + $0x120] sm:$0xff]  ;;  %v2437_v3 = vld [vmem:[%s3641_s1 + $0x128] sm:$0xff] }
 0x281   : > { %3082 = vrot.lane.b32.xlu1 %v3071_v1, %s3161_s27  ;;  %3077 = vrot.lane.b32.xlu0 %v3076_v4, %s3163_s6 }
 0x285   : > { %3092 = vrot.lane.b32.xlu1 %v3071_v1, %s3162_s30  ;;  %3087 = vrot.lane.b32.xlu0 %v3076_v4, %s3161_s27 }
 0x289   : > { %3102 = vrot.lane.b32.xlu1 %v3071_v1, %s3164_s7  ;;  %3097 = vrot.lane.b32.xlu0 %v3076_v4, %s3162_s30  ;;  %v2431_v1 = vld [vmem:[%s3641_s1 + $0x118] sm:$0xff] }
 0x28d   : > { %1526 = vperm.xlu1 %3070, %v2444_v5   ;;  %3107 = vrot.lane.b32.xlu0 %v3076_v4, %s3164_s7  ;;  %v2438_v4 = vld [vmem:[%s3641_s1 + $0x130] sm:$0xff]  ;;  %v2439_v5 = vld [vmem:[%s3641_s1 + $0x138] sm:$0xff] }
 0x291   : > { %1555 = vperm.xlu1 %3070, %v2448_v6   ;;  %1531 = vperm.xlu0 %3069, %v2445_v7  }
 0x295   : > { %1536 = vperm.xlu1 %3070, %v2446_v8   ;;  %1560 = vperm.xlu0 %3069, %v2449_v9  }
 0x299   : > { %1584 = vperm.xlu1 %3070, %v2452_v10   ;;  %1541 = vperm.xlu0 %3069, %v2447_v11  }
 0x29d   : > { %1565 = vperm.xlu1 %3070, %v2450_v12   ;;  %1589 = vperm.xlu0 %3069, %v2453_v13  }
 0x2a1   : > { %1594 = vperm.xlu1 %3070, %v2454_v14   ;;  %1570 = vperm.xlu0 %3069, %v2451_v15  }
 0x2a5   : > { %1599 = vperm.xlu0 %3069, %v2455_v16  }
 0x2ef   : > { %v3073_v17 = vpop.permute.xlu1 %3072 }
 0x2f0   : > { %v3075_v18 = vunpack.i.h.bf16 %v3073_v17  ;;  %v3074_v19 = vunpack.i.l.bf16 %v3073_v17 }
 0x2f2   : > { %v2882_v20 = vpack.c.bf16 %v3075_v18, %v3074_v19 }
 0x2f3   : > { %v3078_v21 = vpop.permute.xlu0 %3077  ;;  %v3083_v26 = vpop.permute.xlu1 %3082 }
 0x2f4   : > { %v3080_v22 = vunpack.i.h.bf16 %v3078_v21  ;;  %v3079_v23 = vunpack.i.l.bf16 %v3078_v21  ;;  %2883 = vmatprep.subr.bf16.mxu1 %v2882_v20  ;;  %v3085_v29 = vunpack.i.h.bf16 %v3083_v26  ;;  %v3084_v30 = vunpack.i.l.bf16 %v3083_v26 }
 0x2f5   : > { %2885 = vmatpush3.bf16.msra.mxu1 %v2882_v20 }
 0x2f6   : > { %v2886_v24 = vpack.c.bf16 %v3080_v22, %v3079_v23  ;;  %v2898_v35 = vpack.c.bf16 %v3085_v29, %v3084_v30 }
 0x2f7   : > { %v3088_v32 = vpop.permute.xlu0 %3087  ;;  %v3093_v38 = vpop.permute.xlu1 %3092 }
 0x2f8   : > { %2887 = vmatprep.subr.bf16.mxu1 %v2886_v24  ;;  %v3090_v36 = vunpack.i.h.bf16 %v3088_v32  ;;  %v3089_v37 = vunpack.i.l.bf16 %v3088_v32  ;;  %v3095_v42 = vunpack.i.h.bf16 %v3093_v38  ;;  %v3094_v43 = vunpack.i.l.bf16 %v3093_v38 }
 0x2f9   : > { %2889 = vmatpush3.bf16.msra.mxu1 %v2886_v24 }
 0x2fa   : > { %2891 = vmatprep.subr.bf16.mxu1 %v2890_v25  ;;  %v2902_v41 = vpack.c.bf16 %v3090_v36, %v3089_v37  ;;  %v2906_v47 = vpack.c.bf16 %v3095_v42, %v3094_v43 }
 0x2fb   : > { %v3098_v44 = vpop.permute.xlu0 %3097  ;;  %v3103_v50 = vpop.permute.xlu1 %3102 }
 0x2fc   : > { %2711 = vmatmul.mubr.msk.f32.vlgmr.msra.gmra.mrb[4].mxu1 %vm284_vm2, %v2409_v27  ;;  %v3100_v48 = vunpack.i.h.bf16 %v3098_v44  ;;  %v3099_v49 = vunpack.i.l.bf16 %v3098_v44  ;;  %v3105_v54 = vunpack.i.h.bf16 %v3103_v50  ;;  %v3104_v55 = vunpack.i.l.bf16 %v3103_v50  ;;  %v2460_v44 = vld [vmem:[%s3641_s1 + $0x160] sm:$0xff] }
 0x2fd   : > { %2893 = vmatpush3.bf16.msra.mxu1 %v2890_v25  ;;  %2713 = vmatprep.mubr.msk.f32.mxu1 %vm284_vm2, %v2410_v28 }
 0x2fe   : > { %2895 = vmatprep.subr.bf16.mxu1 %v2894_v31  ;;  %v2910_v53 = vpack.c.bf16 %v3100_v48, %v3099_v49  ;;  %v2914_v59 = vpack.c.bf16 %v3105_v54, %v3104_v55  ;;  %2780 = vmatprep.mubr.msk.f32.mxu0 %vm284_vm2, %v2460_v44  ;;  %v2500_v54 = vld [vmem:[%s3643_s3 + $0x40] sm:$0xff]  ;;  %v2499_v55 = vld [vmem:[%s3642_s2 + $0x58] sm:$0xff] }
 0x2ff   : > { %v3108_v56 = vpop.permute.xlu0 %3107  ;;  %v2480_v44 = vld [vmem:[%s3641_s1 + $0x1a0] sm:$0xff] }
 0x300   : > { %2714 = vmatmul.mubr.msk.f32.gmra.mrb[6].mxu1 %vm284_vm2, %v2411_v33  ;;  %v3110_v60 = vunpack.i.h.bf16 %v3108_v56  ;;  %v3109_v61 = vunpack.i.l.bf16 %v3108_v56  ;;  %v2502_v56 = vld [vmem:[%s3643_s3 + $0x50] sm:$0xff] }
 0x301   : > { %2897 = vmatpush3.bf16.msra.mxu1 %v2894_v31  ;;  %2724 = vmatprep.mubr.msk.f32.mxu1 %vm284_vm2, %v2404_v34 }
 0x302   : > { %2899 = vmatprep.subr.bf16.mxu1 %v2898_v35  ;;  %v2918_v0 = vpack.c.bf16 %v3110_v60, %v3109_v61  ;;  %v2503_v60 = vld [vmem:[%s3643_s3 + $0x58] sm:$0xff]  ;;  %v2506_v61 = vld [vmem:[%s3644_s4 + $0x50] sm:$0xff] }
 0x304   : > { %2725 = vmatmul.mubr.msk.f32.vlgmr.msra.gmra.mrb[4].mxu1 %vm284_vm2, %v2405_v39 }
 0x305   : > { %2901 = vmatpush3.bf16.msra.mxu1 %v2898_v35  ;;  %2727 = vmatprep.mubr.msk.f32.mxu1 %vm284_vm2, %v2406_v40 }
 0x306   : > { %2903 = vmatprep.subr.bf16.mxu1 %v2902_v41 }
 0x308   : > { %2728 = vmatmul.mubr.msk.f32.gmra.mrb[6].mxu1 %vm284_vm2, %v2407_v45 }
 0x309   : > { %2905 = vmatpush3.bf16.msra.mxu1 %v2902_v41  ;;  %2738 = vmatprep.mubr.msk.f32.mxu1 %vm284_vm2, %v2420_v46 }
 0x30a   : > { %2907 = vmatprep.subr.bf16.mxu1 %v2906_v47 }
 0x30c   : > { %2739 = vmatmul.mubr.msk.f32.vlgmr.msra.gmra.mrb[4].mxu1 %vm284_vm2, %v2421_v51  ;;  %v1527_v7 = vpop.permute.xlu1 %1526  ;;  %v2496_v51 = vld [vmem:[%s3642_s2 + $0x40] sm:$0xff] }
 0x30d   : > { %2909 = vmatpush3.bf16.msra.mxu1 %v2906_v47  ;;  %2741 = vmatprep.mubr.msk.f32.mxu1 %vm284_vm2, %v2422_v52  ;;  %v2498_v52 = vld [vmem:[%s3642_s2 + $0x50] sm:$0xff] }
 0x30e   : > { %2911 = vmatprep.subr.bf16.mxu1 %v2910_v53 }
 0x310   : > { %2742 = vmatmul.mubr.msk.f32.gmra.mrb[6].mxu1 %vm284_vm2, %v2423_v57  ;;  %v1532_v6 = vpop.permute.xlu0 %1531  ;;  %v1556_v9 = vpop.permute.xlu1 %1555  ;;  %v2501_v57 = vld [vmem:[%s3643_s3 + $0x48] sm:$0xff] }
 0x311   : > { %2913 = vmatpush3.bf16.msra.mxu1 %v2910_v53  ;;  %2752 = vmatprep.mubr.msk.f32.mxu1 %vm284_vm2, %v2428_v58  ;;  %v2497_v53 = vld [vmem:[%s3642_s2 + $0x48] sm:$0xff]  ;;  %v2490_v58 = vld [vmem:[%s3641_s1 + $0x1d0] sm:$0xff] }
 0x312   : > { %2915 = vmatprep.subr.bf16.mxu1 %v2914_v59 }
 0x314   : > { %2753 = vmatmul.mubr.msk.f32.vlgmr.msra.gmra.mrb[4].mxu1 %vm284_vm2, %v2429_v62  ;;  %v1561_v8 = vpop.permute.xlu0 %1560  ;;  %v1537_v11 = vpop.permute.xlu1 %1536  ;;  %v2505_v62 = vld [vmem:[%s3644_s4 + $0x48] sm:$0xff] }
 0x315   : > { %2917 = vmatpush3.bf16.msra.mxu1 %v2914_v59  ;;  %2755 = vmatprep.mubr.msk.f32.mxu1 %vm284_vm2, %v2430_v63  ;;  %v2504_v59 = vld [vmem:[%s3644_s4 + $0x40] sm:$0xff]  ;;  %v2507_v63 = vld [vmem:[%s3644_s4 + $0x58] sm:$0xff] }
 0x316   : > { %2919 = vmatprep.subr.bf16.mxu1 %v2918_v0 }
 0x318   : > { %2756 = vmatmul.mubr.msk.f32.gmra.mrb[6].mxu1 %vm284_vm2, %v2431_v1  ;;  %v1542_v10 = vpop.permute.xlu0 %1541  ;;  %v1585_v13 = vpop.permute.xlu1 %1584 }
 0x319   : > { %2921 = vmatpush3.bf16.msra.mxu1 %v2918_v0  ;;  %2766 = vmatprep.mubr.msk.f32.mxu1 %vm284_vm2, %v2436_v2 }
 0x31c   : > { %2767 = vmatmul.mubr.msk.f32.vlgmr.msra.gmra.mrb[4].mxu1 %vm284_vm2, %v2437_v3  ;;  %v1590_v12 = vpop.permute.xlu0 %1589  ;;  %v1566_v19 = vpop.permute.xlu1 %1565 }
 0x31d   : > { %2769 = vmatprep.mubr.msk.f32.mxu1 %vm284_vm2, %v2438_v4 }
 0x320   : > { %2770 = vmatmul.mubr.msk.f32.gmra.mrb[6].mxu1 %vm284_vm2, %v2439_v5  ;;  %v1571_v17 = vpop.permute.xlu0 %1570  ;;  %v1595_v33 = vpop.permute.xlu1 %1594 }
 0x321   : > { %2839 = vmatprep.mubr.msk.f32.mxu1 %vm284_vm2, %v2490_v58 }
 0x324   : > { %v1600_v30 = vpop.permute.xlu0 %1599 }
 0x3ef   : > { %v2768_v14 = vpop.f32.mrb[4].mxu1 }
 0x3f0   : > { %v1545_v15 = vadd.f32 %v2768_v14, %v1532_v6  ;;  %v1496_v16 = vpop.f32.mrb[5].mxu1 }
 0x3f1   : > { %v1544_v18 = vadd.f32 %v1527_v7, %v1496_v16 }
 0x3f2   : > { %v1574_v20 = vmul.f32 %v1561_v8, %v1545_v15 }
 0x3f3   : > { %v1573_v21 = vmul.f32 %v1556_v9, %v1544_v18  ;;  %v2771_v22 = vpop.f32.mrb[6].mxu1 }
 0x3f4   : > { %v1547_v23 = vadd.f32 %v2771_v22, %v1542_v10  ;;  %v1506_v24 = vpop.f32.mrb[7].mxu1  ;;  %v1603_v25 = vadd.f32 %v1590_v12, %v1574_v20  ;;  %v2462_v12 = vld [vmem:[%s3641_s1 + $0x170] sm:$0xff] }
 0x3f5   : > { %v1546_v26 = vadd.f32 %v1537_v11, %v1506_v24  ;;  %v1602_v27 = vadd.f32 %v1585_v13, %v1573_v21  ;;  %v2461_v11 = vld [vmem:[%s3641_s1 + $0x168] sm:$0xff] }
 0x3f6   : > { %v1576_v28 = vmul.f32 %v1571_v17, %v1547_v23  ;;  %v1607_v29 = vmax.f32 %v1603_v25, 0.0  ;;  %v2456_v23 = vld [vmem:[%s3641_s1 + $0x140] sm:$0xff] }
 0x3f7   : > { %v1575_v31 = vmul.f32 %v1566_v19, %v1546_v26  ;;  %v1606_v32 = vmax.f32 %v1602_v27, 0.0  ;;  %v2463_v19 = vld [vmem:[%s3641_s1 + $0x178] sm:$0xff] }
 0x3f8   : > { %1616 = vrot.lane.b32.xlu0 %v1607_v29, %s3160_s24  ;;  %v1605_v34 = vadd.f32 %v1600_v30, %v1576_v28  ;;  %v2457_v28 = vld [vmem:[%s3641_s1 + $0x148] sm:$0xff]  ;;  %v2458_v30 = vld [vmem:[%s3641_s1 + $0x150] sm:$0xff] }
 0x3f9   : > { %1614 = vrot.lane.b32.xlu1 %v1606_v32, %s3160_s24  ;;  %v1604_v35 = vadd.f32 %v1595_v33, %v1575_v31 }
 0x3fa   : > { %v1609_v36 = vmax.f32 %v1605_v34, 0.0  ;;  %v2459_v34 = vld [vmem:[%s3641_s1 + $0x158] sm:$0xff] }
 0x3fb   : > { %v1608_v37 = vmax.f32 %v1604_v35, 0.0  ;;  %v2491_v35 = vld [vmem:[%s3641_s1 + $0x1d8] sm:$0xff] }
 0x3fc   : > { %1620 = vrot.lane.b32.xlu0 %v1609_v36, %s3160_s24  ;;  %v2472_v36 = vld [vmem:[%s3641_s1 + $0x180] sm:$0xff] }
 0x3fd   : > { %1618 = vrot.lane.b32.xlu1 %v1608_v37, %s3160_s24 }
 0x46a   : > { %v1617_v38 = vpop.permute.xlu0 %1616 }
 0x46b   : > { %1627 = vst.msk [vmem:[#allocation2 + $0x8] sm:$0xff] %vm250_vm1, %v1617_v38  ;;  %v1615_v39 = vpop.permute.xlu1 %1614 }
 0x46c   : > { %1626 = vst.msk [vmem:[#allocation2] sm:$0xff] %vm250_vm1, %v1615_v39 }
 0x46e   : > { %v1621_v40 = vpop.permute.xlu0 %1620 }
 0x46f   : > { %1629 = vst.msk [vmem:[#allocation2 + $0x18] sm:$0xff] %vm250_vm1, %v1621_v40  ;;  %v1619_v41 = vpop.permute.xlu1 %1618  ;;  %v2473_v40 = vld [vmem:[%s3641_s1 + $0x188] sm:$0xff] }
 0x470   : > { %1628 = vst.msk [vmem:[#allocation2 + $0x10] sm:$0xff] %vm250_vm1, %v1619_v41  ;;  %v2474_v41 = vld [vmem:[%s3641_s1 + $0x190] sm:$0xff] }
 0x472   : > { %v1636_v42 = vld [vmem:[#allocation2 + $0x8] sm:$0xff] }
 0x473   : > { %v1635_v43 = vld [vmem:[#allocation2] sm:$0xff] }
 0x474   : > { %v3111_v45 = vpack.i.bf16 %v1636_v42, %v1635_v43  ;;  %v3504_v46 = vpack.c.bf16 %v1636_v42, %v1635_v43  ;;  %v2475_v43 = vld [vmem:[%s3641_s1 + $0x198] sm:$0xff] }
 0x476   : > { %3112 = vrot.lane.b32.xlu1 %v3111_v45, %s3163_s6  ;;  %v1638_v47 = vld [vmem:[#allocation2 + $0x18] sm:$0xff] }
 0x477   : > { %v1637_v48 = vld [vmem:[#allocation2 + $0x10] sm:$0xff] }
 0x478   : > { %v3116_v49 = vpack.i.bf16 %v1638_v47, %v1637_v48  ;;  %v3507_v50 = vpack.c.bf16 %v1638_v47, %v1637_v48  ;;  %v2483_v47 = vld [vmem:[%s3641_s1 + $0x1b8] sm:$0xff]  ;;  %v2488_v48 = vld [vmem:[%s3641_s1 + $0x1c0] sm:$0xff] }
 0x47a   : > { %3122 = vrot.lane.b32.xlu1 %v3111_v45, %s3161_s27  ;;  %3117 = vrot.lane.b32.xlu0 %v3116_v49, %s3163_s6 }
 0x47e   : > { %3132 = vrot.lane.b32.xlu1 %v3111_v45, %s3162_s30  ;;  %3127 = vrot.lane.b32.xlu0 %v3116_v49, %s3161_s27 }
 0x482   : > { %3142 = vrot.lane.b32.xlu1 %v3111_v45, %s3164_s7  ;;  %3137 = vrot.lane.b32.xlu0 %v3116_v49, %s3162_s30  ;;  %v2481_v45 = vld [vmem:[%s3641_s1 + $0x1a8] sm:$0xff] }
 0x486   : > { %2215 = vperm.xlu1 %3070, %v2496_v51   ;;  %3147 = vrot.lane.b32.xlu0 %v3116_v49, %s3164_s7  ;;  %v2489_v49 = vld [vmem:[%s3641_s1 + $0x1c8] sm:$0xff] }
 0x48a   : > { %2225 = vperm.xlu1 %3070, %v2498_v52   ;;  %2220 = vperm.xlu0 %3069, %v2497_v53  }
 0x48e   : > { %2244 = vperm.xlu1 %3070, %v2500_v54   ;;  %2230 = vperm.xlu0 %3069, %v2499_v55  }
 0x492   : > { %2254 = vperm.xlu1 %3070, %v2502_v56   ;;  %2249 = vperm.xlu0 %3069, %v2501_v57  }
 0x496   : > { %2273 = vperm.xlu1 %3070, %v2504_v59   ;;  %2259 = vperm.xlu0 %3069, %v2503_v60  }
 0x49a   : > { %2283 = vperm.xlu1 %3070, %v2506_v61   ;;  %2278 = vperm.xlu0 %3069, %v2505_v62  }
 0x49e   : > { %2288 = vperm.xlu0 %3069, %v2507_v63  }
 0x4e8   : > { %v3113_v0 = vpop.permute.xlu1 %3112 }
 0x4e9   : > { %v3115_v1 = vunpack.i.h.bf16 %v3113_v0  ;;  %v3114_v2 = vunpack.i.l.bf16 %v3113_v0 }
 0x4eb   : > { %v2922_v3 = vpack.c.bf16 %v3115_v1, %v3114_v2 }
 0x4ec   : > { %v3118_v4 = vpop.permute.xlu0 %3117  ;;  %v3123_v5 = vpop.permute.xlu1 %3122 }
 0x4ed   : > { %v3120_v6 = vunpack.i.h.bf16 %v3118_v4  ;;  %v3119_v7 = vunpack.i.l.bf16 %v3118_v4  ;;  %2923 = vmatprep.subr.bf16.mxu0 %v2922_v3  ;;  %v3125_v13 = vunpack.i.h.bf16 %v3123_v5  ;;  %v3124_v14 = vunpack.i.l.bf16 %v3123_v5 }
 0x4ee   : > { %2925 = vmatpush3.bf16.msra.mxu0 %v2922_v3 }
 0x4ef   : > { %v2926_v8 = vpack.c.bf16 %v3120_v6, %v3119_v7  ;;  %v2938_v21 = vpack.c.bf16 %v3125_v13, %v3124_v14 }
 0x4f0   : > { %v3128_v9 = vpop.permute.xlu0 %3127  ;;  %v3133_v10 = vpop.permute.xlu1 %3132 }
 0x4f1   : > { %2927 = vmatprep.subr.bf16.mxu0 %v2926_v8  ;;  %v3130_v24 = vunpack.i.h.bf16 %v3128_v9  ;;  %v3129_v25 = vunpack.i.l.bf16 %v3128_v9  ;;  %v3135_v32 = vunpack.i.h.bf16 %v3133_v10  ;;  %v3134_v33 = vunpack.i.l.bf16 %v3133_v10 }
 0x4f2   : > { %2929 = vmatpush3.bf16.msra.mxu0 %v2926_v8 }
 0x4f3   : > { %2931 = vmatprep.subr.bf16.mxu0 %v3504_v46  ;;  %v2942_v31 = vpack.c.bf16 %v3130_v24, %v3129_v25  ;;  %v2946_v37 = vpack.c.bf16 %v3135_v32, %v3134_v33 }
 0x4f4   : > { %v3138_v15 = vpop.permute.xlu0 %3137  ;;  %v3143_v16 = vpop.permute.xlu1 %3142 }
 0x4f5   : > { %v3145_v17 = vunpack.i.h.bf16 %v3143_v16  ;;  %v3144_v18 = vunpack.i.l.bf16 %v3143_v16  ;;  %2781 = vmatmul.mubr.msk.f32.vlgmr.msra.gmra.mrb[4].mxu0 %vm284_vm2, %v2461_v11  ;;  %v3140_v38 = vunpack.i.h.bf16 %v3138_v15  ;;  %v3139_v39 = vunpack.i.l.bf16 %v3138_v15 }
 0x4f6   : > { %2933 = vmatpush3.bf16.msra.mxu0 %v3504_v46  ;;  %2783 = vmatprep.mubr.msk.f32.mxu0 %vm284_vm2, %v2462_v12  ;;  %v2482_v46 = vld [vmem:[%s3641_s1 + $0x1b0] sm:$0xff] }
 0x4f7   : > { %v2954_v20 = vpack.c.bf16 %v3145_v17, %v3144_v18  ;;  %2935 = vmatprep.subr.bf16.mxu0 %v3507_v50  ;;  %v2950_v42 = vpack.c.bf16 %v3140_v38, %v3139_v39 }
 0x4f8   : > { %v3148_v22 = vpop.permute.xlu0 %3147 }
 0x4f9   : > { %v3150_v26 = vunpack.i.h.bf16 %v3148_v22  ;;  %v3149_v27 = vunpack.i.l.bf16 %v3148_v22  ;;  %2784 = vmatmul.mubr.msk.f32.gmra.mrb[6].mxu0 %vm284_vm2, %v2463_v19  ;;  %2962 = vmatprep.subr.bf16.mxu1 %v2954_v20 }
 0x4fa   : > { %2937 = vmatpush3.bf16.msra.mxu0 %v3507_v50  ;;  %2964 = vmatpush3.bf16.msra.mxu1 %v2954_v20 }
 0x4fb   : > { %v2958_v29 = vpack.c.bf16 %v3150_v26, %v3149_v27  ;;  %2939 = vmatprep.subr.bf16.mxu0 %v2938_v21  ;;  %2794 = vmatprep.mubr.msk.f32.mxu0 %vm284_vm2, %v2456_v23 }
 0x4fd   : > { %2795 = vmatmul.mubr.msk.f32.vlgmr.msra.gmra.mrb[4].mxu0 %vm284_vm2, %v2457_v28  ;;  %2963 = vmatprep.subr.bf16.mxu1 %v2958_v29 }
 0x4fe   : > { %2941 = vmatpush3.bf16.msra.mxu0 %v2938_v21  ;;  %2965 = vmatpush3.bf16.msra.mxu1 %v2958_v29 }
 0x4ff   : > { %2943 = vmatprep.subr.bf16.mxu0 %v2942_v31  ;;  %2797 = vmatprep.mubr.msk.f32.mxu0 %vm284_vm2, %v2458_v30 }
 0x501   : > { %2798 = vmatmul.mubr.msk.f32.gmra.mrb[6].mxu0 %vm284_vm2, %v2459_v34  ;;  %2840 = vmatmul.mubr.msk.f32.vlgmr.msra.gmra.mrb[8].mxu1 %vm284_vm2, %v2491_v35 }
 0x502   : > { %2945 = vmatpush3.bf16.msra.mxu0 %v2942_v31  ;;  %2808 = vmatprep.mubr.msk.f32.mxu0 %vm284_vm2, %v2472_v36 }
 0x503   : > { %2947 = vmatprep.subr.bf16.mxu0 %v2946_v37 }
 0x505   : > { %2809 = vmatmul.mubr.msk.f32.vlgmr.msra.gmra.mrb[4].mxu0 %vm284_vm2, %v2473_v40  ;;  %v2216_v51 = vpop.permute.xlu1 %2215 }
 0x506   : > { %2949 = vmatpush3.bf16.msra.mxu0 %v2946_v37  ;;  %2811 = vmatprep.mubr.msk.f32.mxu0 %vm284_vm2, %v2474_v41 }
 0x507   : > { %2951 = vmatprep.subr.bf16.mxu0 %v2950_v42 }
 0x509   : > { %2812 = vmatmul.mubr.msk.f32.gmra.mrb[6].mxu0 %vm284_vm2, %v2475_v43  ;;  %v2221_v50 = vpop.permute.xlu0 %2220  ;;  %v2226_v53 = vpop.permute.xlu1 %2225 }
 0x50a   : > { %2953 = vmatpush3.bf16.msra.mxu0 %v2950_v42  ;;  %2822 = vmatprep.mubr.msk.f32.mxu0 %vm284_vm2, %v2480_v44 }
 0x50b   : > { %2955 = vmatprep.subr.bf16.mxu0 %v2954_v20 }
 0x50d   : > { %2823 = vmatmul.mubr.msk.f32.vlgmr.msra.gmra.mrb[4].mxu0 %vm284_vm2, %v2481_v45  ;;  %v2231_v52 = vpop.permute.xlu0 %2230  ;;  %v2245_v57 = vpop.permute.xlu1 %2244 }
 0x50e   : > { %2957 = vmatpush3.bf16.msra.mxu0 %v2954_v20  ;;  %2825 = vmatprep.mubr.msk.f32.mxu0 %vm284_vm2, %v2482_v46 }
 0x50f   : > { %2959 = vmatprep.subr.bf16.mxu0 %v2958_v29 }
 0x511   : > { %2826 = vmatmul.mubr.msk.f32.gmra.mrb[6].mxu0 %vm284_vm2, %v2483_v47  ;;  %v2250_v56 = vpop.permute.xlu0 %2249  ;;  %v2255_v59 = vpop.permute.xlu1 %2254 }
 0x512   : > { %2961 = vmatpush3.bf16.msra.mxu0 %v2958_v29  ;;  %2836 = vmatprep.mubr.msk.f32.mxu0 %vm284_vm2, %v2488_v48 }
 0x515   : > { %2837 = vmatmul.mubr.msk.f32.vlgmr.msra.gmra.mrb[4].mxu0 %vm284_vm2, %v2489_v49  ;;  %v2260_v58 = vpop.permute.xlu0 %2259  ;;  %v2274_v62 = vpop.permute.xlu1 %2273 }
 0x519   : > { %v2279_v60 = vpop.permute.xlu0 %2278  ;;  %v2284_v11 = vpop.permute.xlu1 %2283 }
 0x51d   : > { %v2289_v8 = vpop.permute.xlu0 %2288 }
 0x5d4   : > { %v2841_v54 = vpop.f32.mrb[8].mxu1 }
 0x5d5   : > { %v2195_v55 = vpop.f32.mrb[9].mxu1 }
 0x5e4   : > { %v2827_v61 = vpop.f32.mrb[6].mxu0 }
 0x5e5   : > { %v2970_v63 = vadd.f32 %v2841_v54, %v2827_v61  ;;  %v2077_v0 = vpop.f32.mrb[7].mxu0 }
 0x5e6   : > { %v2971_v1 = vadd.f32 %v2195_v55, %v2077_v0 }
 0x5e7   : > { %v2236_v2 = vadd.f32 %v2970_v63, %v2231_v52 }
 0x5e8   : > { %v2235_v3 = vadd.f32 %v2971_v1, %v2226_v53  ;;  %v2838_v4 = vpop.f32.mrb[4].mxu0 }
 0x5e9   : > { %v2265_v5 = vmul.f32 %v2260_v58, %v2236_v2  ;;  %v2234_v6 = vadd.f32 %v2838_v4, %v2221_v50  ;;  %v2185_v7 = vpop.f32.mrb[5].mxu0 }
 0x5ea   : > { %v2264_v9 = vmul.f32 %v2255_v59, %v2235_v3  ;;  %v2233_v10 = vadd.f32 %v2216_v51, %v2185_v7 }
 0x5eb   : > { %v2294_v12 = vadd.f32 %v2289_v8, %v2265_v5  ;;  %v2263_v13 = vmul.f32 %v2250_v56, %v2234_v6 }
 0x5ec   : > { %v2293_v14 = vadd.f32 %v2284_v11, %v2264_v9  ;;  %v2262_v15 = vmul.f32 %v2245_v57, %v2233_v10 }
 0x5ed   : > { %v2298_v16 = vmax.f32 %v2294_v12, 0.0  ;;  %v2292_v17 = vadd.f32 %v2279_v60, %v2263_v13 }
 0x5ee   : > { %v2297_v18 = vmax.f32 %v2293_v14, 0.0  ;;  %v2291_v19 = vadd.f32 %v2274_v62, %v2262_v15 }
 0x5ef   : > { %2303 = vst.msk [vmem:[%s224_s13 + $0x18] sm:$0xff] %vm2299_vm3, %v2298_v16  ;;  %v2296_v20 = vmax.f32 %v2292_v17, 0.0 }
 0x5f0   : > { %2302 = vst.msk [vmem:[%s224_s13 + $0x10] sm:$0xff] %vm2299_vm3, %v2297_v18  ;;  %v2295_v21 = vmax.f32 %v2291_v19, 0.0 }
 0x5f1   : > { %2301 = vst.msk [vmem:[%s224_s13 + $0x8] sm:$0xff] %vm2299_vm3, %v2296_v20 }
 0x5f2   : > { %2300 = vst.msk [vmem:[%s224_s13] sm:$0xff] %vm2299_vm3, %v2295_v21 }
 0x5f3 PF: > { %s15_s18 = sadd.s32 1, %s3157_s18  }
 0x5f4   : > { %p12_p4 = scmp.ge.s32.totalorder %s15_s18, 4  }
 0x5f6   :  { %14 = sbr.rel (!%p12_p4) target bundleno = 1 (0x1), region = 90 }

// kernel: tacotron2_forward.10
= control target key start
LH: loop header
LB: loop body
LE: loop exit
PB: predicated region body
PF: predicated region fallthrough
CT: control target
= control target key end

     0   :  { %s3106_s0 = inlined_call_operand.vmem [shape: f32[2,12,128], index: 0, kind: input, shape index: {}]   ;;  %s3107_s1 = inlined_call_operand.vmem [shape: f32[2,8,32], index: 1, kind: input, shape index: {}]   ;;  %s3108_s2 = inlined_call_operand.vmem [shape: f32[2,1,16], index: 2, kind: input, shape index: {}]   ;;  %s3109_s3 = inlined_call_operand.vmem [shape: f32[2,8,1], index: 3, kind: input, shape index: {}]   ;;  %s3110_s4 = inlined_call_operand.vmem [shape: f32[32,32], index: 4, kind: input, shape index: {}]   ;;  %s3111_s5 = inlined_call_operand.vmem [shape: f32[16,32], index: 5, kind: input, shape index: {}]   ;;  %s3112_s6 = inlined_call_operand.vmem [shape: f32[1,32], index: 6, kind: input, shape index: {}]   ;;  %s3113_s7 = inlined_call_operand.vmem [shape: f32[32,16], index: 7, kind: input, shape index: {}]   ;;  %s3114_s8 = inlined_call_operand.vmem [shape: f32[32,128], index: 8, kind: input, shape index: {}]   ;;  %s3115_s9 = inlined_call_operand.vmem [shape: f32[32,128], index: 9, kind: input, shape index: {}]   ;;  %s3116_s10 = inlined_call_operand.vmem [shape: f32[1,128], index: 10, kind: input, shape index: {}]   ;;  %s3117_s11 = inlined_call_operand.vmem [shape: f32[32,16], index: 11, kind: input, shape index: {}]   ;;  %s3118_s12 = inlined_call_operand.vmem [shape: f32[14,16], index: 12, kind: input, shape index: {}]   ;;  %s3119_s13 = inlined_call_operand.vmem [shape: f32[1,16], index: 13, kind: input, shape index: {}]   ;;  %s3120_s14 = inlined_call_operand.vmem [shape: f32[32,128], index: 14, kind: input, shape index: {}]   ;;  %s3121_s15 = inlined_call_operand.vmem [shape: f32[32,128], index: 15, kind: input, shape index: {}]   ;;  %s3122_s16 = inlined_call_operand.vmem [shape: f32[32,128], index: 16, kind: input, shape index: {}]   ;;  %s3123_s17 = inlined_call_operand.vmem [shape: f32[1,128], index: 17, kind: input, shape index: {}]   ;;  %s3124_s18 = inlined_call_operand.vmem [shape: f32[32,17], index: 18, kind: input, shape index: {}]   ;;  %s3125_s19 = inlined_call_operand.vmem [shape: f32[32,17], index: 19, kind: input, shape index: {}]   ;;  %s3126_s20 = inlined_call_operand.vmem [shape: f32[1,17], index: 20, kind: input, shape index: {}]   ;;  %s3127_s21 = inlined_call_operand.vmem [shape: f32[2,12,1,17], index: 21, kind: output, shape index: {0}]   ;;  %s3128_s22 = inlined_call_operand.vmem [shape: f32[2,12,8,1], index: 22, kind: output, shape index: {1}]  }
   0x1   :  { %3135 = sst [smem:[#allocation3_spill]] %s3106_s0 }
   0x2   :  { %3136 = sst [smem:[#allocation4_spill]] %s3107_s1 }
   0x3   :  { %3137 = sst [smem:[#allocation5_spill]] %s3108_s2 }
   0x4   :  { %3138 = sst [smem:[#allocation6_spill]] %s3109_s3  ;;  %s2696_s3 = smov 0  }
   0x5   :  { %3139 = sst [smem:[#allocation7_spill]] %s3110_s4 }
   0x6   :  { %3140 = sst [smem:[#allocation8_spill]] %s3111_s5 }
   0x7   :  { %3141 = sst [smem:[#allocation9_spill]] %s3112_s6 }
   0x8   :  { %3142 = sst [smem:[#allocation10_spill]] %s3123_s17 }
   0x9   :  { %3143 = sst [smem:[#allocation11_spill]] %s3124_s18 }
   0xa   :  { %3144 = sst [smem:[#allocation12_spill]] %s3126_s20 }
   0xb LB: > { %3145 = sst [smem:[#allocation2_spill]] %s2524_s3  ;;  %s2087_s28 = sadd.s32 4294967295, %s2524_s3   ;;  %s2524_s3 = sphi %s2696_s3, %s33_s3  }
   0xc   : > { %p2091_p0 = scmp.ge.s32.totalorder %s2524_s3, 1  ;;  %p641_p1 = scmp.lt.s32.totalorder %s2524_s3, 3 }
   0xe   : > { %p642_p2 = pnand %p2091_p0, %p641_p1 }
   0xf   : > { %s3146_s4 = sld [smem:[#allocation7_spill]] (!%p642_p2)  ;;  %s3147_s24 = sld [smem:[#allocation8_spill]] (!%p642_p2)  ;;  %v2558_v3 = vmov (!%p642_p2), 0.0|0.0   ;;  %vm2559_vm0 = vmmov (!%p642_p2), 0   ;;  %v2560_v9 = vmov (!%p642_p2), 0.0   ;;  %vm751_vm1 = vcmask (!%p642_p2), 130048  }
  0x10   : > { %645 = sbr.rel (%p642_p2) target bundleno = 2787 (0xae3), region = 104  ;;  %2301 = vmatprep.subr.bf16.mxu1 (!%p642_p2), %v2558_v3  ;;  %2298 = vmatprep.subr.bf16.mxu0 (!%p642_p2), %v2558_v3  ;;  %p718_p3 = scmp.lt.s32.totalorder (!%p642_p2), %s2087_s28, 1  ;;  %vm829_vm2 = vcmask (!%p642_p2), 261120   ;;  %v911_v14 = vld [vmem:[%s3113_s7] sm:$0xff] (!%p642_p2)  ;;  %v912_v15 = vld [vmem:[%s3113_s7 + $0x8] sm:$0xff] (!%p642_p2)  ;;  %v913_v17 = vld [vmem:[%s3113_s7 + $0x10] sm:$0xff] (!%p642_p2)  ;;  %v825_v20 = vlaneseq (!%p642_p2) }
  0x11   : > { %2178 = vmatprep.mubr.msk.f32.mxu0 (!%p642_p2), %vm2559_vm0, %v2560_v9  ;;  %2189 = vmatprep.mubr.msk.f32.mxu1 (!%p642_p2), %vm2559_vm0, %v2560_v9  ;;  %s3148_s1 = sld [smem:[#allocation5_spill]] (!%p642_p2)  ;;  %s3149_s26 = sld [smem:[#allocation3_spill]] (!%p642_p2)  ;;  %v2308_v16 = vpack.c.bf16 (!%p642_p2), %v912_v15, %v911_v14  ;;  %v914_v18 = vld [vmem:[%s3113_s7 + $0x18] sm:$0xff] (!%p642_p2)  ;;  %v2779_v33 = vmov (!%p642_p2), 0.0   ;;  %v2781_v34 = vmov (!%p642_p2), 0.0   ;;  %v2783_v35 = vmov (!%p642_p2), 0.0  }
  0x12   : > { %v2311_v19 = vpack.c.bf16 (!%p642_p2), %v914_v18, %v913_v17  ;;  %v2765_v21 = vshrl.u32 (!%p642_p2), %v825_v20, 7  ;;  %v2785_v36 = vmov (!%p642_p2), 0.0   ;;  %v2787_v37 = vmov (!%p642_p2), 0.0   ;;  %s2793_s6 = smov (!%p642_p2), 0  }
  0x13   : > { %v2789_v38 = vmov (!%p642_p2), 0.0   ;;  %v2791_v39 = vmov (!%p642_p2), 0.0  }
  0x14   : > { %v827_v22 = vsub.s32 (!%p642_p2), 0, %v2765_v21 }
  0x15   : > { %v744_v0 = vld [vmem:[%s3146_s4] sm:$0xff] (!%p642_p2)  ;;  %v745_v1 = vld [vmem:[%s3146_s4 + $0x8] sm:$0xff] (!%p642_p2)  ;;  %v746_v6 = vld [vmem:[%s3146_s4 + $0x10] sm:$0xff] (!%p642_p2) }
  0x16   : > { %v749_v2 = vld [vmem:[%s3147_s24] sm:$0xff] (!%p642_p2)  ;;  %v2302_v4 = vpack.c.bf16 (!%p642_p2), %v745_v1, %v744_v0  ;;  %v750_v5 = vld [vmem:[%s3147_s24 + $0x8] sm:$0xff] (!%p642_p2)  ;;  %v747_v7 = vld [vmem:[%s3146_s4 + $0x18] sm:$0xff] (!%p642_p2) }
  0x17   : > { %v2299_v8 = vpack.c.bf16 %v750_v5, %v749_v2  ;;  %s3158_s28 = smov (!%p718_p3, %s2087_s28), 1  ;;  %v2305_v10 = vpack.c.bf16 %v747_v7, %v746_v6 }
  0x18   : > { %2303 = vmatpush3.bf16.msra.mxu1 %v2302_v4  ;;  %s2117_s30 = sshll.u32 %s3158_s28, 4  ;;  %s729_s5 = scalar_lea.vmem %s3148_s1, %s3158_s28 }
  0x19   : > { %2300 = vmatpush3.bf16.msra.mxu0 %v2299_v8  ;;  %2304 = vmatprep.subr.bf16.mxu1 %v2558_v3  ;;  %s2730_s2 = scalar_lea.vmem %s3149_s26, %s2117_s30  ;;  %s2365_s27 = smul.u32 12, %s3158_s28  ;;  %v748_v11 = vld [vmem:[%s729_s5] sm:$0x1] }
  0x1a   : > { %2307 = vmatprep.subr.bf16.mxu0 %v2558_v3  ;;  %s2366_s29 = smul.u32 96, %s3158_s28  ;;  %s2094_s4 = sshll.u32 %s3158_s28, 3 }
  0x1b   : > { %s2736_s20 = scalar_lea.vmem %s3127_s21, %s2365_s27  ;;  %s3150_s1 = sld [smem:[#allocation4_spill]] }
  0x1c   : > { %2179 = vmatmul.mubr.msk.f32.vlgmr.msra.gmra.mrb[0].mxu0 %vm751_vm1, %v748_v11  ;;  %2306 = vmatpush3.bf16.msra.mxu1 %v2305_v10  ;;  %s2745_s5 = scalar_lea.vmem %s3128_s22, %s2366_s29  ;;  %s3151_s28 = sld [smem:[#allocation6_spill]] }
  0x1d   : > { %2200 = vmatprep.mubr.msk.f32.mxu0 %vm2559_vm0, %v2560_v9  ;;  %2309 = vmatpush3.bf16.msra.mxu0 %v2308_v16  ;;  %s3152_s30 = sld [smem:[#allocation9_spill]] }
  0x1e   : > { %2310 = vmatprep.subr.bf16.mxu0 %v2558_v3 }
  0x21   : > { %s726_s18 = scalar_lea.vmem %s3150_s1, %s2094_s4  ;;  %2312 = vmatpush3.bf16.msra.mxu0 %v2311_v19 }
  0x22   : > { %s733_s17 = scalar_lea.vmem %s3151_s28, %s2094_s4  ;;  %v743_v12 = vld [vmem:[%s726_s18] sm:$0xff] }
  0x23   : > { %2190 = vmatmul.mubr.msk.f32.vlgmr.msra.gmra.mrb[0].mxu1 %vm829_vm2, %v743_v12  ;;  %v2751_v13 = vld [vmem:[%s733_s17] sm:$0xff] }
  0x24   : > { %v2099_v27 = vld [vmem:[%s3152_s30] ss:$0 sm:$0xff] }
  0xef   : > { %v821_v23 = vpop.f32.mrb[0].mxu0 }
  0xf0   : > { %v828_v24 = vrot.slane %v821_v23, %v827_v22  ;;  %v2180_v25 = vpop.f32.mrb[1].mxu0 }
  0xf6   : > { %v899_v26 = vpop.f32.mrb[0].mxu1 }
  0xf7   : > { %v900_v28 = vadd.f32 %v899_v26, %v828_v24  ;;  %v2191_v29 = vpop.f32.mrb[1].mxu1 }
  0xf9   : > { %v2773_v30 = vadd.f32 %v2099_v27, %v900_v28 }
  0xfb   : > { %2201 = vmatmul.mubr.msk.f32.vlgmr.msra.gmra.mrb[2].mxu0 %vm829_vm2, %v2773_v30 }
 0x1ce   : > { %v2777_v31 = vpop.f32.mrb[2].mxu0 }
 0x1cf   : > { %v2202_v32 = vpop.f32.mrb[3].mxu0 }
 0x1d0 LB: >> { %v1004_v40 = vld [vmem:[%s3114_s8] sm:$0xff]  ;;  %v1005_v41 = vld [vmem:[%s3114_s8 + $0x8] sm:$0xff]  ;;  %v2561_v43 = vmov 0.0|0.0   ;;  %v1006_v46 = vld [vmem:[%s3114_s8 + $0x10] sm:$0xff]  ;;  %s2562_s1 = smov 64   ;;  %vm2563_vm3 = vmmov 0   ;;  %s1002_s3 = scalar_lea.vmem %s2730_s2, %s2556_s6  ;;  %s2556_s6 = sphi %s2793_s6, %s994_s6   ;;  %v2552_v39 = vphi %v2791_v39, %v2945_v39   ;;  %v2548_v38 = vphi %v2789_v38, %v2901_v38   ;;  %v2544_v37 = vphi %v2787_v37, %v1775_v37   ;;  %v2540_v36 = vphi %v2785_v36, %v1769_v36   ;;  %v2536_v35 = vphi %v2783_v35, %v2988_v35   ;;  %v2532_v34 = vphi %v2781_v34, %v2995_v34   ;;  %v2528_v33 = vphi %v2779_v33, %v3034_v33  }
 0x1d1   : >> { %v1082_v42 = vld [vmem:[%s3115_s9] sm:$0xff]  ;;  %2313 = vmatprep.subr.bf16.mxu0 %v2561_v43  ;;  %v2314_v44 = vpack.c.bf16 %v1005_v41, %v1004_v40  ;;  %2319 = vmatprep.subr.bf16.mxu1 %v2561_v43  ;;  %v1083_v45 = vld [vmem:[%s3115_s9 + $0x8] sm:$0xff]  ;;  %v1007_v47 = vld [vmem:[%s3114_s8 + $0x18] sm:$0xff]  ;;  %v2564_v49 = vmov 0.0   ;;  %s2565_s0 = smov 32   ;;  %vm1270_vm4 = vcmask 1042432  }
 0x1d2   : >> { %1087 = vrot.lane.b32.xlu0 %v2552_v39, %s2562_s1  ;;  %v2320_v48 = vpack.c.bf16 %v1083_v45, %v1082_v42  ;;  %2211 = vmatprep.mubr.msk.f32.mxu0 %vm2563_vm3, %v2564_v49  ;;  %v1084_v50 = vld [vmem:[%s3115_s9 + $0x10] sm:$0xff]  ;;  %v1085_v51 = vld [vmem:[%s3115_s9 + $0x18] sm:$0xff]  ;;  %v2317_v52 = vpack.c.bf16 %v1007_v47, %v1006_v46  ;;  %v1003_v57 = vld [vmem:[%s1002_s3] sm:$0x1]  ;;  %v1268_v7 = vrot.slane %v2536_v35, 5  ;;  %vm1280_vm5 = vcmask 1046528  }
 0x1d3   : >> { %2315 = vmatpush3.bf16.msra.mxu0 %v2314_v44  ;;  %2222 = vmatprep.mubr.msk.f32.mxu1 %vm2563_vm3, %v2564_v49  ;;  %v2323_v53 = vpack.c.bf16 %v1085_v51, %v1084_v50  ;;  %v1162_v60 = vld [vmem:[%s3116_s10] sm:$0x1]  ;;  %vm1294_vm6 = vcmask 1044480   ;;  %s2566_s29 = smov 1   ;;  %v1274_v19 = vrot.slane %v2532_v34, 5  ;;  %s2567_s23 = smov 3  }
 0x1d4   : >> { %2316 = vmatprep.subr.bf16.mxu0 %v2561_v43  ;;  %2321 = vmatpush3.bf16.msra.mxu1 %v2320_v48  ;;  %v2868_v8 = vsel %vm1270_vm4, 0.0, %v1268_v7  ;;  %v2871_v9 = vsel %vm1270_vm4, %v1268_v7, 0.0  ;;  %s2568_s18 = smov 5   ;;  %vm1287_vm7 = vcmask 1045504   ;;  %s2569_s4 = smov 7   ;;  %vm1301_vm8 = vcmask 1043456  }
 0x1d5   : >> { %2322 = vmatprep.subr.bf16.mxu1 %v2561_v43  ;;  %v1281_v10 = vrot.slane %v2868_v8, 1  ;;  %v1282_v11 = vrot.slane %v2871_v9, 1  ;;  %v1295_v12 = vrot.slane %v2868_v8, 3  ;;  %v1296_v14 = vrot.slane %v2871_v9, 3  ;;  %s2570_s17 = smov 9   ;;  %s2571_s30 = smov 10  }
 0x1d6   : >> { %v1308_v17 = vrot.slane %v2868_v8, 5  ;;  %v1309_v18 = vrot.slane %v2871_v9, 5  ;;  %v2884_v23 = vsel %vm1270_vm4, 0.0, %v1274_v19  ;;  %v2887_v24 = vsel %vm1270_vm4, %v1274_v19, 0.0  ;;  %s2572_s25 = smov 12   ;;  %s2573_s26 = smov 2  }
 0x1d7   : >> { %2318 = vmatpush3.bf16.msra.mxu0 %v2317_v52  ;;  %v1283_v15 = vsel %vm1280_vm5, %v1281_v10, %v1282_v11  ;;  %v1297_v16 = vsel %vm1294_vm6, %v1295_v12, %v1296_v14  ;;  %v1332_v25 = vrot.slane %v2884_v23, 2  ;;  %v1333_v26 = vrot.slane %v2887_v24, 2  ;;  %s2574_s28 = smov 4   ;;  %s2114_s27 = sshll.u32 %s2556_s6, 3 }
 0x1d8   : >> { %2324 = vmatpush3.bf16.msra.mxu1 %v2323_v53  ;;  %2325 = vmatprep.subr.bf16.mxu0 %v2561_v43  ;;  %v1310_v20 = vsel %vm1270_vm4, %v1308_v17, %v1309_v18  ;;  %v1338_v28 = vrot.slane %v2884_v23, 3  ;;  %v1339_v29 = vrot.slane %v2887_v24, 3  ;;  %v1351_v35 = vrot.slane %v2887_v24, 5  ;;  %v1188_v53 = vld [vmem:[%s3117_s11] sm:$0xff] }
 0x1d9   : >> { %2331 = vmatprep.subr.bf16.mxu1 %v2561_v43  ;;  %v1334_v27 = vsel %vm1287_vm7, %v1332_v25, %v1333_v26  ;;  %v1288_v42 = vrot.slane %v2868_v8, 2  ;;  %v1289_v44 = vrot.slane %v2871_v9, 2  ;;  %v1302_v47 = vrot.slane %v2868_v8, 4 }
 0x1da   : >> { %2212 = vmatmul.mubr.msk.f32.vlgmr.msra.gmra.mrb[0].mxu0 %vm829_vm2, %v2528_v33  ;;  %v1340_v32 = vsel %vm1294_vm6, %v1338_v28, %v1339_v29  ;;  %v1350_v33 = vrot.slane %v2884_v23, 5  ;;  %v1303_v48 = vrot.slane %v2871_v9, 4  ;;  %v1315_v51 = vrot.slane %v2868_v8, 6 }
 0x1db   : >> { %2233 = vmatprep.mubr.msk.f32.mxu0 %vm2563_vm3, %v2564_v49  ;;  %v1290_v46 = vsel %vm1287_vm7, %v1288_v42, %v1289_v44  ;;  %v1316_v52 = vrot.slane %v2871_v9, 6  ;;  %vm1314_vm9 = vcmask 1041408   ;;  %vm2578_vm10 = vmmov 1   ;;  %v1521_v44 = vld [vmem:[%s3120_s14 + $0x10] sm:$0xff] }
 0x1dc   : >> { %v1352_v39 = vsel %vm1270_vm4, %v1350_v33, %v1351_v35  ;;  %v1304_v50 = vsel %vm1301_vm8, %v1302_v47, %v1303_v48  ;;  %vm2333_vm11 = vmpackc.low %vm1287_vm7, %vm2578_vm10  ;;  %v1356_v7 = vrot.slane %v2884_v23, 6  ;;  %v1357_v9 = vrot.slane %v2887_v24, 6  ;;  %v1519_v33 = vld [vmem:[%s3120_s14] sm:$0xff]  ;;  %v1520_v35 = vld [vmem:[%s3120_s14 + $0x8] sm:$0xff] }
 0x1dd   : >> { %vm1362_vm12 = vcmask 7168   ;;  %vm1364_vm13 = vcmask 15360   ;;  %vm1366_vm14 = vcmask 23552   ;;  %vm1368_vm15 = vcmask 31744  }
 0x1de   : >> { %v1358_v10 = vsel %vm1314_vm9, %v1356_v7, %v1357_v9  ;;  %vm1370_vm0 = vcmask 39936   ;;  %vm1372_vm4 = vcmask 48128   ;;  %vm1376_vm6 = vcmask 64512  }
 0x1df   : >> { %vm1378_vm7 = vcmask 72704   ;;  %v2342_v42 = vpack.c.bf16 %v1520_v35, %v1519_v33  ;;  %vm1384_vm10 = vcmask 97280   ;;  %v1781_v33 = vld [vmem:[%s3125_s19 + $0x8] sm:$0xff] }
 0x244   : >> { %v1088_v54 = vpop.permute.xlu0 %1087 }
 0x245   : >> { %2223 = vmatmul.mubr.msk.f32.vlgmr.msra.gmra.mrb[0].mxu1 %vm829_vm2, %v1088_v54  ;;  %v1189_v54 = vld [vmem:[%s3117_s11 + $0x8] sm:$0xff] }
 0x246   : >> { %2240 = vmatprep.mubr.msk.f32.mxu1 %vm2563_vm3, %v2564_v49 }
 0x2ad   : >> { %v1077_v55 = vpop.f32.mrb[0].mxu0 }
 0x2ae   : >> { %v2213_v56 = vpop.f32.mrb[1].mxu0  ;;  %v1081_v58 = vadd.f32 %v1077_v55, %v1003_v57  ;;  %v1190_v55 = vld [vmem:[%s3117_s11 + $0x10] sm:$0xff]  ;;  %v1326_v57 = vrot.slane %v2884_v23, 1 }
 0x2af   : >> { %v1317_v56 = vsel %vm1314_vm9, %v1315_v51, %v1316_v52  ;;  %vm1382_vm9 = vcmask 89088  }
 0x318   : >> { %v1157_v59 = vpop.f32.mrb[0].mxu1 }
 0x319   : >> { %v1161_v61 = vadd.f32 %v1157_v59, %v1081_v58  ;;  %v2224_v62 = vpop.f32.mrb[1].mxu1  ;;  %v1327_v58 = vrot.slane %v2887_v24, 1  ;;  %v2326_v59 = vpack.c.bf16 %v1189_v54, %v1188_v53 }
 0x31b   : >> { %v1163_v63 = vadd.f32 %v1162_v60, %v1161_v61  ;;  %v1191_v60 = vld [vmem:[%s3117_s11 + $0x18] sm:$0xff]  ;;  %2327 = vmatpush3.bf16.msra.mxu0 %v2326_v59  ;;  %v1328_v62 = vsel %vm1280_vm5, %v1326_v57, %v1327_v58  ;;  %vm1374_vm5 = vcmask 56320  }
 0x31c   : >> { %v2329_v61 = vpack.c.bf16 %v1191_v60, %v1190_v55  ;;  %2328 = vmatprep.subr.bf16.mxu0 %v2561_v43 }
 0x31d   : >> { %2464 = vtanh.f32 %v1163_v63  ;;  %v2103_v1 = vmul.f32 -1.442695, %v1163_v63  ;;  %v1344_v63 = vrot.slane %v2884_v23, 4 }
 0x31f   : >> { %2466 = vpow2.f32 %v2103_v1  ;;  %2330 = vmatpush3.bf16.msra.mxu0 %v2329_v61 }
 0x320   : >> { %2341 = vmatprep.subr.bf16.mxu0 %v2561_v43 }
 0x327   : >> { %v2465_v0 = vpop.eup %2464 }
 0x328   : >> { %1173 = vrot.lane.b32.xlu0 %v2465_v0, %s2565_s0  ;;  %v1345_v0 = vrot.slane %v2887_v24, 4 }
 0x329   : >> { %v2467_v2 = vpop.eup %2466 }
 0x32a   : >> { %v1167_v3 = vadd.f32 1.0, %v2467_v2  ;;  %v1346_v1 = vsel %vm1301_vm8, %v1344_v63, %v1345_v0  ;;  %v1388_v2 = vld [vmem:[%s3118_s12] sm:$0xff]  ;;  %vm1380_vm8 = vcmask 80896  }
 0x32b   : >> { %v2107_v63 = vld [vmem:[%s3119_s13] ss:$0 sm:$0xff] }
 0x32c   : >> { %2468 = vrcp.f32 %v1167_v3  ;;  %1284 = vrot.lane.b32.xlu0 %v1283_v15, %s2566_s29  ;;  %v1389_v3 = vld [vmem:[%s3118_s12 + $0x8] sm:$0x3f]  ;;  %s2579_s29 = smov 13  }
 0x330   : >> { %1298 = vrot.lane.b32.xlu0 %v1297_v16, %s2567_s23 }
 0x334   : >> { %1311 = vrot.lane.b32.xlu0 %v1310_v20, %s2568_s18 }
 0x336   : >> { %v2862_v4 = vpop.eup %2468 }
 0x337   : >> { %v1171_v40 = vmul.f32 %v2548_v38, %v2862_v4 }
 0x338   : >> { %1322 = vrot.lane.b32.xlu0 %v2884_v23, %s2569_s4  ;;  %s3153_s4 = sld [smem:[#allocation10_spill]] }
 0x33c   : >> { %1335 = vrot.lane.b32.xlu0 %v1334_v27, %s2570_s17  ;;  %s1931_s17 = scalar_lea.vmem %s2736_s20, %s2556_s6  ;;  %s994_s6 = sadd.s32 1, %s2556_s6  }
 0x33d   : >> { %p991_p4 = scmp.ge.s32.totalorder %s994_s6, 12  }
 0x340   : >> { %1341 = vrot.lane.b32.xlu0 %v1340_v32, %s2571_s30  ;;  %s2575_s30 = smov 6  }
 0x344   : >> { %1353 = vrot.lane.b32.xlu0 %v1352_v39, %s2572_s25  ;;  %s2576_s25 = smov 8  }
 0x39a   : >> { %v1174_v5 = vpop.permute.xlu0 %1173 }
 0x39b   : >> { %v1176_v6 = vmul.f32 %v2862_v4, %v1174_v5  ;;  %v2332_v5 = vpack.c.bf16 %v1389_v3, %v1388_v2  ;;  %v2580_v3 = vmov 0  }
 0x39c   : >> { %2462 = vset.pattern.permute.xlu1 %v2580_v3  ;;  %2463 = vset.pattern.permute.xlu0 %v2580_v3 }
 0x39d   : >> { %1178 = vrot.lane.b32.xlu1 %v1176_v6, %s2565_s0  ;;  %2334 = vmatpush3.bf16.msk.msra.mxu1 %vm2333_vm11, %v2332_v5  ;;  %vm1386_vm11 = vcmask 105472  }
 0x39e   : >> { %2335 = vmatprep.subr.bf16.mxu1 %v2561_v43  ;;  %v1285_v11 = vpop.permute.xlu0 %1284 }
 0x39f   : >> { %v1363_v12 = vsel %vm1362_vm12, %v2868_v8, %v1285_v11 }
 0x3a2   : >> { %v1299_v14 = vpop.permute.xlu0 %1298 }
 0x3a6   : >> { %v1312_v17 = vpop.permute.xlu0 %1311 }
 0x3aa   : >> { %v1323_v20 = vpop.permute.xlu0 %1322 }
 0x3ae   : >> { %v1336_v26 = vpop.permute.xlu0 %1335 }
 0x3b2   : >> { %v1342_v29 = vpop.permute.xlu0 %1341 }
 0x3b6   : >> { %v1354_v48 = vpop.permute.xlu0 %1353 }
 0x40f   : >> { %v1179_v41 = vpop.permute.xlu1 %1178 }
 0x410   : >> { %v2901_v38 = vadd.f32 %v1179_v41, %v1171_v40  }
 0x412   : >> { %2470 = vtanh.f32 %v2901_v38 }
 0x41c   : >> { %v2471_v45 = vpop.eup %2470 }
 0x41d   : >> { %1184 = vrot.lane.b32.xlu1 %v2471_v45, %s2565_s0  ;;  %v1522_v45 = vld [vmem:[%s3120_s14 + $0x18] sm:$0xff] }
 0x421   : >> { %1291 = vrot.lane.b32.xlu1 %v1290_v46, %s2573_s26  ;;  %s2577_s26 = smov 11  }
 0x425   : >> { %1305 = vrot.lane.b32.xlu1 %v1304_v50, %s2574_s28  ;;  %v2345_v50 = vpack.c.bf16 %v1522_v45, %v1521_v44  ;;  %v1782_v44 = vld [vmem:[%s3125_s19 + $0x10] sm:$0xff]  ;;  %v1783_v45 = vld [vmem:[%s3125_s19 + $0x18] sm:$0xff] }
 0x429   : >> { %1318 = vrot.lane.b32.xlu1 %v1317_v56, %s2575_s30 }
 0x42d   : >> { %1329 = vrot.lane.b32.xlu1 %v1328_v62, %s2576_s25  ;;  %s3154_s25 = sld [smem:[#allocation11_spill]] }
 0x431   : >> { %1347 = vrot.lane.b32.xlu1 %v1346_v1, %s2577_s26 }
 0x48f   : >> { %v1185_v6 = vpop.permute.xlu1 %1184 }
 0x490   : >> { %v2945_v39 = vmul.f32 %v2862_v4, %v1185_v6  }
 0x492   : >> { %1193 = vrot.lane.b32.xlu1 %v2945_v39, %s2562_s1 }
 0x493   : >> { %v1292_v15 = vpop.permute.xlu1 %1291 }
 0x494   : >> { %v1365_v16 = vsel %vm1364_vm13, %v1363_v12, %v1292_v15  ;;  %vm1390_vm13 = vcmask 113664  }
 0x495   : >> { %v1367_v4 = vsel %vm1366_vm14, %v1365_v16, %v1299_v14  ;;  %vm1485_vm14 = vcmp.gt.f32.partialorder %v2751_v13, 0.5 }
 0x496   : >> { %1359 = vrot.lane.b32.xlu1 %v1358_v10, %s2579_s29  ;;  %s1935_s29 = scalar_lea.vmem %s2745_s5, %s2114_s27 }
 0x497   : >> { %v1306_v18 = vpop.permute.xlu1 %1305 }
 0x498   : >> { %v1369_v19 = vsel %vm1368_vm15, %v1367_v4, %v1306_v18 }
 0x499   : >> { %v1371_v23 = vsel %vm1370_vm0, %v1369_v19, %v1312_v17 }
 0x49b   : >> { %v1319_v24 = vpop.permute.xlu1 %1318 }
 0x49c   : >> { %v1373_v25 = vsel %vm1372_vm4, %v1371_v23, %v1319_v24 }
 0x49d   : >> { %v1375_v27 = vsel %vm1374_vm5, %v1373_v25, %v1323_v20 }
 0x49f   : >> { %v1330_v8 = vpop.permute.xlu1 %1329 }
 0x4a0   : >> { %v1377_v28 = vsel %vm1376_vm6, %v1375_v27, %v1330_v8  ;;  %v1523_v8 = vld [vmem:[%s3121_s15] sm:$0xff] }
 0x4a1   : >> { %v1379_v32 = vsel %vm1378_vm7, %v1377_v28, %v1336_v26  ;;  %v1524_v28 = vld [vmem:[%s3121_s15 + $0x8] sm:$0xff] }
 0x4a2   : >> { %v1381_v41 = vsel %vm1380_vm8, %v1379_v32, %v1342_v29  ;;  %v2336_v29 = vpack.c.bf16 %v1524_v28, %v1523_v8  ;;  %v1780_v32 = vld [vmem:[%s3125_s19] sm:$0xff] }
 0x4a3   : >> { %v1348_v40 = vpop.permute.xlu1 %1347 }
 0x4a4   : >> { %v1383_v47 = vsel %vm1382_vm9, %v1381_v41, %v1348_v40  ;;  %v2354_v40 = vpack.c.bf16 %v1781_v33, %v1780_v32  ;;  %v1526_v41 = vld [vmem:[%s3121_s15 + $0x18] sm:$0xff] }
 0x4a5   : >> { %v1385_v51 = vsel %vm1384_vm10, %v1383_v47, %v1354_v48 }
 0x504   : >> { %v1194_v46 = vpop.permute.xlu1 %1193 }
 0x505   : >> { %2234 = vmatmul.mubr.msk.f32.vlgmr.msra.gmra.mrb[2].mxu0 %vm829_vm2, %v1194_v46 }
 0x506   : >> { %2343 = vmatpush3.bf16.msra.mxu0 %v2342_v42  ;;  %2262 = vmatprep.mubr.msk.f32.mxu0 %vm2563_vm3, %v2564_v49 }
 0x507   : >> { %2344 = vmatprep.subr.bf16.mxu0 %v2561_v43 }
 0x508   : >> { %v1360_v52 = vpop.permute.xlu1 %1359 }
 0x509   : >> { %v1387_v53 = vsel %vm1386_vm11, %v1385_v51, %v1360_v52 }
 0x50a   : >> { %2346 = vmatpush3.bf16.msra.mxu0 %v2345_v50  ;;  %2241 = vmatmul.mubr.msk.f32.vlgmr.msra.gmra.mrb[2].mxu1 %vm1390_vm13, %v1387_v53 }
 0x50b   : >> { %2353 = vmatprep.subr.bf16.mxu0 %v2561_v43  ;;  %2251 = vmatprep.mubr.msk.f32.mxu1 %vm2563_vm3, %v2564_v49 }
 0x50c   : >> { %2337 = vmatpush3.bf16.msra.mxu1 %v2336_v29 }
 0x50d   : >> { %2263 = vmatmul.mubr.msk.f32.vlgmr.msra.gmra.mrb[4].mxu0 %vm829_vm2, %v1194_v46  ;;  %2338 = vmatprep.subr.bf16.mxu1 %v2561_v43  ;;  %v2357_v46 = vpack.c.bf16 %v1783_v45, %v1782_v44 }
 0x50e   : >> { %2284 = vmatprep.mubr.msk.f32.mxu0 %vm2563_vm3, %v2564_v49  ;;  %2355 = vmatpush3.bf16.msra.mxu0 %v2354_v40 }
 0x50f   : >> { %2356 = vmatprep.subr.bf16.mxu0 %v2561_v43 }
 0x512   : >> { %2358 = vmatpush3.bf16.msra.mxu0 %v2357_v46 }
 0x5d8   : >> { %v1263_v54 = vpop.f32.mrb[2].mxu0 }
 0x5d9   : >> { %v1470_v55 = vrot.slane %v1263_v54, %v827_v22  ;;  %v2235_v56 = vpop.f32.mrb[3].mxu0 }
 0x5da   : >> { %v1671_v56 = vld [vmem:[%s3122_s16 + $0x8] sm:$0xff] }
 0x5db   : >> { %v1471_v57 = vadd.f32 %v1470_v55, %v2777_v31  ;;  %v1670_v55 = vld [vmem:[%s3122_s16] sm:$0xff] }
 0x5dd   : >> { %v1463_v58 = vpop.f32.mrb[2].mxu1 }
 0x5de   : >> { %v1472_v59 = vadd.f32 %v1471_v57, %v1463_v58  ;;  %v2242_v60 = vpop.f32.mrb[3].mxu1  ;;  %v2348_v58 = vpack.c.bf16 %v1671_v56, %v1670_v55 }
 0x5df   : >> { %v1673_v60 = vld [vmem:[%s3122_s16 + $0x18] sm:$0xff] }
 0x5e0   : >> { %2472 = vtanh.f32 %v1472_v59  ;;  %v2977_v61 = vpop.f32.mrb[4].mxu0  ;;  %v1672_v59 = vld [vmem:[%s3122_s16 + $0x10] sm:$0xff] }
 0x5e1   : >> { %v2264_v62 = vpop.f32.mrb[5].mxu0 }
 0x5e2   : >> { %v2351_v62 = vpack.c.bf16 %v1673_v60, %v1672_v59 }
 0x5ea   : >> { %v2473_v0 = vpop.eup %2472 }
 0x5eb   : >> { %v1481_v1 = vmul.f32 %v2473_v0, %v2107_v63 }
 0x5ed   : >> { %v1482_v2 = vsel %vm751_vm1, %v1481_v1, 0.0 }
 0x5ee   : >> { %1483 = vadd.xlane.f32.xlu0 %v1482_v2 }
 0x67b   : >> { %v1484_v5 = vpop.xlane.xlu0 %1483 }
 0x67c   : >> { %v1486_v6 = vsel %vm1485_vm14, %v1484_v5, -1e+09 }
 0x67d   : >> { %v1487_v7 = vsel %vm1362_vm12, %v1486_v6, -inf }
 0x67e   : >> { %v1488_v9 = vrot.slane %v1487_v7, 4 }
 0x680   : >> { %v1489_v10 = vmax.f32 %v1487_v7, %v1488_v9  ;;  %v1750_v7 = vld [vmem:[%s3153_s4] sm:$0x1]  ;;  %s3155_s4 = sld [smem:[#allocation12_spill]] }
 0x682   : >> { %v1490_v11 = vrot.slane %v1489_v10, 2 }
 0x684   : >> { %v1491_v12 = vmax.f32 %v1489_v10, %v1490_v11 }
 0x686   : >> { %v1492_v14 = vrot.slane %v1491_v12, 1  ;;  %v1929_v32 = vld [vmem:[%s3155_s4] sm:$0x1] }
 0x688   : >> { %v1493_v15 = vmax.f32 %v1491_v12, %v1492_v14 }
 0x68a   : >> { %v1494_v16 = vsub.f32 %v1486_v6, %v1493_v15 }
 0x68c   : >> { %v1495_v17 = vmul.f32 1.442695, %v1494_v16 }
 0x68e   : >> { %2474 = vpow2.f32 %v1495_v17 }
 0x698   : >> { %v2475_v4 = vpop.eup %2474 }
 0x699   : >> { %v1497_v18 = vsel %vm1362_vm12, %v2475_v4, 0.0 }
 0x69a   : >> { %v1498_v19 = vrot.slane %v1497_v18, 4 }
 0x69c   : >> { %v1499_v20 = vadd.f32 %v1498_v19, %v1497_v18  ;;  %v1776_v19 = vld [vmem:[%s3154_s25] sm:$0xff] }
 0x69e   : >> { %v1500_v23 = vrot.slane %v1499_v20, 2 }
 0x6a0   : >> { %v1501_v24 = vadd.f32 %v1500_v23, %v1499_v20  ;;  %v1777_v20 = vld [vmem:[%s3154_s25 + $0x8] sm:$0xff]  ;;  %v1778_v23 = vld [vmem:[%s3154_s25 + $0x10] sm:$0xff] }
 0x6a2   : >> { %v1502_v25 = vrot.slane %v1501_v24, 1 }
 0x6a4   : >> { %v1503_v26 = vadd.f32 %v1502_v25, %v1501_v24  ;;  %v2360_v24 = vpack.c.bf16 %v1777_v20, %v1776_v19  ;;  %v1779_v25 = vld [vmem:[%s3154_s25 + $0x18] sm:$0xff] }
 0x6a6   : >> { %2476 = vrcp.f32 %v1503_v26  ;;  %v2363_v26 = vpack.c.bf16 %v1779_v25, %v1778_v23 }
 0x6b0   : >> { %v2477_v27 = vpop.eup %2476 }
 0x6b1   : >> { %v2988_v35 = vmul.f32 %v2477_v27, %v2475_v4  }
 0x6b3   : >> { %1508 = vperm.xlu1 %2462, %v2988_v35   ;;  %1936 = vst.msk [vmem:[%s1935_s29] sm:$0xff] %vm1362_vm12, %v2988_v35  ;;  %v2995_v34 = vadd.f32 %v2532_v34, %v2988_v35  }
 0x6b7   : >> { %1675 = vrot.lane.b32.xlu1 %v2544_v37, %s2562_s1  ;;  %v1525_v37 = vld [vmem:[%s3121_s15 + $0x10] sm:$0xff] }
 0x6b8   : >> { %v2339_v42 = vpack.c.bf16 %v1526_v41, %v1525_v37 }
 0x6ba   : >> { %2340 = vmatpush3.bf16.msra.mxu1 %v2339_v42 }
 0x6bb   : >> { %2347 = vmatprep.subr.bf16.mxu1 %v2561_v43 }
 0x732   : >> { %v1509_v47 = vpop.permute.xlu1 %1508 }
 0x733   : >> { %v1511_v48 = vmul.f32 %v1509_v47, %v2773_v30 }
 0x735   : >> { %v1512_v50 = vsel %vm829_vm2, %v1511_v48, 0.0 }
 0x736   : >> { %v1513_v51 = vrot.slane %v1512_v50, 4  ;;  %v1676_v63 = vpop.permute.xlu1 %1675 }
 0x738   : >> { %v1514_v52 = vadd.f32 %v1513_v51, %v1512_v50 }
 0x73a   : >> { %v1515_v53 = vrot.slane %v1514_v52, 2 }
 0x73c   : >> { %v1516_v54 = vadd.f32 %v1515_v53, %v1514_v52 }
 0x73e   : >> { %v1517_v57 = vrot.slane %v1516_v54, 1 }
 0x740   : >> { %v3034_v33 = vadd.f32 %v1517_v57, %v1516_v54  }
 0x742   : >> { %2252 = vmatmul.mubr.msk.f32.vlgmr.msra.gmra.mrb[4].mxu1 %vm829_vm2, %v3034_v33  ;;  %2285 = vmatmul.mubr.msk.f32.vlgmr.msra.gmra.mrb[6].mxu0 %vm829_vm2, %v3034_v33 }
 0x743   : >> { %2349 = vmatpush3.bf16.msra.mxu1 %v2348_v58  ;;  %2273 = vmatprep.mubr.msk.f32.mxu1 %vm2563_vm3, %v2564_v49 }
 0x744   : >> { %2350 = vmatprep.subr.bf16.mxu1 %v2561_v43 }
 0x747   : >> { %2352 = vmatpush3.bf16.msra.mxu1 %v2351_v62 }
 0x748   : >> { %2359 = vmatprep.subr.bf16.mxu1 %v2561_v43 }
 0x74a   : >> { %2274 = vmatmul.mubr.msk.f32.vlgmr.msra.gmra.mrb[6].mxu1 %vm829_vm2, %v1676_v63 }
 0x74b   : >> { %2295 = vmatprep.mubr.msk.f32.mxu1 %vm2563_vm3, %v2564_v49  ;;  %2361 = vmatpush3.bf16.msra.mxu1 %v2360_v24  ;;  %vm1932_vm3 = vcmask 131072  }
 0x74c   : >> { %2362 = vmatprep.subr.bf16.mxu1 %v2561_v43 }
 0x74f   : >> { %2364 = vmatpush3.bf16.msra.mxu1 %v2363_v26 }
 0x815   : >> { %v1596_v0 = vpop.f32.mrb[4].mxu1  ;;  %v1850_v1 = vpop.f32.mrb[6].mxu0 }
 0x816   : >> { %v1667_v2 = vadd.f32 %v2977_v61, %v1596_v0  ;;  %v2253_v3 = vpop.f32.mrb[5].mxu1  ;;  %v2286_v5 = vpop.f32.mrb[7].mxu0 }
 0x81d   : >> { %v1745_v6 = vpop.f32.mrb[6].mxu1 }
 0x81e   : >> { %v1749_v9 = vadd.f32 %v1745_v6, %v1667_v2  ;;  %v2275_v10 = vpop.f32.mrb[7].mxu1 }
 0x820   : >> { %v1751_v11 = vadd.f32 %v1750_v7, %v1749_v9 }
 0x822   : >> { %2478 = vtanh.f32 %v1751_v11  ;;  %v2111_v14 = vmul.f32 -1.442695, %v1751_v11 }
 0x824   : >> { %2480 = vpow2.f32 %v2111_v14 }
 0x82c   : >> { %v2479_v12 = vpop.eup %2478 }
 0x82d   : >> { %1761 = vrot.lane.b32.xlu1 %v2479_v12, %s2565_s0 }
 0x82e   : >> { %v2481_v49 = vpop.eup %2480 }
 0x82f   : >> { %v1755_v15 = vadd.f32 1.0, %v2481_v49 }
 0x831   : >> { %2482 = vrcp.f32 %v1755_v15 }
 0x83b   : >> { %v2483_v61 = vpop.eup %2482 }
 0x83c   : >> { %v1759_v4 = vmul.f32 %v2540_v36, %v2483_v61 }
 0x89f   : >> { %v1762_v16 = vpop.permute.xlu1 %1761 }
 0x8a0   : >> { %v1764_v17 = vmul.f32 %v2483_v61, %v1762_v16 }
 0x8a2   : >> { %1766 = vrot.lane.b32.xlu1 %v1764_v17, %s2565_s0 }
 0x914   : >> { %v1767_v18 = vpop.permute.xlu1 %1766 }
 0x915   : >> { %v1769_v36 = vadd.f32 %v1767_v18, %v1759_v4  }
 0x917   : >> { %2484 = vtanh.f32 %v1769_v36 }
 0x921   : >> { %v2485_v27 = vpop.eup %2484 }
 0x922   : >> { %1772 = vrot.lane.b32.xlu1 %v2485_v27, %s2565_s0 }
 0x994   : >> { %v1773_v8 = vpop.permute.xlu1 %1772 }
 0x995   : >> { %v1775_v37 = vmul.f32 %v2483_v61, %v1773_v8  }
 0x997   : >> { %1855 = vrot.lane.b32.xlu1 %v1775_v37, %s2562_s1 }
 0xa09   : >> { %v1856_v28 = vpop.permute.xlu1 %1855 }
 0xa0a   : >> { %2296 = vmatmul.mubr.msk.f32.vlgmr.msra.gmra.mrb[8].mxu1 %vm829_vm2, %v1856_v28 }
 0xadc   : > { %993 = sbr.rel (!%p991_p4) target bundleno = 464 (0x1d0), region = 165 }
 0xadd   : >> { %v1925_v29 = vpop.f32.mrb[8].mxu1 }
 0xade   : >> { %v1926_v40 = vadd.f32 %v1925_v29, %v1850_v1  ;;  %v2297_v41 = vpop.f32.mrb[9].mxu1 }
 0xae0   : >> { %v1930_v43 = vadd.f32 %v1929_v32, %v1926_v40 }
 0xae2   : >> { %1933 = vst.msk [vmem:[%s1931_s17] sm:$0x1] %vm1932_vm3, %v1930_v43 }
 0xae3 PF: > { %s3156_s1 = sld [smem:[#allocation2_spill]] }
 0xae9   : > { %s33_s3 = sadd.s32 1, %s3156_s1  }
 0xaea   : > { %p30_p5 = scmp.ge.s32.totalorder %s33_s3, 4  }
 0xaec   :  { %32 = sbr.rel (!%p30_p5) target bundleno = 11 (0xb), region = 176 }

// kernel: tacotron2_forward.11
= control target key start
LH: loop header
LB: loop body
LE: loop exit
PB: predicated region body
PF: predicated region fallthrough
CT: control target
= control target key end

     0   :  { %s3119_s25 = smov 0   ;;  %s3477_s0 = inlined_call_operand.vmem [shape: f32[2,16,12], index: 0, kind: input, shape index: {}]   ;;  %s3478_s1 = inlined_call_operand.vmem [shape: f32[5,32,16], index: 1, kind: input, shape index: {}]   ;;  %s3479_s2 = inlined_call_operand.vmem [shape: f32[32,1], index: 2, kind: input, shape index: {}]   ;;  %s3480_s3 = inlined_call_operand.vmem [shape: f32[32,1], index: 3, kind: input, shape index: {}]   ;;  %s3481_s4 = inlined_call_operand.vmem [shape: f32[32,1], index: 4, kind: input, shape index: {}]   ;;  %s3482_s5 = inlined_call_operand.vmem [shape: f32[5,32,32], index: 5, kind: input, shape index: {}]   ;;  %s3483_s6 = inlined_call_operand.vmem [shape: f32[32,1], index: 6, kind: input, shape index: {}]   ;;  %s3484_s7 = inlined_call_operand.vmem [shape: f32[32,1], index: 7, kind: input, shape index: {}]   ;;  %s3485_s8 = inlined_call_operand.vmem [shape: f32[32,1], index: 8, kind: input, shape index: {}]   ;;  %s3486_s9 = inlined_call_operand.vmem [shape: f32[5,16,32], index: 9, kind: input, shape index: {}]   ;;  %s3487_s10 = inlined_call_operand.vmem [shape: f32[16,1], index: 10, kind: input, shape index: {}]   ;;  %s3488_s11 = inlined_call_operand.vmem [shape: f32[16,1], index: 11, kind: input, shape index: {}]   ;;  %s3489_s12 = inlined_call_operand.vmem [shape: f32[16,1], index: 12, kind: input, shape index: {}]   ;;  %s3490_s13 = inlined_call_operand.vmem [shape: f32[2,16,12], index: 13, kind: output, shape index: {}]  }
   0x1 LB: > { %s2383_s26 = sadd.s32 4294967295, %s3040_s25   ;;  %p2387_p0 = scmp.ge.s32.totalorder %s3040_s25, 1  ;;  %s3040_s25 = sphi %s3119_s25, %s23_s25  }
   0x2   : > { %p387_p1 = scmp.lt.s32.totalorder %s3040_s25, 3 }
   0x4   : > { %p388_p2 = pnand %p2387_p0, %p387_p1 }
   0x5   : > { %p431_p3 = scmp.lt.s32.totalorder (!%p388_p2), %s2383_s26, 1  ;;  %vm441_vm0 = vcmask (!%p388_p2), 130048   ;;  %v3042_v0 = vmov (!%p388_p2), 0.0   ;;  %s3043_s14 = smov (!%p388_p2), 2   ;;  %vm456_vm1 = vcmask (!%p388_p2), 113680   ;;  %v2404_v5 = vld [vmem:[%s3478_s1 + $0x40] sm:$0xff] (!%p388_p2) }
   0x6   : > { %391 = sbr.rel (%p388_p2) target bundleno = 1535 (0x5ff), region = 72  ;;  %442 = vst.msk [vmem:[#allocation2] sm:$0xff] (!%p388_p2), %vm441_vm0, %v3042_v0  ;;  %443 = vst.msk [vmem:[#allocation2 + $0x8] sm:$0xff] (!%p388_p2), %vm441_vm0, %v3042_v0  ;;  %2610 = vmatprep.mubr.msk.f32.mxu0 (!%p388_p2), %vm441_vm0, %v2404_v5  ;;  %v2392_v8 = vld [vmem:[%s3478_s1 + $0x20] sm:$0xff] (!%p388_p2)  ;;  %s3044_s19 = smov (!%p388_p2), 125   ;;  %v1009_v11 = vld [vmem:[%s3479_s2 + $0x8] sm:$0xff] (!%p388_p2) }
   0x7   : > { %444 = vst.msk [vmem:[#allocation2 + $0x10] sm:$0xff] (!%p388_p2), %vm441_vm0, %v3042_v0  ;;  %445 = vst.msk [vmem:[#allocation2 + $0x18] sm:$0xff] (!%p388_p2), %vm441_vm0, %v3042_v0  ;;  %2590 = vmatprep.mubr.msk.f32.mxu1 (!%p388_p2), %vm441_vm0, %v2392_v8  ;;  %s3045_s20 = smov (!%p388_p2), 126   ;;  %s3046_s21 = smov (!%p388_p2), 127   ;;  %v1008_v10 = vld [vmem:[%s3479_s2] sm:$0xff] (!%p388_p2)  ;;  %v3048_v12 = vmov (!%p388_p2), 0  }
   0x8   : > { %s3047_s22 = smov (!%p388_p2), 124   ;;  %2937 = vset.pattern.permute.xlu1 (!%p388_p2), %v3048_v12  ;;  %2936 = vset.pattern.permute.xlu0 (!%p388_p2), %v3048_v12  ;;  %v1037_v13 = vld [vmem:[%s3480_s3 + $0x8] sm:$0xff] (!%p388_p2)  ;;  %v1036_v14 = vld [vmem:[%s3480_s3] sm:$0xff] (!%p388_p2)  ;;  %v1011_v15 = vld [vmem:[%s3479_s2 + $0x18] sm:$0xff] (!%p388_p2)  ;;  %vm1145_vm2 = vcmask (!%p388_p2), 261120   ;;  %vm2325_vm3 = vcmask (!%p388_p2), 97280  }
   0x9   : > { %v1010_v16 = vld [vmem:[%s3479_s2 + $0x10] sm:$0xff] (!%p388_p2)  ;;  %v1065_v17 = vld [vmem:[%s3481_s4 + $0x8] sm:$0xff] (!%p388_p2)  ;;  %v1064_v18 = vld [vmem:[%s3481_s4] sm:$0xff] (!%p388_p2) }
   0xa   : > { %v1039_v19 = vld [vmem:[%s3480_s3 + $0x18] sm:$0xff] (!%p388_p2)  ;;  %v1038_v20 = vld [vmem:[%s3480_s3 + $0x10] sm:$0xff] (!%p388_p2)  ;;  %v2405_v34 = vld [vmem:[%s3478_s1 + $0x48] sm:$0xff] (!%p388_p2) }
   0xb   : > { %v1067_v21 = vld [vmem:[%s3481_s4 + $0x18] sm:$0xff] (!%p388_p2)  ;;  %v1066_v22 = vld [vmem:[%s3481_s4 + $0x10] sm:$0xff] (!%p388_p2)  ;;  %v2393_v41 = vld [vmem:[%s3478_s1 + $0x28] sm:$0xff] (!%p388_p2) }
   0xc   : > { %v2406_v37 = vld [vmem:[%s3478_s1 + $0x50] sm:$0xff] (!%p388_p2)  ;;  %v2407_v42 = vld [vmem:[%s3478_s1 + $0x58] sm:$0xff] (!%p388_p2)  ;;  %v2412_v45 = vld [vmem:[%s3478_s1 + $0x60] sm:$0xff] (!%p388_p2) }
   0xd   : > { %s3494_s26 = smov (!%p431_p3, %s2383_s26), 1  ;;  %v2394_v44 = vld [vmem:[%s3478_s1 + $0x30] sm:$0xff]  ;;  %v2395_v46 = vld [vmem:[%s3478_s1 + $0x38] sm:$0xff]  ;;  %v2413_v47 = vld [vmem:[%s3478_s1 + $0x68] sm:$0xff] }
   0xe   : > { %s3491_s27 = sshll.u32 %s3494_s26, 4  ;;  %v459_v48 = vld [vmem:[%s3478_s1] sm:$0xff]  ;;  %v2414_v49 = vld [vmem:[%s3478_s1 + $0x70] sm:$0xff]  ;;  %v460_v50 = vld [vmem:[%s3478_s1 + $0x8] sm:$0xff] }
   0xf   : > { %s435_s30 = scalar_lea.vmem %s3477_s0, %s3491_s27  ;;  %v2415_v51 = vld [vmem:[%s3478_s1 + $0x78] sm:$0xff]  ;;  %v461_v52 = vld [vmem:[%s3478_s1 + $0x10] sm:$0xff]  ;;  %v2420_v53 = vld [vmem:[%s3478_s1 + $0x80] sm:$0xff] }
  0x10   : > { %v446_v1 = vld [vmem:[%s435_s30] sm:$0xff]  ;;  %v447_v2 = vld [vmem:[%s435_s30 + $0x8] sm:$0xff]  ;;  %v462_v54 = vld [vmem:[%s3478_s1 + $0x18] sm:$0xff] }
  0x11   : > { %450 = vrot.lane.b32.xlu0 %v446_v1, %s3043_s14  ;;  %v2421_v55 = vld [vmem:[%s3478_s1 + $0x88] sm:$0xff]  ;;  %v2422_v56 = vld [vmem:[%s3478_s1 + $0x90] sm:$0xff]  ;;  %v2423_v57 = vld [vmem:[%s3478_s1 + $0x98] sm:$0xff] }
  0x15   : > { %452 = vrot.lane.b32.xlu0 %v447_v2, %s3043_s14 }
  0x83   : > { %v451_v3 = vpop.permute.xlu0 %450 }
  0x84   : > { %457 = vst.msk [vmem:[#allocation2] sm:$0xff] %vm456_vm1, %v451_v3 }
  0x87   : > { %v453_v4 = vpop.permute.xlu0 %452 }
  0x88   : > { %458 = vst.msk [vmem:[#allocation2 + $0x8] sm:$0xff] %vm456_vm1, %v453_v4 }
  0x8b   : > { %v463_v6 = vld [vmem:[#allocation2] sm:$0xff] }
  0x8f   : > { %v464_v7 = vld [vmem:[#allocation2 + $0x8] sm:$0xff] }
  0x90   : > { %v2926_v9 = vpack.i.bf16 %v464_v7, %v463_v6  ;;  %v2765_v40 = vpack.c.bf16 %v464_v7, %v463_v6 }
  0x92   : > { %2927 = vrot.lane.b32.xlu0 %v2926_v9, %s3044_s19  ;;  %2917 = vrot.lane.b32.xlu1 %v2926_v9, %s3045_s20 }
  0x96   : > { %2922 = vrot.lane.b32.xlu1 %v2926_v9, %s3046_s21  ;;  %1014 = vperm.xlu0 %2936, %v1008_v10  }
  0x9a   : > { %2932 = vrot.lane.b32.xlu1 %v2926_v9, %s3047_s22  ;;  %1047 = vperm.xlu0 %2936, %v1037_v13  }
  0x9e   : > { %1019 = vperm.xlu1 %2937, %v1009_v11   ;;  %1029 = vperm.xlu0 %2936, %v1011_v15  }
  0xa2   : > { %1042 = vperm.xlu1 %2937, %v1036_v14   ;;  %1075 = vperm.xlu0 %2936, %v1065_v17  }
  0xa6   : > { %1024 = vperm.xlu1 %2937, %v1010_v16   ;;  %1057 = vperm.xlu0 %2936, %v1039_v19  }
  0xaa   : > { %1070 = vperm.xlu1 %2937, %v1064_v18   ;;  %1085 = vperm.xlu0 %2936, %v1067_v21  }
  0xae   : > { %1052 = vperm.xlu1 %2937, %v1038_v20  }
  0xb2   : > { %1080 = vperm.xlu1 %2937, %v1066_v22  }
 0x104   : > { %v2928_v23 = vpop.permute.xlu0 %2927  ;;  %v2918_v24 = vpop.permute.xlu1 %2917 }
 0x105   : > { %v2930_v25 = vunpack.i.h.bf16 %v2928_v23  ;;  %v2929_v26 = vunpack.i.l.bf16 %v2928_v23  ;;  %v2920_v27 = vunpack.i.h.bf16 %v2918_v24  ;;  %v2919_v28 = vunpack.i.l.bf16 %v2918_v24 }
 0x107   : > { %v2769_v29 = vpack.c.bf16 %v2920_v27, %v2919_v28  ;;  %v2773_v31 = vpack.c.bf16 %v2930_v25, %v2929_v26 }
 0x108   : > { %v2923_v30 = vpop.permute.xlu1 %2922 }
 0x109   : > { %v2925_v32 = vunpack.i.h.bf16 %v2923_v30  ;;  %v2924_v33 = vunpack.i.l.bf16 %v2923_v30  ;;  %2770 = vmatprep.subr.bf16.mxu0 %v2769_v29 }
 0x10a   : > { %2772 = vmatpush3.bf16.msra.mxu0 %v2769_v29 }
 0x10b   : > { %2774 = vmatprep.subr.bf16.mxu0 %v2773_v31  ;;  %v2761_v35 = vpack.c.bf16 %v2925_v32, %v2924_v33 }
 0x10c   : > { %v2933_v36 = vpop.permute.xlu1 %2932 }
 0x10d   : > { %v2935_v38 = vunpack.i.h.bf16 %v2933_v36  ;;  %v2934_v39 = vunpack.i.l.bf16 %v2933_v36  ;;  %2762 = vmatprep.subr.bf16.mxu1 %v2761_v35  ;;  %2611 = vmatmul.mubr.msk.f32.vlgmr.msra.gmra.mrb[0].mxu0 %vm441_vm0, %v2405_v34 }
 0x10e   : > { %2764 = vmatpush3.bf16.msra.mxu1 %v2761_v35  ;;  %2776 = vmatpush3.bf16.msra.mxu0 %v2773_v31 }
 0x10f   : > { %v2777_v43 = vpack.c.bf16 %v2935_v38, %v2934_v39  ;;  %2766 = vmatprep.subr.bf16.mxu1 %v2765_v40  ;;  %2613 = vmatprep.mubr.msk.f32.mxu0 %vm441_vm0, %v2406_v37 }
 0x111   : > { %2591 = vmatmul.mubr.msk.f32.vlgmr.msra.gmra.mrb[0].mxu1 %vm441_vm0, %v2393_v41  ;;  %2614 = vmatmul.mubr.msk.f32.gmra.mrb[2].mxu0 %vm441_vm0, %v2407_v42 }
 0x112   : > { %2778 = vmatprep.subr.bf16.mxu0 %v2777_v43  ;;  %2768 = vmatpush3.bf16.msra.mxu1 %v2765_v40  ;;  %v2428_v40 = vld [vmem:[%s3482_s5 + $0x20] sm:$0xff] }
 0x113   : > { %2593 = vmatprep.mubr.msk.f32.mxu1 %vm441_vm0, %v2394_v44  ;;  %2620 = vmatprep.mubr.msk.f32.mxu0 %vm441_vm0, %v2412_v45  ;;  %v1694_v45 = vld [vmem:[%s3483_s6] sm:$0xff] }
 0x115   : > { %2594 = vmatmul.mubr.msk.f32.gmra.mrb[2].mxu1 %vm441_vm0, %v2395_v46  ;;  %2621 = vmatmul.mubr.msk.f32.vlgmr.msra.gmra.mrb[0].mxu0 %vm441_vm0, %v2413_v47  ;;  %v1015_v58 = vpop.permute.xlu0 %1014  ;;  %v1722_v46 = vld [vmem:[%s3484_s7] sm:$0xff]  ;;  %v1695_v47 = vld [vmem:[%s3483_s6 + $0x8] sm:$0xff] }
 0x116   : > { %2780 = vmatpush3.bf16.msra.mxu0 %v2777_v43  ;;  %2600 = vmatprep.mubr.msk.f32.mxu1 %vm441_vm0, %v459_v48  ;;  %v1696_v48 = vld [vmem:[%s3483_s6 + $0x10] sm:$0xff] }
 0x117   : > { %2623 = vmatprep.mubr.msk.f32.mxu0 %vm441_vm0, %v2414_v49  ;;  %v1723_v49 = vld [vmem:[%s3484_s7 + $0x8] sm:$0xff] }
 0x119   : > { %2601 = vmatmul.mubr.msk.f32.vlgmr.msra.gmra.mrb[0].mxu1 %vm441_vm0, %v460_v50  ;;  %2624 = vmatmul.mubr.msk.f32.gmra.mrb[2].mxu0 %vm441_vm0, %v2415_v51  ;;  %v1048_v60 = vpop.permute.xlu0 %1047  ;;  %v1750_v50 = vld [vmem:[%s3485_s8] sm:$0xff]  ;;  %v1697_v51 = vld [vmem:[%s3483_s6 + $0x18] sm:$0xff] }
 0x11a   : > { %2603 = vmatprep.mubr.msk.f32.mxu1 %vm441_vm0, %v461_v52  ;;  %2630 = vmatprep.mubr.msk.f32.mxu0 %vm441_vm0, %v2420_v53  ;;  %v1724_v52 = vld [vmem:[%s3484_s7 + $0x10] sm:$0xff]  ;;  %v1751_v53 = vld [vmem:[%s3485_s8 + $0x8] sm:$0xff] }
 0x11d   : > { %2604 = vmatmul.mubr.msk.f32.gmra.mrb[2].mxu1 %vm441_vm0, %v462_v54  ;;  %2631 = vmatmul.mubr.msk.f32.vlgmr.msra.gmra.mrb[0].mxu0 %vm441_vm0, %v2421_v55  ;;  %v1020_v59 = vpop.permute.xlu1 %1019  ;;  %v1030_v62 = vpop.permute.xlu0 %1029  ;;  %v1752_v54 = vld [vmem:[%s3485_s8 + $0x10] sm:$0xff]  ;;  %v1725_v55 = vld [vmem:[%s3484_s7 + $0x18] sm:$0xff] }
 0x11e   : > { %2633 = vmatprep.mubr.msk.f32.mxu0 %vm441_vm0, %v2422_v56  ;;  %2644 = vmatprep.mubr.msk.f32.mxu1 %vm1145_vm2, %v2428_v40  ;;  %v1753_v56 = vld [vmem:[%s3485_s8 + $0x18] sm:$0xff] }
 0x121   : > { %2634 = vmatmul.mubr.msk.f32.gmra.mrb[2].mxu0 %vm441_vm0, %v2423_v57  ;;  %v1043_v61 = vpop.permute.xlu1 %1042  ;;  %v1076_v2 = vpop.permute.xlu0 %1075 }
 0x125   : > { %v1025_v63 = vpop.permute.xlu1 %1024  ;;  %v1058_v11 = vpop.permute.xlu0 %1057 }
 0x129   : > { %v1071_v3 = vpop.permute.xlu1 %1070  ;;  %v1086_v25 = vpop.permute.xlu0 %1085 }
 0x12d   : > { %v1053_v14 = vpop.permute.xlu1 %1052 }
 0x131   : > { %v1081_v27 = vpop.permute.xlu1 %1080 }
 0x1ec   : > { %v2602_v0 = vpop.f32.mrb[0].mxu1 }
 0x1ed   : > { %v653_v1 = vpop.f32.mrb[1].mxu1 }
 0x1f0   : > { %v2605_v4 = vpop.f32.mrb[2].mxu1  ;;  %v2632_v5 = vpop.f32.mrb[0].mxu0 }
 0x1f1   : > { %v2861_v6 = vadd.f32 %v2632_v5, %v2602_v0  ;;  %v663_v7 = vpop.f32.mrb[3].mxu1  ;;  %v985_v8 = vpop.f32.mrb[1].mxu0 }
 0x1f2   : > { %v2862_v9 = vadd.f32 %v985_v8, %v653_v1 }
 0x1f3   : > { %v1033_v10 = vadd.f32 %v2861_v6, %v1020_v59 }
 0x1f4   : > { %v1032_v12 = vadd.f32 %v2862_v9, %v1015_v58  ;;  %v2635_v13 = vpop.f32.mrb[2].mxu0  ;;  %v2431_v9 = vld [vmem:[%s3482_s5 + $0x38] sm:$0xff] }
 0x1f5   : > { %v1061_v15 = vmul.f32 %v1048_v60, %v1033_v10  ;;  %v2863_v16 = vadd.f32 %v2635_v13, %v2605_v4  ;;  %v995_v17 = vpop.f32.mrb[3].mxu0  ;;  %v2430_v4 = vld [vmem:[%s3482_s5 + $0x30] sm:$0xff]  ;;  %v1116_v10 = vld [vmem:[%s3482_s5] sm:$0xff] }
 0x1f6   : > { %v1060_v18 = vmul.f32 %v1043_v61, %v1032_v12  ;;  %v2864_v19 = vadd.f32 %v995_v17, %v663_v7 }
 0x1f7   : > { %v1089_v20 = vadd.f32 %v1076_v2, %v1061_v15  ;;  %v1035_v21 = vadd.f32 %v2863_v16, %v1030_v62  ;;  %v1117_v15 = vld [vmem:[%s3482_s5 + $0x8] sm:$0xff]  ;;  %v1118_v16 = vld [vmem:[%s3482_s5 + $0x10] sm:$0xff] }
 0x1f8   : > { %v1088_v22 = vadd.f32 %v1071_v3, %v1060_v18  ;;  %v1034_v23 = vadd.f32 %v2864_v19, %v1025_v63  ;;  %v2429_v3 = vld [vmem:[%s3482_s5 + $0x28] sm:$0xff] }
 0x1f9   : > { %3018 = vtanh.f32 %v1089_v20  ;;  %v1063_v24 = vmul.f32 %v1058_v11, %v1035_v21  ;;  %v1119_v21 = vld [vmem:[%s3482_s5 + $0x18] sm:$0xff] }
 0x1fa   : > { %3020 = vtanh.f32 %v1088_v22  ;;  %v1062_v26 = vmul.f32 %v1053_v14, %v1034_v23  ;;  %v2440_v22 = vld [vmem:[%s3482_s5 + $0x40] sm:$0xff] }
 0x1fb   : > { %v1091_v28 = vadd.f32 %v1086_v25, %v1063_v24 }
 0x1fc   : > { %v1090_v29 = vadd.f32 %v1081_v27, %v1062_v26  ;;  %v2441_v27 = vld [vmem:[%s3482_s5 + $0x48] sm:$0xff] }
 0x1fd   : > { %3022 = vtanh.f32 %v1091_v28  ;;  %v2442_v28 = vld [vmem:[%s3482_s5 + $0x50] sm:$0xff] }
 0x1fe   : > { %3024 = vtanh.f32 %v1090_v29 }
 0x203   : > { %v3019_v30 = vpop.eup %3018 }
 0x204   : > { %v3021_v31 = vpop.eup %3020  ;;  %1102 = vrot.lane.b32.xlu0 %v3019_v30, %s3043_s14 }
 0x205   : > { %1100 = vrot.lane.b32.xlu1 %v3021_v31, %s3043_s14 }
 0x207   : > { %v3023_v32 = vpop.eup %3022 }
 0x208   : > { %v3025_v33 = vpop.eup %3024  ;;  %1106 = vrot.lane.b32.xlu0 %v3023_v32, %s3043_s14 }
 0x209   : > { %1104 = vrot.lane.b32.xlu1 %v3025_v33, %s3043_s14  ;;  %v2443_v33 = vld [vmem:[%s3482_s5 + $0x58] sm:$0xff] }
 0x276   : > { %v1103_v34 = vpop.permute.xlu0 %1102 }
 0x277   : > { %1113 = vst.msk [vmem:[#allocation2 + $0x8] sm:$0xff] %vm456_vm1, %v1103_v34  ;;  %v1101_v35 = vpop.permute.xlu1 %1100  ;;  %v2448_v34 = vld [vmem:[%s3482_s5 + $0x60] sm:$0xff] }
 0x278   : > { %1112 = vst.msk [vmem:[#allocation2] sm:$0xff] %vm456_vm1, %v1101_v35 }
 0x27a   : > { %v1107_v36 = vpop.permute.xlu0 %1106 }
 0x27b   : > { %1115 = vst.msk [vmem:[#allocation2 + $0x18] sm:$0xff] %vm456_vm1, %v1107_v36  ;;  %v1105_v37 = vpop.permute.xlu1 %1104 }
 0x27c   : > { %1114 = vst.msk [vmem:[#allocation2 + $0x10] sm:$0xff] %vm456_vm1, %v1105_v37 }
 0x27e   : > { %v1121_v38 = vld [vmem:[#allocation2 + $0x8] sm:$0xff] }
 0x27f   : > { %v1120_v39 = vld [vmem:[#allocation2] sm:$0xff] }
 0x280   : > { %v2938_v41 = vpack.i.bf16 %v1121_v38, %v1120_v39  ;;  %v2789_v1 = vpack.c.bf16 %v1121_v38, %v1120_v39  ;;  %v2449_v38 = vld [vmem:[%s3482_s5 + $0x68] sm:$0xff]  ;;  %v2450_v39 = vld [vmem:[%s3482_s5 + $0x70] sm:$0xff] }
 0x282   : > { %2939 = vrot.lane.b32.xlu1 %v2938_v41, %s3046_s21  ;;  %v1123_v42 = vld [vmem:[#allocation2 + $0x18] sm:$0xff] }
 0x283   : > { %v1122_v43 = vld [vmem:[#allocation2 + $0x10] sm:$0xff] }
 0x284   : > { %v2943_v44 = vpack.i.bf16 %v1123_v42, %v1122_v43  ;;  %v2793_v7 = vpack.c.bf16 %v1123_v42, %v1122_v43  ;;  %v2456_v42 = vld [vmem:[%s3482_s5 + $0x80] sm:$0xff]  ;;  %v2457_v43 = vld [vmem:[%s3482_s5 + $0x88] sm:$0xff] }
 0x286   : > { %2949 = vrot.lane.b32.xlu1 %v2938_v41, %s3045_s20  ;;  %2944 = vrot.lane.b32.xlu0 %v2943_v44, %s3046_s21 }
 0x28a   : > { %2959 = vrot.lane.b32.xlu1 %v2938_v41, %s3044_s19  ;;  %2954 = vrot.lane.b32.xlu0 %v2943_v44, %s3045_s20 }
 0x28e   : > { %2969 = vrot.lane.b32.xlu1 %v2938_v41, %s3047_s22  ;;  %2964 = vrot.lane.b32.xlu0 %v2943_v44, %s3044_s19  ;;  %v2451_v41 = vld [vmem:[%s3482_s5 + $0x78] sm:$0xff] }
 0x292   : > { %1700 = vperm.xlu1 %2937, %v1694_v45   ;;  %2974 = vrot.lane.b32.xlu0 %v2943_v44, %s3047_s22  ;;  %v2458_v44 = vld [vmem:[%s3482_s5 + $0x90] sm:$0xff]  ;;  %v2459_v45 = vld [vmem:[%s3482_s5 + $0x98] sm:$0xff] }
 0x296   : > { %1728 = vperm.xlu1 %2937, %v1722_v46   ;;  %1705 = vperm.xlu0 %2936, %v1695_v47  }
 0x29a   : > { %1710 = vperm.xlu1 %2937, %v1696_v48   ;;  %1733 = vperm.xlu0 %2936, %v1723_v49  }
 0x29e   : > { %1756 = vperm.xlu1 %2937, %v1750_v50   ;;  %1715 = vperm.xlu0 %2936, %v1697_v51  }
 0x2a2   : > { %1738 = vperm.xlu1 %2937, %v1724_v52   ;;  %1761 = vperm.xlu0 %2936, %v1751_v53  }
 0x2a6   : > { %1766 = vperm.xlu1 %2937, %v1752_v54   ;;  %1743 = vperm.xlu0 %2936, %v1725_v55  }
 0x2aa   : > { %1771 = vperm.xlu0 %2936, %v1753_v56  }
 0x2f4   : > { %v2940_v57 = vpop.permute.xlu1 %2939 }
 0x2f5   : > { %v2942_v58 = vunpack.i.h.bf16 %v2940_v57  ;;  %v2941_v59 = vunpack.i.l.bf16 %v2940_v57 }
 0x2f7   : > { %v2781_v60 = vpack.c.bf16 %v2942_v58, %v2941_v59 }
 0x2f8   : > { %v2945_v61 = vpop.permute.xlu0 %2944  ;;  %v2950_v2 = vpop.permute.xlu1 %2949 }
 0x2f9   : > { %v2947_v62 = vunpack.i.h.bf16 %v2945_v61  ;;  %v2946_v63 = vunpack.i.l.bf16 %v2945_v61  ;;  %2782 = vmatprep.subr.bf16.mxu1 %v2781_v60  ;;  %v2952_v5 = vunpack.i.h.bf16 %v2950_v2  ;;  %v2951_v6 = vunpack.i.l.bf16 %v2950_v2 }
 0x2fa   : > { %2784 = vmatpush3.bf16.msra.mxu1 %v2781_v60 }
 0x2fb   : > { %v2785_v0 = vpack.c.bf16 %v2947_v62, %v2946_v63  ;;  %v2797_v11 = vpack.c.bf16 %v2952_v5, %v2951_v6 }
 0x2fc   : > { %v2955_v8 = vpop.permute.xlu0 %2954  ;;  %v2960_v14 = vpop.permute.xlu1 %2959 }
 0x2fd   : > { %2786 = vmatprep.subr.bf16.mxu1 %v2785_v0  ;;  %v2957_v12 = vunpack.i.h.bf16 %v2955_v8  ;;  %v2956_v13 = vunpack.i.l.bf16 %v2955_v8  ;;  %v2962_v18 = vunpack.i.h.bf16 %v2960_v14  ;;  %v2961_v19 = vunpack.i.l.bf16 %v2960_v14 }
 0x2fe   : > { %2788 = vmatpush3.bf16.msra.mxu1 %v2785_v0 }
 0x2ff   : > { %2790 = vmatprep.subr.bf16.mxu1 %v2789_v1  ;;  %v2801_v17 = vpack.c.bf16 %v2957_v12, %v2956_v13  ;;  %v2805_v23 = vpack.c.bf16 %v2962_v18, %v2961_v19 }
 0x300   : > { %v2965_v20 = vpop.permute.xlu0 %2964  ;;  %v2970_v26 = vpop.permute.xlu1 %2969 }
 0x301   : > { %2645 = vmatmul.mubr.msk.f32.vlgmr.msra.gmra.mrb[4].mxu1 %vm1145_vm2, %v2429_v3  ;;  %v2967_v24 = vunpack.i.h.bf16 %v2965_v20  ;;  %v2966_v25 = vunpack.i.l.bf16 %v2965_v20  ;;  %v2972_v30 = vunpack.i.h.bf16 %v2970_v26  ;;  %v2971_v31 = vunpack.i.l.bf16 %v2970_v26  ;;  %v2464_v20 = vld [vmem:[%s3486_s9 + $0x10] sm:$0xff] }
 0x302   : > { %2792 = vmatpush3.bf16.msra.mxu1 %v2789_v1  ;;  %2647 = vmatprep.mubr.msk.f32.mxu1 %vm1145_vm2, %v2430_v4 }
 0x303   : > { %2794 = vmatprep.subr.bf16.mxu1 %v2793_v7  ;;  %v2809_v29 = vpack.c.bf16 %v2967_v24, %v2966_v25  ;;  %v2813_v35 = vpack.c.bf16 %v2972_v30, %v2971_v31  ;;  %2714 = vmatprep.mubr.msk.f32.mxu0 %vm1145_vm2, %v2464_v20  ;;  %v2311_v30 = vld [vmem:[%s3489_s12] sm:$0xff]  ;;  %v2298_v31 = vld [vmem:[%s3488_s11 + $0x8] sm:$0xff] }
 0x304   : > { %v2975_v32 = vpop.permute.xlu0 %2974 }
 0x305   : > { %2648 = vmatmul.mubr.msk.f32.gmra.mrb[6].mxu1 %vm1145_vm2, %v2431_v9  ;;  %v2977_v36 = vunpack.i.h.bf16 %v2975_v32  ;;  %v2976_v37 = vunpack.i.l.bf16 %v2975_v32  ;;  %v2312_v32 = vld [vmem:[%s3489_s12 + $0x8] sm:$0xff] }
 0x306   : > { %2796 = vmatpush3.bf16.msra.mxu1 %v2793_v7  ;;  %2658 = vmatprep.mubr.msk.f32.mxu1 %vm1145_vm2, %v1116_v10 }
 0x307   : > { %2798 = vmatprep.subr.bf16.mxu1 %v2797_v11  ;;  %v2817_v40 = vpack.c.bf16 %v2977_v36, %v2976_v37 }
 0x309   : > { %2659 = vmatmul.mubr.msk.f32.vlgmr.msra.gmra.mrb[4].mxu1 %vm1145_vm2, %v1117_v15 }
 0x30a   : > { %2800 = vmatpush3.bf16.msra.mxu1 %v2797_v11  ;;  %2661 = vmatprep.mubr.msk.f32.mxu1 %vm1145_vm2, %v1118_v16 }
 0x30b   : > { %2802 = vmatprep.subr.bf16.mxu1 %v2801_v17 }
 0x30d   : > { %2662 = vmatmul.mubr.msk.f32.gmra.mrb[6].mxu1 %vm1145_vm2, %v1119_v21 }
 0x30e   : > { %2804 = vmatpush3.bf16.msra.mxu1 %v2801_v17  ;;  %2672 = vmatprep.mubr.msk.f32.mxu1 %vm1145_vm2, %v2440_v22 }
 0x30f   : > { %2806 = vmatprep.subr.bf16.mxu1 %v2805_v23 }
 0x311   : > { %2673 = vmatmul.mubr.msk.f32.vlgmr.msra.gmra.mrb[4].mxu1 %vm1145_vm2, %v2441_v27  ;;  %v1701_v47 = vpop.permute.xlu1 %1700  ;;  %v2283_v27 = vld [vmem:[%s3487_s10] sm:$0xff] }
 0x312   : > { %2808 = vmatpush3.bf16.msra.mxu1 %v2805_v23  ;;  %2675 = vmatprep.mubr.msk.f32.mxu1 %vm1145_vm2, %v2442_v28  ;;  %v2297_v28 = vld [vmem:[%s3488_s11] sm:$0xff] }
 0x313   : > { %2810 = vmatprep.subr.bf16.mxu1 %v2809_v29 }
 0x315   : > { %2676 = vmatmul.mubr.msk.f32.gmra.mrb[6].mxu1 %vm1145_vm2, %v2443_v33  ;;  %v1706_v46 = vpop.permute.xlu0 %1705  ;;  %v1729_v49 = vpop.permute.xlu1 %1728 }
 0x316   : > { %2812 = vmatpush3.bf16.msra.mxu1 %v2809_v29  ;;  %2686 = vmatprep.mubr.msk.f32.mxu1 %vm1145_vm2, %v2448_v34  ;;  %v2284_v29 = vld [vmem:[%s3487_s10 + $0x8] sm:$0xff] }
 0x317   : > { %2814 = vmatprep.subr.bf16.mxu1 %v2813_v35 }
 0x319   : > { %2687 = vmatmul.mubr.msk.f32.vlgmr.msra.gmra.mrb[4].mxu1 %vm1145_vm2, %v2449_v38  ;;  %v1734_v48 = vpop.permute.xlu0 %1733  ;;  %v1711_v51 = vpop.permute.xlu1 %1710 }
 0x31a   : > { %2816 = vmatpush3.bf16.msra.mxu1 %v2813_v35  ;;  %2689 = vmatprep.mubr.msk.f32.mxu1 %vm1145_vm2, %v2450_v39 }
 0x31b   : > { %2818 = vmatprep.subr.bf16.mxu1 %v2817_v40 }
 0x31d   : > { %2690 = vmatmul.mubr.msk.f32.gmra.mrb[6].mxu1 %vm1145_vm2, %v2451_v41  ;;  %v1716_v50 = vpop.permute.xlu0 %1715  ;;  %v1757_v53 = vpop.permute.xlu1 %1756 }
 0x31e   : > { %2820 = vmatpush3.bf16.msra.mxu1 %v2817_v40  ;;  %2700 = vmatprep.mubr.msk.f32.mxu1 %vm1145_vm2, %v2456_v42  ;;  %v2465_v42 = vld [vmem:[%s3486_s9 + $0x18] sm:$0xff] }
 0x321   : > { %2701 = vmatmul.mubr.msk.f32.vlgmr.msra.gmra.mrb[4].mxu1 %vm1145_vm2, %v2457_v43  ;;  %v1762_v52 = vpop.permute.xlu0 %1761  ;;  %v1739_v59 = vpop.permute.xlu1 %1738  ;;  %v1802_v43 = vld [vmem:[%s3486_s9] sm:$0xff] }
 0x322   : > { %2703 = vmatprep.mubr.msk.f32.mxu1 %vm1145_vm2, %v2458_v44 }
 0x325   : > { %2704 = vmatmul.mubr.msk.f32.gmra.mrb[6].mxu1 %vm1145_vm2, %v2459_v45  ;;  %v1744_v57 = vpop.permute.xlu0 %1743  ;;  %v1767_v7 = vpop.permute.xlu1 %1766 }
 0x329   : > { %v1772_v5 = vpop.permute.xlu0 %1771 }
 0x3f4   : > { %v2702_v54 = vpop.f32.mrb[4].mxu1 }
 0x3f5   : > { %v1719_v55 = vadd.f32 %v2702_v54, %v1706_v46  ;;  %v1671_v56 = vpop.f32.mrb[5].mxu1 }
 0x3f6   : > { %v1718_v58 = vadd.f32 %v1701_v47, %v1671_v56 }
 0x3f7   : > { %v1747_v60 = vmul.f32 %v1734_v48, %v1719_v55 }
 0x3f8   : > { %v1746_v61 = vmul.f32 %v1729_v49, %v1718_v58  ;;  %v2705_v62 = vpop.f32.mrb[6].mxu1 }
 0x3f9   : > { %v1775_v63 = vadd.f32 %v1762_v52, %v1747_v60  ;;  %v1721_v0 = vadd.f32 %v2705_v62, %v1716_v50  ;;  %v1681_v1 = vpop.f32.mrb[7].mxu1  ;;  %v2470_v52 = vld [vmem:[%s3486_s9 + $0x20] sm:$0xff]  ;;  %v2474_v62 = vld [vmem:[%s3486_s9 + $0x30] sm:$0xff] }
 0x3fa   : > { %v1774_v2 = vadd.f32 %v1757_v53, %v1746_v61  ;;  %v1720_v3 = vadd.f32 %v1711_v51, %v1681_v1  ;;  %v1803_v51 = vld [vmem:[%s3486_s9 + $0x8] sm:$0xff] }
 0x3fb   : > { %3026 = vtanh.f32 %v1775_v63  ;;  %v1749_v4 = vmul.f32 %v1744_v57, %v1721_v0  ;;  %v2471_v61 = vld [vmem:[%s3486_s9 + $0x28] sm:$0xff] }
 0x3fc   : > { %3028 = vtanh.f32 %v1774_v2  ;;  %v1748_v6 = vmul.f32 %v1739_v59, %v1720_v3 }
 0x3fd   : > { %v1777_v8 = vadd.f32 %v1772_v5, %v1749_v4 }
 0x3fe   : > { %v1776_v9 = vadd.f32 %v1767_v7, %v1748_v6  ;;  %v2475_v6 = vld [vmem:[%s3486_s9 + $0x38] sm:$0xff]  ;;  %v2478_v7 = vld [vmem:[%s3486_s9 + $0x40] sm:$0xff] }
 0x3ff   : > { %3030 = vtanh.f32 %v1777_v8 }
 0x400   : > { %3032 = vtanh.f32 %v1776_v9  ;;  %v2479_v9 = vld [vmem:[%s3486_s9 + $0x48] sm:$0xff] }
 0x405   : > { %v3027_v10 = vpop.eup %3026 }
 0x406   : > { %v3029_v11 = vpop.eup %3028  ;;  %1788 = vrot.lane.b32.xlu0 %v3027_v10, %s3043_s14 }
 0x407   : > { %1786 = vrot.lane.b32.xlu1 %v3029_v11, %s3043_s14 }
 0x409   : > { %v3031_v12 = vpop.eup %3030 }
 0x40a   : > { %v3033_v13 = vpop.eup %3032  ;;  %1792 = vrot.lane.b32.xlu0 %v3031_v12, %s3043_s14 }
 0x40b   : > { %1790 = vrot.lane.b32.xlu1 %v3033_v13, %s3043_s14  ;;  %s3492_s14 = sshll.u32 %s3494_s26, 4 }
 0x40c   : > { %s440_s18 = scalar_lea.vmem %s3490_s13, %s3492_s14 }
 0x478   : > { %v1789_v14 = vpop.permute.xlu0 %1788 }
 0x479   : > { %1799 = vst.msk [vmem:[#allocation2 + $0x8] sm:$0xff] %vm456_vm1, %v1789_v14  ;;  %v1787_v15 = vpop.permute.xlu1 %1786 }
 0x47a   : > { %1798 = vst.msk [vmem:[#allocation2] sm:$0xff] %vm456_vm1, %v1787_v15 }
 0x47c   : > { %v1793_v16 = vpop.permute.xlu0 %1792 }
 0x47d   : > { %1801 = vst.msk [vmem:[#allocation2 + $0x18] sm:$0xff] %vm456_vm1, %v1793_v16  ;;  %v1791_v17 = vpop.permute.xlu1 %1790 }
 0x47e   : > { %1800 = vst.msk [vmem:[#allocation2 + $0x10] sm:$0xff] %vm456_vm1, %v1791_v17 }
 0x480   : > { %v1805_v18 = vld [vmem:[#allocation2 + $0x8] sm:$0xff] }
 0x481   : > { %v1804_v19 = vld [vmem:[#allocation2] sm:$0xff] }
 0x482   : > { %v2978_v21 = vpack.i.bf16 %v1805_v18, %v1804_v19  ;;  %v2829_v22 = vpack.c.bf16 %v1805_v18, %v1804_v19 }
 0x484   : > { %2979 = vrot.lane.b32.xlu1 %v2978_v21, %s3046_s21  ;;  %v1807_v23 = vld [vmem:[#allocation2 + $0x18] sm:$0xff] }
 0x485   : > { %v1806_v24 = vld [vmem:[#allocation2 + $0x10] sm:$0xff] }
 0x486   : > { %v2983_v25 = vpack.i.bf16 %v1807_v23, %v1806_v24  ;;  %v2833_v26 = vpack.c.bf16 %v1807_v23, %v1806_v24 }
 0x488   : > { %2989 = vrot.lane.b32.xlu1 %v2978_v21, %s3045_s20  ;;  %2984 = vrot.lane.b32.xlu0 %v2983_v25, %s3046_s21 }
 0x48c   : > { %2999 = vrot.lane.b32.xlu1 %v2978_v21, %s3044_s19  ;;  %2994 = vrot.lane.b32.xlu0 %v2983_v25, %s3045_s20 }
 0x490   : > { %3009 = vrot.lane.b32.xlu1 %v2978_v21, %s3047_s22  ;;  %3004 = vrot.lane.b32.xlu0 %v2983_v25, %s3044_s19 }
 0x494   : > { %2287 = vperm.xlu1 %2937, %v2283_v27   ;;  %3014 = vrot.lane.b32.xlu0 %v2983_v25, %s3047_s22 }
 0x498   : > { %2301 = vperm.xlu1 %2937, %v2297_v28   ;;  %2292 = vperm.xlu0 %2936, %v2284_v29  }
 0x49c   : > { %2315 = vperm.xlu1 %2937, %v2311_v30   ;;  %2306 = vperm.xlu0 %2936, %v2298_v31  }
 0x4a0   : > { %2320 = vperm.xlu0 %2936, %v2312_v32  }
 0x4f6   : > { %v2980_v33 = vpop.permute.xlu1 %2979 }
 0x4f7   : > { %v2982_v34 = vunpack.i.h.bf16 %v2980_v33  ;;  %v2981_v35 = vunpack.i.l.bf16 %v2980_v33 }
 0x4f9   : > { %v2821_v36 = vpack.c.bf16 %v2982_v34, %v2981_v35 }
 0x4fa   : > { %v2985_v37 = vpop.permute.xlu0 %2984  ;;  %v2990_v41 = vpop.permute.xlu1 %2989 }
 0x4fb   : > { %v2987_v38 = vunpack.i.h.bf16 %v2985_v37  ;;  %v2986_v39 = vunpack.i.l.bf16 %v2985_v37  ;;  %2822 = vmatprep.subr.bf16.mxu0 %v2821_v36  ;;  %v2992_v44 = vunpack.i.h.bf16 %v2990_v41  ;;  %v2991_v45 = vunpack.i.l.bf16 %v2990_v41 }
 0x4fc   : > { %2824 = vmatpush3.bf16.msra.mxu0 %v2821_v36 }
 0x4fd   : > { %v2825_v40 = vpack.c.bf16 %v2987_v38, %v2986_v39  ;;  %v2837_v47 = vpack.c.bf16 %v2992_v44, %v2991_v45 }
 0x4fe   : > { %v2995_v46 = vpop.permute.xlu0 %2994  ;;  %v3000_v50 = vpop.permute.xlu1 %2999 }
 0x4ff   : > { %2826 = vmatprep.subr.bf16.mxu0 %v2825_v40  ;;  %v2997_v48 = vunpack.i.h.bf16 %v2995_v46  ;;  %v2996_v49 = vunpack.i.l.bf16 %v2995_v46  ;;  %v3002_v54 = vunpack.i.h.bf16 %v3000_v50  ;;  %v3001_v55 = vunpack.i.l.bf16 %v3000_v50 }
 0x500   : > { %2828 = vmatpush3.bf16.msra.mxu0 %v2825_v40 }
 0x501   : > { %2830 = vmatprep.subr.bf16.mxu0 %v2829_v22  ;;  %v2841_v53 = vpack.c.bf16 %v2997_v48, %v2996_v49  ;;  %v2845_v57 = vpack.c.bf16 %v3002_v54, %v3001_v55 }
 0x502   : > { %v3005_v56 = vpop.permute.xlu0 %3004  ;;  %v3010_v60 = vpop.permute.xlu1 %3009 }
 0x503   : > { %2715 = vmatmul.mubr.msk.f32.vlgmr.msra.gmra.mrb[4].mxu0 %vm1145_vm2, %v2465_v42  ;;  %v3007_v58 = vunpack.i.h.bf16 %v3005_v56  ;;  %v3006_v59 = vunpack.i.l.bf16 %v3005_v56  ;;  %v3012_v0 = vunpack.i.h.bf16 %v3010_v60  ;;  %v3011_v1 = vunpack.i.l.bf16 %v3010_v60 }
 0x504   : > { %2832 = vmatpush3.bf16.msra.mxu0 %v2829_v22  ;;  %2725 = vmatprep.mubr.msk.f32.mxu0 %vm1145_vm2, %v1802_v43 }
 0x505   : > { %2834 = vmatprep.subr.bf16.mxu0 %v2833_v26  ;;  %v2849_v63 = vpack.c.bf16 %v3007_v58, %v3006_v59  ;;  %v2853_v3 = vpack.c.bf16 %v3012_v0, %v3011_v1 }
 0x506   : > { %v3015_v2 = vpop.permute.xlu0 %3014 }
 0x507   : > { %v3017_v4 = vunpack.i.h.bf16 %v3015_v2  ;;  %v3016_v5 = vunpack.i.l.bf16 %v3015_v2 }
 0x508   : > { %2836 = vmatpush3.bf16.msra.mxu0 %v2833_v26 }
 0x509   : > { %2838 = vmatprep.subr.bf16.mxu0 %v2837_v47  ;;  %v2857_v8 = vpack.c.bf16 %v3017_v4, %v3016_v5 }
 0x50b   : > { %2726 = vmatmul.mubr.msk.f32.vlgmr.msra.gmra.mrb[4].mxu0 %vm1145_vm2, %v1803_v51 }
 0x50c   : > { %2840 = vmatpush3.bf16.msra.mxu0 %v2837_v47  ;;  %2736 = vmatprep.mubr.msk.f32.mxu0 %vm1145_vm2, %v2470_v52 }
 0x50d   : > { %2842 = vmatprep.subr.bf16.mxu0 %v2841_v53 }
 0x510   : > { %2844 = vmatpush3.bf16.msra.mxu0 %v2841_v53 }
 0x511   : > { %2846 = vmatprep.subr.bf16.mxu0 %v2845_v57 }
 0x513   : > { %2737 = vmatmul.mubr.msk.f32.vlgmr.msra.gmra.mrb[4].mxu0 %vm1145_vm2, %v2471_v61  ;;  %v2288_v11 = vpop.permute.xlu1 %2287 }
 0x514   : > { %2848 = vmatpush3.bf16.msra.mxu0 %v2845_v57  ;;  %2747 = vmatprep.mubr.msk.f32.mxu0 %vm1145_vm2, %v2474_v62 }
 0x515   : > { %2850 = vmatprep.subr.bf16.mxu0 %v2849_v63 }
 0x517   : > { %v2293_v10 = vpop.permute.xlu0 %2292  ;;  %v2302_v13 = vpop.permute.xlu1 %2301 }
 0x518   : > { %2852 = vmatpush3.bf16.msra.mxu0 %v2849_v63 }
 0x519   : > { %2854 = vmatprep.subr.bf16.mxu0 %v2853_v3 }
 0x51b   : > { %2748 = vmatmul.mubr.msk.f32.vlgmr.msra.gmra.mrb[4].mxu0 %vm1145_vm2, %v2475_v6  ;;  %v2307_v12 = vpop.permute.xlu0 %2306  ;;  %v2316_v21 = vpop.permute.xlu1 %2315 }
 0x51c   : > { %2856 = vmatpush3.bf16.msra.mxu0 %v2853_v3  ;;  %2758 = vmatprep.mubr.msk.f32.mxu0 %vm1145_vm2, %v2478_v7 }
 0x51d   : > { %2858 = vmatprep.subr.bf16.mxu0 %v2857_v8 }
 0x51f   : > { %v2321_v19 = vpop.permute.xlu0 %2320 }
 0x520   : > { %2860 = vmatpush3.bf16.msra.mxu0 %v2857_v8 }
 0x523   : > { %2759 = vmatmul.mubr.msk.f32.vlgmr.msra.gmra.mrb[4].mxu0 %vm1145_vm2, %v2479_v9 }
 0x5f6   : > { %v2760_v14 = vpop.f32.mrb[4].mxu0 }
 0x5f7   : > { %v2296_v15 = vadd.f32 %v2760_v14, %v2293_v10  ;;  %v2272_v16 = vpop.f32.mrb[5].mxu0 }
 0x5f8   : > { %v2295_v17 = vadd.f32 %v2288_v11, %v2272_v16 }
 0x5f9   : > { %v2310_v18 = vmul.f32 %v2307_v12, %v2296_v15 }
 0x5fa   : > { %v2309_v20 = vmul.f32 %v2302_v13, %v2295_v17 }
 0x5fb   : > { %v2324_v22 = vadd.f32 %v2321_v19, %v2310_v18 }
 0x5fc   : > { %v2323_v23 = vadd.f32 %v2316_v21, %v2309_v20 }
 0x5fd   : > { %2327 = vst.msk [vmem:[%s440_s18 + $0x8] sm:$0xff] %vm2325_vm3, %v2324_v22 }
 0x5fe   : > { %2326 = vst.msk [vmem:[%s440_s18] sm:$0xff] %vm2325_vm3, %v2323_v23 }
 0x5ff PF: > { %s23_s25 = sadd.s32 1, %s3040_s25  }
 0x600   : > { %p20_p4 = scmp.ge.s32.totalorder %s23_s25, 4  }
 0x602   :  { %22 = sbr.rel (!%p20_p4) target bundleno = 1 (0x1), region = 114 }

</bundles_post_ra>
